<compile_context>
chip_gen: v7x
topology: tpu7x:2x2x1
jax: 0.10.0
libtpu: 0.0.40
codegen_flags: <defaults>
</compile_context>

<pallas_src>
import functools

import jax
import jax.numpy as jnp
from jax.experimental import pallas as pl
from jax.experimental.pallas import tpu as pltpu

# ------------------------- model configuration -------------------------
HIDDEN = 32        # hidden_channels
IN_CH = 4          # in_channels (must be >= 4 because of x[:, [0, 3]])
OUT_CH = 2         # out_channels
CONV_LAYERS = 3
MLP_HIDDEN = 64    # internal width of the MLP class (fixed to 64 in PyTorch)
LN_EPS = 1e-5

ROW_TILE = 2048                  # max rows per grid step (8 * power of two)
VMEM_LIMIT = 32 * 1024 * 1024    # explicit scoped-VMEM budget; actual working
                                 # sets are only a few MiB (safe on v5e/v6e/v7x)


def _round_up(n, m):
    return ((n + m - 1) // m) * m


def _choose_rows(rows, row_tile=ROW_TILE):
    """Pick (padded_rows, tile).  tile = 8 * 2**k, >= 2 tiles whenever rows
    allow it (keeps v7x's second TensorCore busy), padding waste <= ~12.5%."""
    r8 = _round_up(max(rows, 1), 8)
    tile = 8
    while (tile * 2 <= row_tile and tile * 4 <= r8
           and _round_up(r8, tile * 2) * 8 <= r8 * 9):
        tile *= 2
    return _round_up(r8, tile), tile


def _lane_tile(total, cap=512):
    """Tile along a lane-blocked axis: multiple of 128 dividing `total` (<=cap),
    otherwise the full extent (then the block equals the array dim)."""
    t = cap
    while t >= 128:
        if total % t == 0:
            return t
        t //= 2
    return total


# ------------------------------ kernels ------------------------------
def _dot(a, b):
    return jnp.dot(a, b, preferred_element_type=jnp.float32)


def _ln(x, g, b):
    mu = jnp.mean(x, axis=-1, keepdims=True)
    var = jnp.mean(jnp.square(x - mu), axis=-1, keepdims=True)
    return (x - mu) * jax.lax.rsqrt(var + LN_EPS) * g + b


def _mlp_tail(h1, w2, b2, w3, b3, g, be, w4, b4):
    # MLP after its first (pre-activation) Linear:
    # ReLU -> Linear -> ReLU -> Linear -> ReLU -> LayerNorm -> Linear
    h = jnp.maximum(h1, 0.0)
    h = jnp.maximum(_dot(h, w2) + b2, 0.0)
    h = jnp.maximum(_dot(h, w3) + b3, 0.0)
    h = _ln(h, g, be)
    return _dot(h, w4) + b4


def _mlp_kernel(x_ref, w1_ref, wh_ref, w4_ref, bias_ref, b4_ref, out_ref):
    # Encoders: plain MLP on a row tile.  Packed params:
    #   wh = [w2; w3] (K-stacked), bias rows = [b1, b2, b3, ln_g, ln_b].
    M = MLP_HIDDEN
    h1 = _dot(x_ref[...], w1_ref[...]) + bias_ref[0:1, :]
    out_ref[...] = _mlp_tail(h1,
                             wh_ref[0:M, :], bias_ref[1:2, :],
                             wh_ref[M:2 * M, :], bias_ref[2:3, :],
                             bias_ref[3:4, :], bias_ref[4:5, :],
                             w4_ref[...], b4_ref[...])


def _edge_msg_kernel(xr_ref, xc_ref, e_ref,
                     wxr_ref, wo_ref, wh_ref, w4_ref, bias_ref, b4_ref,
                     e_out_ref, msg_out_ref):
    # Fused EdgeModel MLP (residual) + NodeModel.node_mlp_1, per edge tile.
    # First-layer weights are split per operand (concat eliminated; u == 0
    # block dropped).  xr hits one [H, 128] weight (edge + node blocks stacked
    # along N) -> single MXU push instead of two K=32/N=64 matmuls.
    H = e_ref.shape[1]
    M = MLP_HIDDEN
    xr, xc, e = xr_ref[...], xc_ref[...], e_ref[...]
    t = _dot(xr, wxr_ref[...])                                   # [tile, 2M]

    # EdgeModel: e_new = e + MLP(cat([x[row], x[col], e, u]));  u == 0.
    h1e = (t[:, 0:M] + _dot(xc, wo_ref[0:H, :]) + _dot(e, wo_ref[H:2 * H, :])
           + bias_ref[0:1, :])
    e_new = e + _mlp_tail(h1e,
                          wh_ref[0:M, :], bias_ref[1:2, :],
                          wh_ref[M:2 * M, :], bias_ref[2:3, :],
                          bias_ref[3:4, :], bias_ref[4:5, :],
                          w4_ref[0:M, :], b4_ref[0:1, :])
    e_out_ref[...] = e_new

    # NodeModel.node_mlp_1 on cat([x[row], e_new])  (e_new stays in VMEM).
    h1n = t[:, M:2 * M] + _dot(e_new, wo_ref[2 * H:3 * H, :]) + bias_ref[5:6, :]
    msg_out_ref[...] = _mlp_tail(h1n,
                                 wh_ref[2 * M:3 * M, :], bias_ref[6:7, :],
                                 wh_ref[3 * M:4 * M, :], bias_ref[7:8, :],
                                 bias_ref[8:9, :], bias_ref[9:10, :],
                                 w4_ref[M:2 * M, :], b4_ref[1:2, :])


def _scatter_node_kernel(idx_ref, msg_ref, x_ref,
                         w1_ref, wh_ref, w4_ref, bias_ref, b4_ref,
                         out_ref, acc_ref):
    # Fused scatter_sum(msg, col) + NodeModel.node_mlp_2 (+ residual):
    # grid = (node tiles [parallel], edge tiles [arbitrary]).  agg never
    # leaves VMEM; node_mlp_2 runs at the last edge tile.
    k = pl.program_id(1)

    @pl.when(k == 0)
    def _():
        acc_ref[...] = jnp.zeros_like(acc_ref)

    tn = acc_ref.shape[0]
    te = msg_ref.shape[0]
    base = pl.program_id(0) * tn
    seg = base + jax.lax.broadcasted_iota(jnp.int32, (tn, te), 0)
    onehot = (seg == idx_ref[...]).astype(jnp.float32)   # pad idx = -1 -> 0
    acc_ref[...] += _dot(onehot, msg_ref[...])

    @pl.when(k == pl.num_programs(1) - 1)
    def _():
        H = x_ref.shape[1]
        M = MLP_HIDDEN
        x = x_ref[...]
        h1 = (_dot(x, w1_ref[0:H, :]) + _dot(acc_ref[...], w1_ref[H:2 * H, :])
              + bias_ref[0:1, :])
        out_ref[...] = x + _mlp_tail(h1,
                                     wh_ref[0:M, :], bias_ref[1:2, :],
                                     wh_ref[M:2 * M, :], bias_ref[2:3, :],
                                     bias_ref[3:4, :], bias_ref[4:5, :],
                                     w4_ref[...], b4_ref[...])


def _pool_decode_kernel(idx_ref, x_ref,
                        w1_ref, b1_ref, ln2_ref, w2_ref, b2_ref,
                        out_ref, acc_ref):
    # Fused global_add_pool + per-channel decoders.  LN1 affine is folded into
    # the channel-stacked first weight (w1: [H, C*H]), so all channels share
    # one matmul; padded nodes carry batch = -1 -> ignored.
    k = pl.program_id(0)

    @pl.when(k == 0)
    def _():
        acc_ref[...] = jnp.zeros_like(acc_ref)

    s_pad = acc_ref.shape[0]
    tn = x_ref.shape[0]
    seg = jax.lax.broadcasted_iota(jnp.int32, (s_pad, tn), 0)
    onehot = (seg == idx_ref[...]).astype(jnp.float32)
    acc_ref[...] += _dot(onehot, x_ref[...])

    @pl.when(k == pl.num_programs(0) - 1)
    def _():
        xg = acc_ref[...]                                  # [S_pad, H]
        H = xg.shape[1]
        C = w2_ref.shape[0]
        mu = jnp.mean(xg, axis=-1, keepdims=True)
        var = jnp.mean(jnp.square(xg - mu), axis=-1, keepdims=True)
        xn = (xg - mu) * jax.lax.rsqrt(var + LN_EPS)       # shared normalization
        h = _dot(xn, w1_ref[...]) + b1_ref[...]            # [S_pad, C*H]
        cols = []
        for c in range(C):                                 # static unroll
            hc = h[:, c * H:(c + 1) * H]
            hn = _ln(hc, ln2_ref[c:c + 1, :], ln2_ref[C + c:C + c + 1, :])
            cols.append(jnp.sum(hn * w2_ref[c:c + 1, :], axis=-1, keepdims=True)
                        + b2_ref[:, c:c + 1])
        out_ref[...] = jnp.concatenate(cols, axis=1)[:out_ref.shape[0], :]


# ------------------------------ wrappers ------------------------------
def _cparams(*sems):
    return pltpu.CompilerParams(dimension_semantics=sems,
                                vmem_limit_bytes=VMEM_LIMIT)


def _row_spec(tile, width):
    return pl.BlockSpec((tile, width), lambda i: (i, 0))


def _const_specs(ws):
    # Whole-array weight blocks with constant index maps: DMA'd once and kept
    # VMEM-resident across all grid steps.
    return [pl.BlockSpec(w.shape, lambda *_: (0, 0)) for w in ws]


def _w(p):
    return [p['w1'], p['wh'], p['w4'], p['bias'], p['b4']]


def mlp_apply(x, p, tile):
    """Row-tiled MLP (node / edge encoders)."""
    rows, fin = x.shape
    ws = _w(p)
    n_out = p['w4'].shape[1]
    return pl.pallas_call(
        _mlp_kernel,
        grid=(rows // tile,),
        in_specs=[_row_spec(tile, fin)] + _const_specs(ws),
        out_specs=_row_spec(tile, n_out),
        out_shape=jax.ShapeDtypeStruct((rows, n_out), jnp.float32),
        compiler_params=_cparams("parallel"),
    )(x, *ws)


def edge_msg_apply(xr, xc, e, p, tile):
    """Fused EdgeModel MLP (residual) + node_mlp_1, tiled over edges."""
    rows, h = e.shape
    ws = [p['wxr'], p['wo'], p['wh'], p['w4'], p['bias'], p['b4']]
    sds = jax.ShapeDtypeStruct((rows, h), jnp.float32)
    return pl.pallas_call(
        _edge_msg_kernel,
        grid=(rows // tile,),
        in_specs=[_row_spec(tile, h)] * 3 + _const_specs(ws),
        out_specs=(_row_spec(tile, h), _row_spec(tile, h)),
        out_shape=(sds, sds),
        compiler_params=_cparams("parallel"),
    )(xr, xc, e, *ws)


def scatter_node_apply(idx, msg, x, p, tn, te):
    """Fused scatter_sum(msg, idx) + node_mlp_2 residual update of x."""
    n_pad, h = x.shape
    e_pad = msg.shape[0]
    ws = _w(p)
    idx2 = idx.reshape(1, e_pad).astype(jnp.int32)
    return pl.pallas_call(
        _scatter_node_kernel,
        grid=(n_pad // tn, e_pad // te),
        in_specs=[pl.BlockSpec((1, te), lambda s, k: (0, k)),
                  pl.BlockSpec((te, h), lambda s, k: (k, 0)),
                  pl.BlockSpec((tn, h), lambda s, k: (s, 0))] + _const_specs(ws),
        out_specs=pl.BlockSpec((tn, h), lambda s, k: (s, 0)),
        out_shape=jax.ShapeDtypeStruct((n_pad, h), jnp.float32),
        scratch_shapes=[pltpu.VMEM((tn, h), jnp.float32)],
        compiler_params=_cparams("parallel", "arbitrary"),
    )(idx2, msg, x, *ws)


def pool_decode_apply(batch_idx, x, p, num_graphs, tn):
    """Fused global_add_pool + per-output-channel decoders."""
    n_pad, h = x.shape
    s_pad = _round_up(num_graphs, 8)
    c = p['w2'].shape[0]
    ws = [p['w1'], p['b1'], p['ln2'], p['w2'], p['b2']]
    idx2 = batch_idx.reshape(1, n_pad).astype(jnp.int32)
    return pl.pallas_call(
        _pool_decode_kernel,
        grid=(n_pad // tn,),
        in_specs=[pl.BlockSpec((1, tn), lambda k: (0, k)),
                  pl.BlockSpec((tn, h), lambda k: (k, 0))] + _const_specs(ws),
        out_specs=pl.BlockSpec((num_graphs, c), lambda k: (0, 0)),
        out_shape=jax.ShapeDtypeStruct((num_graphs, c), jnp.float32),
        scratch_shapes=[pltpu.VMEM((s_pad, h), jnp.float32)],
        compiler_params=_cparams("arbitrary"),
    )(idx2, x, *ws)


# --------------------------- parameter init ---------------------------
def _init_linear(key, n_in, n_out):
    w = jax.random.normal(key, (n_in, n_out), jnp.float32) / jnp.sqrt(
        jnp.float32(n_in))
    b = jnp.zeros((1, n_out), jnp.float32)
    return w, b


def _init_mlp(key, n_in, n_out, hidden=MLP_HIDDEN):
    k1, k2, k3, k4 = jax.random.split(key, 4)
    w1, b1 = _init_linear(k1, n_in, hidden)
    w2, b2 = _init_linear(k2, hidden, hidden)
    w3, b3 = _init_linear(k3, hidden, hidden)
    w4, b4 = _init_linear(k4, hidden, n_out)
    return dict(w1=w1, b1=b1, w2=w2, b2=b2, w3=w3, b3=b3,
                g=jnp.ones((1, hidden), jnp.float32),
                be=jnp.zeros((1, hidden), jnp.float32),
                w4=w4, b4=b4)


def _bias_pack(p):
    return jnp.concatenate([p['b1'], p['b2'], p['b3'], p['g'], p['be']], 0)


def _pack_encoder(p):
    return dict(w1=p['w1'],
                wh=jnp.concatenate([p['w2'], p['w3']], 0),
                w4=p['w4'],
                bias=_bias_pack(p),
                b4=p['b4'])


def _pack_edge_layer(ep, np1, h):
    ewa, ewb, ewc = ep['w1'][:h], ep['w1'][h:2 * h], ep['w1'][2 * h:3 * h]
    nwa, nwb = np1['w1'][:h], np1['w1'][h:2 * h]
    return dict(
        wxr=jnp.concatenate([ewa, nwa], axis=1),                   # [H, 2M]
        wo=jnp.concatenate([ewb, ewc, nwb], axis=0),               # [3H, M]
        wh=jnp.concatenate([ep['w2'], ep['w3'], np1['w2'], np1['w3']], 0),
        w4=jnp.concatenate([ep['w4'], np1['w4']], 0),              # [2M, H]
        bias=jnp.concatenate([_bias_pack(ep), _bias_pack(np1)], 0),
        b4=jnp.concatenate([ep['b4'], np1['b4']], 0))


def _pack_node2(p, h):
    return dict(w1=jnp.concatenate([p['w1'][:h], p['w1'][h:2 * h]], 0),
                wh=jnp.concatenate([p['w2'], p['w3']], 0),
                w4=p['w4'],
                bias=_bias_pack(p),
                b4=p['b4'])


def _pack_decoder(g1, bn1, w1, bb1, g2, bn2, w2, bb2):
    # Fold LN1 affine into the first Linear; stack channels along N.
    C = w1.shape[0]
    w1f = g1[:, :, None] * w1                                      # [C,H,H]
    b1f = jnp.einsum('ch,chk->ck', bn1, w1) + bb1                  # [C,H]
    return dict(
        w1=jnp.concatenate([w1f[c] for c in range(C)], axis=1),    # [H, C*H]
        b1=b1f.reshape(1, -1),
        ln2=jnp.concatenate([g2, bn2], axis=0),                    # [2C, H]
        w2=w2[:, :, 0],                                            # [C, H]
        b2=bb2.reshape(1, C))


def init_params(key, hidden=HIDDEN, in_ch=IN_CH, out_ch=OUT_CH,
                conv_layers=CONV_LAYERS):
    keys = jax.random.split(key, 3 + conv_layers)
    params = {
        'node_enc': _pack_encoder(_init_mlp(keys[0], in_ch, hidden)),
        'edge_enc': _pack_encoder(_init_mlp(keys[1], 3, hidden)),
    }
    convs = []
    for i in range(conv_layers):
        ka, kb, kc = jax.random.split(keys[2 + i], 3)
        e_raw = _init_mlp(ka, hidden * 4, hidden)    # EdgeModel.mlp
        n1_raw = _init_mlp(kb, hidden * 2, hidden)   # NodeModel.node_mlp_1
        n2_raw = _init_mlp(kc, hidden * 3, hidden)   # NodeModel.node_mlp_2
        convs.append(dict(edge=_pack_edge_layer(e_raw, n1_raw, hidden),
                          node2=_pack_node2(n2_raw, hidden)))
    params['convs'] = convs

    kds = jax.random.split(keys[2 + conv_layers], 2 * out_ch)
    w1 = jnp.stack([jax.random.normal(kds[2 * c], (hidden, hidden), jnp.float32)
                    / jnp.sqrt(jnp.float32(hidden)) for c in range(out_ch)])
    w2 = jnp.stack([jax.random.normal(kds[2 * c + 1], (hidden, 1), jnp.float32)
                    / jnp.sqrt(jnp.float32(hidden)) for c in range(out_ch)])
    params['decoder'] = _pack_decoder(
        g1=jnp.ones((out_ch, hidden), jnp.float32),
        bn1=jnp.zeros((out_ch, hidden), jnp.float32),
        w1=w1, bb1=jnp.zeros((out_ch, hidden), jnp.float32),
        g2=jnp.ones((out_ch, hidden), jnp.float32),
        bn2=jnp.zeros((out_ch, hidden), jnp.float32),
        w2=w2, bb2=jnp.zeros((out_ch, 1), jnp.float32))
    return params


# ------------------------------ forward ------------------------------
@functools.partial(jax.jit, static_argnames=("num_graphs",))
def meta_edge_forward(x_nodes, edge_index, edge_attr, batch, params,
                      num_graphs):
    """MetaEdge.forward (agg='sum', variance=0, rho=0, global_model=None)."""
    n = x_nodes.shape[0]
    m = edge_attr.shape[0]

    # Pad node / edge row counts ONCE so every row-tiled kernel sees aligned
    # shapes with >= 2 parallel tiles when possible.  Padded scatter indices
    # are -1 (masked), padded gather indices are 0 (results discarded).
    n_pad, n_tile = _choose_rows(n)
    e_pad, e_tile = _choose_rows(m)
    tn_node = min(n_tile, 1024)      # node tile for the fused scatter kernel
    te_scat = _lane_tile(e_pad)      # lane-legal edge tile for the index array
    tn_pool = _lane_tile(n_pad)      # lane-legal node tile for pooling

    xp = jnp.pad(x_nodes.astype(jnp.float32), ((0, n_pad - n), (0, 0)))
    batch_p = jnp.pad(batch.astype(jnp.int32), (0, n_pad - n),
                      constant_values=-1)
    row = jnp.pad(edge_index[0].astype(jnp.int32), (0, e_pad - m))
    col = jnp.pad(edge_index[1].astype(jnp.int32), (0, e_pad - m))
    col_scatter = jnp.pad(edge_index[1].astype(jnp.int32), (0, e_pad - m),
                          constant_values=-1)
    ea = jnp.pad(edge_attr.astype(jnp.float32), (0, e_pad - m))

    # node encoder
    x = mlp_apply(xp, params['node_enc'], n_tile)                  # [Np, H]

    # edge encoder: cat([edge_attr, e_feat[src] - e_feat[dst]], -1) -> MLP
    e_feat = xp[:, jnp.array([0, 3])]                              # [Np, 2]
    e_encode = jnp.concatenate(
        [ea.reshape(-1, 1),
         jnp.take(e_feat, row, axis=0) - jnp.take(e_feat, col, axis=0)],
        axis=-1)                                                   # [Ep, 3]
    e = mlp_apply(e_encode, params['edge_enc'], e_tile)            # [Ep, H]

    # globals u are identically zero and never updated (global_model=None);
    # their first-layer matmul contribution is exactly zero -> dropped.
    for conv in params['convs']:
        # TODO(synk): x[row]/x[col] gathers stay in XLA (see header note).
        xr = jnp.take(x, row, axis=0)                              # [Ep, H]
        xc = jnp.take(x, col, axis=0)                              # [Ep, H]
        # fused EdgeModel (residual) + node_mlp_1
        e, msg = edge_msg_apply(xr, xc, e, conv['edge'], e_tile)
        # fused scatter_sum + node_mlp_2 (residual); agg never leaves VMEM
        x = scatter_node_apply(col_scatter, msg, x, conv['node2'],
                               tn_node, te_scat)

    # fused global_add_pool + per-channel decoders (LN -> Linear, x2;
    # decode activation treated as identity, see TODO above).
    return pool_decode_apply(batch_p, x, params['decoder'], num_graphs,
                             tn_pool)                              # [B, C]


# -------------------------------- main --------------------------------
if __name__ == "__main__":
    key = jax.random.PRNGKey(0)
    kp, kx, ke, k1, k2, k3, k4 = jax.random.split(key, 7)

    params = init_params(kp)

    # small two-graph batch: 6 nodes per graph, 12 directed edges per graph
    num_graphs = 2
    n_nodes, n_edges = 12, 24
    batch = jnp.concatenate([jnp.zeros(6, jnp.int32), jnp.ones(6, jnp.int32)])
    src0 = jax.random.randint(k1, (12,), 0, 6)
    dst0 = jax.random.randint(k2, (12,), 0, 6)
    src1 = jax.random.randint(k3, (12,), 6, 12)
    dst1 = jax.random.randint(k4, (12,), 6, 12)
    edge_index = jnp.stack([jnp.concatenate([src0, src1]),
                            jnp.concatenate([dst0, dst1])]).astype(jnp.int32)

    x_nodes = jax.random.normal(kx, (n_nodes, IN_CH), jnp.float32)
    edge_attr = jax.random.normal(ke, (n_edges,), jnp.float32)

    out = meta_edge_forward(x_nodes, edge_index, edge_attr, batch, params,
                            num_graphs=num_graphs)
    jax.block_until_ready(out)
    assert out.shape == (num_graphs, OUT_CH) and out.dtype == jnp.float32
    print("KERNEL_OK")
</pallas_src>

<mosaic_0001>
module attributes {stable_mosaic.version = 11 : i64} {
  func.func @_mlp_kernel(%arg0: i32, %arg1: memref<8x3xf32, #tpu.memory_space<vmem>>, %arg2: memref<3x64xf32, #tpu.memory_space<vmem>>, %arg3: memref<128x64xf32, #tpu.memory_space<vmem>>, %arg4: memref<64x32xf32, #tpu.memory_space<vmem>>, %arg5: memref<5x64xf32, #tpu.memory_space<vmem>>, %arg6: memref<1x32xf32, #tpu.memory_space<vmem>>, %arg7: memref<8x32xf32, #tpu.memory_space<vmem>>) attributes {dimension_semantics = [#tpu.dimension_semantics<parallel>], iteration_bounds = array<i64: 3>, scalar_prefetch = 0 : i64, scratch_operands = 0 : i64, tpu.core_type = #tpu.core_type<tc>, window_params = [{transform_indices = @transform_0, window_bounds = array<i64: 8, 3>}, {pipeline_mode = #tpu.pipeline_mode<synchronous>, transform_indices = @transform_1, window_bounds = array<i64: 3, 64>}, {pipeline_mode = #tpu.pipeline_mode<synchronous>, transform_indices = @transform_2, window_bounds = array<i64: 128, 64>}, {pipeline_mode = #tpu.pipeline_mode<synchronous>, transform_indices = @transform_3, window_bounds = array<i64: 64, 32>}, {pipeline_mode = #tpu.pipeline_mode<synchronous>, transform_indices = @transform_4, window_bounds = array<i64: 5, 64>}, {pipeline_mode = #tpu.pipeline_mode<synchronous>, transform_indices = @transform_5, window_bounds = array<i64: 1, 32>}, {transform_indices = @transform_6, window_bounds = array<i64: 8, 32>}]} {
    %c0 = arith.constant 0 : index
    %c0_0 = arith.constant 0 : index
    %0 = vector.load %arg1[%c0, %c0_0] : memref<8x3xf32, #tpu.memory_space<vmem>>, vector<8x3xf32>
    %c0_1 = arith.constant 0 : index
    %c0_2 = arith.constant 0 : index
    %1 = vector.load %arg2[%c0_1, %c0_2] : memref<3x64xf32, #tpu.memory_space<vmem>>, vector<3x64xf32>
    %cst = arith.constant dense<0.000000e+00> : vector<8x64xf32>
    %2 = tpu.matmul %0, %1, %cst {dimension_numbers = #tpu.dot_dimension_numbers<[1], [0], [0], [1], [0, 0, 1, 1], [], []>} : vector<8x3xf32>, vector<3x64xf32>, vector<8x64xf32> -> vector<8x64xf32>
    %c0_3 = arith.constant 0 : index
    %c0_4 = arith.constant 0 : index
    %3 = vector.load %arg5[%c0_3, %c0_4] : memref<5x64xf32, #tpu.memory_space<vmem>>, vector<1x64xf32>
    %4 = vector.broadcast %3 : vector<1x64xf32> to vector<8x64xf32>
    %5 = arith.addf %2, %4 : vector<8x64xf32>
    %c0_5 = arith.constant 0 : index
    %c0_6 = arith.constant 0 : index
    %6 = vector.load %arg3[%c0_5, %c0_6] : memref<128x64xf32, #tpu.memory_space<vmem>>, vector<64x64xf32>
    %c1 = arith.constant 1 : index
    %c0_7 = arith.constant 0 : index
    %7 = vector.load %arg5[%c1, %c0_7] : memref<5x64xf32, #tpu.memory_space<vmem>>, vector<1x64xf32>
    %c64 = arith.constant 64 : index
    %c0_8 = arith.constant 0 : index
    %8 = vector.load %arg3[%c64, %c0_8] : memref<128x64xf32, #tpu.memory_space<vmem>>, vector<64x64xf32>
    %c2 = arith.constant 2 : index
    %c0_9 = arith.constant 0 : index
    %9 = vector.load %arg5[%c2, %c0_9] : memref<5x64xf32, #tpu.memory_space<vmem>>, vector<1x64xf32>
    %c3 = arith.constant 3 : index
    %c0_10 = arith.constant 0 : index
    %10 = vector.load %arg5[%c3, %c0_10] : memref<5x64xf32, #tpu.memory_space<vmem>>, vector<1x64xf32>
    %c4 = arith.constant 4 : index
    %c0_11 = arith.constant 0 : index
    %11 = vector.load %arg5[%c4, %c0_11] : memref<5x64xf32, #tpu.memory_space<vmem>>, vector<1x64xf32>
    %c0_12 = arith.constant 0 : index
    %c0_13 = arith.constant 0 : index
    %12 = vector.load %arg4[%c0_12, %c0_13] : memref<64x32xf32, #tpu.memory_space<vmem>>, vector<64x32xf32>
    %c0_14 = arith.constant 0 : index
    %c0_15 = arith.constant 0 : index
    %13 = vector.load %arg6[%c0_14, %c0_15] : memref<1x32xf32, #tpu.memory_space<vmem>>, vector<1x32xf32>
    %cst_16 = arith.constant 0.000000e+00 : f32
    %14 = vector.broadcast %cst_16 : f32 to vector<8x64xf32>
    %15 = arith.maximumf %5, %14 : vector<8x64xf32>
    %cst_17 = arith.constant dense<0.000000e+00> : vector<8x64xf32>
    %16 = tpu.matmul %15, %6, %cst_17 {dimension_numbers = #tpu.dot_dimension_numbers<[1], [0], [0], [1], [0, 0, 1, 1], [], []>} : vector<8x64xf32>, vector<64x64xf32>, vector<8x64xf32> -> vector<8x64xf32>
    %17 = vector.broadcast %7 : vector<1x64xf32> to vector<8x64xf32>
    %18 = arith.addf %16, %17 : vector<8x64xf32>
    %cst_18 = arith.constant 0.000000e+00 : f32
    %19 = vector.broadcast %cst_18 : f32 to vector<8x64xf32>
    %20 = arith.maximumf %18, %19 : vector<8x64xf32>
    %cst_19 = arith.constant dense<0.000000e+00> : vector<8x64xf32>
    %21 = tpu.matmul %20, %8, %cst_19 {dimension_numbers = #tpu.dot_dimension_numbers<[1], [0], [0], [1], [0, 0, 1, 1], [], []>} : vector<8x64xf32>, vector<64x64xf32>, vector<8x64xf32> -> vector<8x64xf32>
    %22 = vector.broadcast %9 : vector<1x64xf32> to vector<8x64xf32>
    %23 = arith.addf %21, %22 : vector<8x64xf32>
    %cst_20 = arith.constant 0.000000e+00 : f32
    %24 = vector.broadcast %cst_20 : f32 to vector<8x64xf32>
    %25 = arith.maximumf %23, %24 : vector<8x64xf32>
    %cst_21 = arith.constant dense<0.000000e+00> : vector<8xf32>
    %26 = vector.multi_reduction <add>, %25, %cst_21 [1] : vector<8x64xf32> to vector<8xf32>
    %27 = vector.shape_cast %26 : vector<8xf32> to vector<8x1xf32>
    %cst_22 = arith.constant 6.400000e+01 : f32
    %28 = vector.broadcast %cst_22 : f32 to vector<8x1xf32>
    %29 = arith.divf %27, %28 : vector<8x1xf32>
    %30 = vector.broadcast %29 : vector<8x1xf32> to vector<8x64xf32>
    %31 = arith.subf %25, %30 : vector<8x64xf32>
    %32 = arith.mulf %31, %31 : vector<8x64xf32>
    %cst_23 = arith.constant dense<0.000000e+00> : vector<8xf32>
    %33 = vector.multi_reduction <add>, %32, %cst_23 [1] : vector<8x64xf32> to vector<8xf32>
    %34 = vector.shape_cast %33 : vector<8xf32> to vector<8x1xf32>
    %cst_24 = arith.constant 6.400000e+01 : f32
    %35 = vector.broadcast %cst_24 : f32 to vector<8x1xf32>
    %36 = arith.divf %34, %35 : vector<8x1xf32>
    %37 = vector.broadcast %29 : vector<8x1xf32> to vector<8x64xf32>
    %38 = arith.subf %25, %37 : vector<8x64xf32>
    %cst_25 = arith.constant 9.99999974E-6 : f32
    %39 = vector.broadcast %cst_25 : f32 to vector<8x1xf32>
    %40 = arith.addf %36, %39 : vector<8x1xf32>
    %41 = math.rsqrt %40 : vector<8x1xf32>
    %42 = vector.broadcast %41 : vector<8x1xf32> to vector<8x64xf32>
    %43 = arith.mulf %38, %42 : vector<8x64xf32>
    %44 = vector.broadcast %10 : vector<1x64xf32> to vector<8x64xf32>
    %45 = arith.mulf %43, %44 : vector<8x64xf32>
    %46 = vector.broadcast %11 : vector<1x64xf32> to vector<8x64xf32>
    %47 = arith.addf %45, %46 : vector<8x64xf32>
    %cst_26 = arith.constant dense<0.000000e+00> : vector<8x32xf32>
    %48 = tpu.matmul %47, %12, %cst_26 {dimension_numbers = #tpu.dot_dimension_numbers<[1], [0], [0], [1], [0, 0, 1, 1], [], []>} : vector<8x64xf32>, vector<64x32xf32>, vector<8x32xf32> -> vector<8x32xf32>
    %49 = vector.broadcast %13 : vector<1x32xf32> to vector<8x32xf32>
    %50 = arith.addf %48, %49 : vector<8x32xf32>
    %c0_27 = arith.constant 0 : index
    %c0_28 = arith.constant 0 : index
    %51 = vector.load %arg7[%c0_27, %c0_28] : memref<8x32xf32, #tpu.memory_space<vmem>>, vector<8x32xf32>
    tpu.vector_store %arg7[%c0_27, %c0_28], %50 {strides = array<i32>} : memref<8x32xf32, #tpu.memory_space<vmem>>, vector<8x32xf32>,
    return
  }
  func.func @transform_0(%arg0: i32) -> (i32, i32) {
    %c0_i32 = arith.constant 0 : i32
    %c0_i32_0 = arith.constant 0 : i32
    return %arg0, %c0_i32 : i32, i32
  }
  func.func @transform_1(%arg0: i32) -> (i32, i32) {
    %c0_i32 = arith.constant 0 : i32
    %c0_i32_0 = arith.constant 0 : i32
    %c0_i32_1 = arith.constant 0 : i32
    return %c0_i32, %c0_i32_0 : i32, i32
  }
  func.func @transform_2(%arg0: i32) -> (i32, i32) {
    %c0_i32 = arith.constant 0 : i32
    %c0_i32_0 = arith.constant 0 : i32
    %c0_i32_1 = arith.constant 0 : i32
    return %c0_i32, %c0_i32_0 : i32, i32
  }
  func.func @transform_3(%arg0: i32) -> (i32, i32) {
    %c0_i32 = arith.constant 0 : i32
    %c0_i32_0 = arith.constant 0 : i32
    %c0_i32_1 = arith.constant 0 : i32
    return %c0_i32, %c0_i32_0 : i32, i32
  }
  func.func @transform_4(%arg0: i32) -> (i32, i32) {
    %c0_i32 = arith.constant 0 : i32
    %c0_i32_0 = arith.constant 0 : i32
    %c0_i32_1 = arith.constant 0 : i32
    return %c0_i32, %c0_i32_0 : i32, i32
  }
  func.func @transform_5(%arg0: i32) -> (i32, i32) {
    %c0_i32 = arith.constant 0 : i32
    %c0_i32_0 = arith.constant 0 : i32
    %c0_i32_1 = arith.constant 0 : i32
    return %c0_i32, %c0_i32_0 : i32, i32
  }
  func.func @transform_6(%arg0: i32) -> (i32, i32) {
    %c0_i32 = arith.constant 0 : i32
    %c0_i32_0 = arith.constant 0 : i32
    return %arg0, %c0_i32 : i32, i32
  }
}

module attributes {stable_mosaic.version = 11 : i64} {
  func.func @_mlp_kernel(%arg0: i32, %arg1: memref<8x4xf32, #tpu.memory_space<vmem>>, %arg2: memref<4x64xf32, #tpu.memory_space<vmem>>, %arg3: memref<128x64xf32, #tpu.memory_space<vmem>>, %arg4: memref<64x32xf32, #tpu.memory_space<vmem>>, %arg5: memref<5x64xf32, #tpu.memory_space<vmem>>, %arg6: memref<1x32xf32, #tpu.memory_space<vmem>>, %arg7: memref<8x32xf32, #tpu.memory_space<vmem>>) attributes {dimension_semantics = [#tpu.dimension_semantics<parallel>], iteration_bounds = array<i64: 2>, scalar_prefetch = 0 : i64, scratch_operands = 0 : i64, tpu.core_type = #tpu.core_type<tc>, window_params = [{transform_indices = @transform_0, window_bounds = array<i64: 8, 4>}, {pipeline_mode = #tpu.pipeline_mode<synchronous>, transform_indices = @transform_1, window_bounds = array<i64: 4, 64>}, {pipeline_mode = #tpu.pipeline_mode<synchronous>, transform_indices = @transform_2, window_bounds = array<i64: 128, 64>}, {pipeline_mode = #tpu.pipeline_mode<synchronous>, transform_indices = @transform_3, window_bounds = array<i64: 64, 32>}, {pipeline_mode = #tpu.pipeline_mode<synchronous>, transform_indices = @transform_4, window_bounds = array<i64: 5, 64>}, {pipeline_mode = #tpu.pipeline_mode<synchronous>, transform_indices = @transform_5, window_bounds = array<i64: 1, 32>}, {transform_indices = @transform_6, window_bounds = array<i64: 8, 32>}]} {
    %c0 = arith.constant 0 : index
    %c0_0 = arith.constant 0 : index
    %0 = vector.load %arg1[%c0, %c0_0] : memref<8x4xf32, #tpu.memory_space<vmem>>, vector<8x4xf32>
    %c0_1 = arith.constant 0 : index
    %c0_2 = arith.constant 0 : index
    %1 = vector.load %arg2[%c0_1, %c0_2] : memref<4x64xf32, #tpu.memory_space<vmem>>, vector<4x64xf32>
    %cst = arith.constant dense<0.000000e+00> : vector<8x64xf32>
    %2 = tpu.matmul %0, %1, %cst {dimension_numbers = #tpu.dot_dimension_numbers<[1], [0], [0], [1], [0, 0, 1, 1], [], []>} : vector<8x4xf32>, vector<4x64xf32>, vector<8x64xf32> -> vector<8x64xf32>
    %c0_3 = arith.constant 0 : index
    %c0_4 = arith.constant 0 : index
    %3 = vector.load %arg5[%c0_3, %c0_4] : memref<5x64xf32, #tpu.memory_space<vmem>>, vector<1x64xf32>
    %4 = vector.broadcast %3 : vector<1x64xf32> to vector<8x64xf32>
    %5 = arith.addf %2, %4 : vector<8x64xf32>
    %c0_5 = arith.constant 0 : index
    %c0_6 = arith.constant 0 : index
    %6 = vector.load %arg3[%c0_5, %c0_6] : memref<128x64xf32, #tpu.memory_space<vmem>>, vector<64x64xf32>
    %c1 = arith.constant 1 : index
    %c0_7 = arith.constant 0 : index
    %7 = vector.load %arg5[%c1, %c0_7] : memref<5x64xf32, #tpu.memory_space<vmem>>, vector<1x64xf32>
    %c64 = arith.constant 64 : index
    %c0_8 = arith.constant 0 : index
    %8 = vector.load %arg3[%c64, %c0_8] : memref<128x64xf32, #tpu.memory_space<vmem>>, vector<64x64xf32>
    %c2 = arith.constant 2 : index
    %c0_9 = arith.constant 0 : index
    %9 = vector.load %arg5[%c2, %c0_9] : memref<5x64xf32, #tpu.memory_space<vmem>>, vector<1x64xf32>
    %c3 = arith.constant 3 : index
    %c0_10 = arith.constant 0 : index
    %10 = vector.load %arg5[%c3, %c0_10] : memref<5x64xf32, #tpu.memory_space<vmem>>, vector<1x64xf32>
    %c4 = arith.constant 4 : index
    %c0_11 = arith.constant 0 : index
    %11 = vector.load %arg5[%c4, %c0_11] : memref<5x64xf32, #tpu.memory_space<vmem>>, vector<1x64xf32>
    %c0_12 = arith.constant 0 : index
    %c0_13 = arith.constant 0 : index
    %12 = vector.load %arg4[%c0_12, %c0_13] : memref<64x32xf32, #tpu.memory_space<vmem>>, vector<64x32xf32>
    %c0_14 = arith.constant 0 : index
    %c0_15 = arith.constant 0 : index
    %13 = vector.load %arg6[%c0_14, %c0_15] : memref<1x32xf32, #tpu.memory_space<vmem>>, vector<1x32xf32>
    %cst_16 = arith.constant 0.000000e+00 : f32
    %14 = vector.broadcast %cst_16 : f32 to vector<8x64xf32>
    %15 = arith.maximumf %5, %14 : vector<8x64xf32>
    %cst_17 = arith.constant dense<0.000000e+00> : vector<8x64xf32>
    %16 = tpu.matmul %15, %6, %cst_17 {dimension_numbers = #tpu.dot_dimension_numbers<[1], [0], [0], [1], [0, 0, 1, 1], [], []>} : vector<8x64xf32>, vector<64x64xf32>, vector<8x64xf32> -> vector<8x64xf32>
    %17 = vector.broadcast %7 : vector<1x64xf32> to vector<8x64xf32>
    %18 = arith.addf %16, %17 : vector<8x64xf32>
    %cst_18 = arith.constant 0.000000e+00 : f32
    %19 = vector.broadcast %cst_18 : f32 to vector<8x64xf32>
    %20 = arith.maximumf %18, %19 : vector<8x64xf32>
    %cst_19 = arith.constant dense<0.000000e+00> : vector<8x64xf32>
    %21 = tpu.matmul %20, %8, %cst_19 {dimension_numbers = #tpu.dot_dimension_numbers<[1], [0], [0], [1], [0, 0, 1, 1], [], []>} : vector<8x64xf32>, vector<64x64xf32>, vector<8x64xf32> -> vector<8x64xf32>
    %22 = vector.broadcast %9 : vector<1x64xf32> to vector<8x64xf32>
    %23 = arith.addf %21, %22 : vector<8x64xf32>
    %cst_20 = arith.constant 0.000000e+00 : f32
    %24 = vector.broadcast %cst_20 : f32 to vector<8x64xf32>
    %25 = arith.maximumf %23, %24 : vector<8x64xf32>
    %cst_21 = arith.constant dense<0.000000e+00> : vector<8xf32>
    %26 = vector.multi_reduction <add>, %25, %cst_21 [1] : vector<8x64xf32> to vector<8xf32>
    %27 = vector.shape_cast %26 : vector<8xf32> to vector<8x1xf32>
    %cst_22 = arith.constant 6.400000e+01 : f32
    %28 = vector.broadcast %cst_22 : f32 to vector<8x1xf32>
    %29 = arith.divf %27, %28 : vector<8x1xf32>
    %30 = vector.broadcast %29 : vector<8x1xf32> to vector<8x64xf32>
    %31 = arith.subf %25, %30 : vector<8x64xf32>
    %32 = arith.mulf %31, %31 : vector<8x64xf32>
    %cst_23 = arith.constant dense<0.000000e+00> : vector<8xf32>
    %33 = vector.multi_reduction <add>, %32, %cst_23 [1] : vector<8x64xf32> to vector<8xf32>
    %34 = vector.shape_cast %33 : vector<8xf32> to vector<8x1xf32>
    %cst_24 = arith.constant 6.400000e+01 : f32
    %35 = vector.broadcast %cst_24 : f32 to vector<8x1xf32>
    %36 = arith.divf %34, %35 : vector<8x1xf32>
    %37 = vector.broadcast %29 : vector<8x1xf32> to vector<8x64xf32>
    %38 = arith.subf %25, %37 : vector<8x64xf32>
    %cst_25 = arith.constant 9.99999974E-6 : f32
    %39 = vector.broadcast %cst_25 : f32 to vector<8x1xf32>
    %40 = arith.addf %36, %39 : vector<8x1xf32>
    %41 = math.rsqrt %40 : vector<8x1xf32>
    %42 = vector.broadcast %41 : vector<8x1xf32> to vector<8x64xf32>
    %43 = arith.mulf %38, %42 : vector<8x64xf32>
    %44 = vector.broadcast %10 : vector<1x64xf32> to vector<8x64xf32>
    %45 = arith.mulf %43, %44 : vector<8x64xf32>
    %46 = vector.broadcast %11 : vector<1x64xf32> to vector<8x64xf32>
    %47 = arith.addf %45, %46 : vector<8x64xf32>
    %cst_26 = arith.constant dense<0.000000e+00> : vector<8x32xf32>
    %48 = tpu.matmul %47, %12, %cst_26 {dimension_numbers = #tpu.dot_dimension_numbers<[1], [0], [0], [1], [0, 0, 1, 1], [], []>} : vector<8x64xf32>, vector<64x32xf32>, vector<8x32xf32> -> vector<8x32xf32>
    %49 = vector.broadcast %13 : vector<1x32xf32> to vector<8x32xf32>
    %50 = arith.addf %48, %49 : vector<8x32xf32>
    %c0_27 = arith.constant 0 : index
    %c0_28 = arith.constant 0 : index
    %51 = vector.load %arg7[%c0_27, %c0_28] : memref<8x32xf32, #tpu.memory_space<vmem>>, vector<8x32xf32>
    tpu.vector_store %arg7[%c0_27, %c0_28], %50 {strides = array<i32>} : memref<8x32xf32, #tpu.memory_space<vmem>>, vector<8x32xf32>,
    return
  }
  func.func @transform_0(%arg0: i32) -> (i32, i32) {
    %c0_i32 = arith.constant 0 : i32
    %c0_i32_0 = arith.constant 0 : i32
    return %arg0, %c0_i32 : i32, i32
  }
  func.func @transform_1(%arg0: i32) -> (i32, i32) {
    %c0_i32 = arith.constant 0 : i32
    %c0_i32_0 = arith.constant 0 : i32
    %c0_i32_1 = arith.constant 0 : i32
    return %c0_i32, %c0_i32_0 : i32, i32
  }
  func.func @transform_2(%arg0: i32) -> (i32, i32) {
    %c0_i32 = arith.constant 0 : i32
    %c0_i32_0 = arith.constant 0 : i32
    %c0_i32_1 = arith.constant 0 : i32
    return %c0_i32, %c0_i32_0 : i32, i32
  }
  func.func @transform_3(%arg0: i32) -> (i32, i32) {
    %c0_i32 = arith.constant 0 : i32
    %c0_i32_0 = arith.constant 0 : i32
    %c0_i32_1 = arith.constant 0 : i32
    return %c0_i32, %c0_i32_0 : i32, i32
  }
  func.func @transform_4(%arg0: i32) -> (i32, i32) {
    %c0_i32 = arith.constant 0 : i32
    %c0_i32_0 = arith.constant 0 : i32
    %c0_i32_1 = arith.constant 0 : i32
    return %c0_i32, %c0_i32_0 : i32, i32
  }
  func.func @transform_5(%arg0: i32) -> (i32, i32) {
    %c0_i32 = arith.constant 0 : i32
    %c0_i32_0 = arith.constant 0 : i32
    %c0_i32_1 = arith.constant 0 : i32
    return %c0_i32, %c0_i32_0 : i32, i32
  }
  func.func @transform_6(%arg0: i32) -> (i32, i32) {
    %c0_i32 = arith.constant 0 : i32
    %c0_i32_0 = arith.constant 0 : i32
    return %arg0, %c0_i32 : i32, i32
  }
}

module attributes {stable_mosaic.version = 11 : i64} {
  func.func @_edge_msg_kernel(%arg0: i32, %arg1: memref<8x32xf32, #tpu.memory_space<vmem>>, %arg2: memref<8x32xf32, #tpu.memory_space<vmem>>, %arg3: memref<8x32xf32, #tpu.memory_space<vmem>>, %arg4: memref<32x128xf32, #tpu.memory_space<vmem>>, %arg5: memref<96x64xf32, #tpu.memory_space<vmem>>, %arg6: memref<256x64xf32, #tpu.memory_space<vmem>>, %arg7: memref<128x32xf32, #tpu.memory_space<vmem>>, %arg8: memref<10x64xf32, #tpu.memory_space<vmem>>, %arg9: memref<2x32xf32, #tpu.memory_space<vmem>>, %arg10: memref<8x32xf32, #tpu.memory_space<vmem>>, %arg11: memref<8x32xf32, #tpu.memory_space<vmem>>) attributes {dimension_semantics = [#tpu.dimension_semantics<parallel>], iteration_bounds = array<i64: 3>, scalar_prefetch = 0 : i64, scratch_operands = 0 : i64, tpu.core_type = #tpu.core_type<tc>, window_params = [{transform_indices = @transform_0, window_bounds = array<i64: 8, 32>}, {transform_indices = @transform_1, window_bounds = array<i64: 8, 32>}, {transform_indices = @transform_2, window_bounds = array<i64: 8, 32>}, {pipeline_mode = #tpu.pipeline_mode<synchronous>, transform_indices = @transform_3, window_bounds = array<i64: 32, 128>}, {pipeline_mode = #tpu.pipeline_mode<synchronous>, transform_indices = @transform_4, window_bounds = array<i64: 96, 64>}, {pipeline_mode = #tpu.pipeline_mode<synchronous>, transform_indices = @transform_5, window_bounds = array<i64: 256, 64>}, {pipeline_mode = #tpu.pipeline_mode<synchronous>, transform_indices = @transform_6, window_bounds = array<i64: 128, 32>}, {pipeline_mode = #tpu.pipeline_mode<synchronous>, transform_indices = @transform_7, window_bounds = array<i64: 10, 64>}, {pipeline_mode = #tpu.pipeline_mode<synchronous>, transform_indices = @transform_8, window_bounds = array<i64: 2, 32>}, {transform_indices = @transform_9, window_bounds = array<i64: 8, 32>}, {transform_indices = @transform_10, window_bounds = array<i64: 8, 32>}]} {
    %c0 = arith.constant 0 : index
    %c0_0 = arith.constant 0 : index
    %0 = vector.load %arg1[%c0, %c0_0] : memref<8x32xf32, #tpu.memory_space<vmem>>, vector<8x32xf32>
    %c0_1 = arith.constant 0 : index
    %c0_2 = arith.constant 0 : index
    %1 = vector.load %arg2[%c0_1, %c0_2] : memref<8x32xf32, #tpu.memory_space<vmem>>, vector<8x32xf32>
    %c0_3 = arith.constant 0 : index
    %c0_4 = arith.constant 0 : index
    %2 = vector.load %arg3[%c0_3, %c0_4] : memref<8x32xf32, #tpu.memory_space<vmem>>, vector<8x32xf32>
    %c0_5 = arith.constant 0 : index
    %c0_6 = arith.constant 0 : index
    %3 = vector.load %arg4[%c0_5, %c0_6] : memref<32x128xf32, #tpu.memory_space<vmem>>, vector<32x128xf32>
    %cst = arith.constant dense<0.000000e+00> : vector<8x128xf32>
    %4 = tpu.matmul %0, %3, %cst {dimension_numbers = #tpu.dot_dimension_numbers<[1], [0], [0], [1], [0, 0, 1, 1], [], []>} : vector<8x32xf32>, vector<32x128xf32>, vector<8x128xf32> -> vector<8x128xf32>
    %5 = vector.extract_strided_slice %4 {offsets = [0, 0], sizes = [8, 64], strides = [1, 1]} : vector<8x128xf32> to vector<8x64xf32>
    %c0_7 = arith.constant 0 : index
    %c0_8 = arith.constant 0 : index
    %6 = vector.load %arg5[%c0_7, %c0_8] : memref<96x64xf32, #tpu.memory_space<vmem>>, vector<32x64xf32>
    %cst_9 = arith.constant dense<0.000000e+00> : vector<8x64xf32>
    %7 = tpu.matmul %1, %6, %cst_9 {dimension_numbers = #tpu.dot_dimension_numbers<[1], [0], [0], [1], [0, 0, 1, 1], [], []>} : vector<8x32xf32>, vector<32x64xf32>, vector<8x64xf32> -> vector<8x64xf32>
    %8 = arith.addf %5, %7 : vector<8x64xf32>
    %c32 = arith.constant 32 : index
    %c0_10 = arith.constant 0 : index
    %9 = vector.load %arg5[%c32, %c0_10] : memref<96x64xf32, #tpu.memory_space<vmem>>, vector<32x64xf32>
    %cst_11 = arith.constant dense<0.000000e+00> : vector<8x64xf32>
    %10 = tpu.matmul %2, %9, %cst_11 {dimension_numbers = #tpu.dot_dimension_numbers<[1], [0], [0], [1], [0, 0, 1, 1], [], []>} : vector<8x32xf32>, vector<32x64xf32>, vector<8x64xf32> -> vector<8x64xf32>
    %11 = arith.addf %8, %10 : vector<8x64xf32>
    %c0_12 = arith.constant 0 : index
    %c0_13 = arith.constant 0 : index
    %12 = vector.load %arg8[%c0_12, %c0_13] : memref<10x64xf32, #tpu.memory_space<vmem>>, vector<1x64xf32>
    %13 = vector.broadcast %12 : vector<1x64xf32> to vector<8x64xf32>
    %14 = arith.addf %11, %13 : vector<8x64xf32>
    %c0_14 = arith.constant 0 : index
    %c0_15 = arith.constant 0 : index
    %15 = vector.load %arg6[%c0_14, %c0_15] : memref<256x64xf32, #tpu.memory_space<vmem>>, vector<64x64xf32>
    %c1 = arith.constant 1 : index
    %c0_16 = arith.constant 0 : index
    %16 = vector.load %arg8[%c1, %c0_16] : memref<10x64xf32, #tpu.memory_space<vmem>>, vector<1x64xf32>
    %c64 = arith.constant 64 : index
    %c0_17 = arith.constant 0 : index
    %17 = vector.load %arg6[%c64, %c0_17] : memref<256x64xf32, #tpu.memory_space<vmem>>, vector<64x64xf32>
    %c2 = arith.constant 2 : index
    %c0_18 = arith.constant 0 : index
    %18 = vector.load %arg8[%c2, %c0_18] : memref<10x64xf32, #tpu.memory_space<vmem>>, vector<1x64xf32>
    %c3 = arith.constant 3 : index
    %c0_19 = arith.constant 0 : index
    %19 = vector.load %arg8[%c3, %c0_19] : memref<10x64xf32, #tpu.memory_space<vmem>>, vector<1x64xf32>
    %c4 = arith.constant 4 : index
    %c0_20 = arith.constant 0 : index
    %20 = vector.load %arg8[%c4, %c0_20] : memref<10x64xf32, #tpu.memory_space<vmem>>, vector<1x64xf32>
    %c0_21 = arith.constant 0 : index
    %c0_22 = arith.constant 0 : index
    %21 = vector.load %arg7[%c0_21, %c0_22] : memref<128x32xf32, #tpu.memory_space<vmem>>, vector<64x32xf32>
    %c0_23 = arith.constant 0 : index
    %c0_24 = arith.constant 0 : index
    %22 = vector.load %arg9[%c0_23, %c0_24] : memref<2x32xf32, #tpu.memory_space<vmem>>, vector<1x32xf32>
    %cst_25 = arith.constant 0.000000e+00 : f32
    %23 = vector.broadcast %cst_25 : f32 to vector<8x64xf32>
    %24 = arith.maximumf %14, %23 : vector<8x64xf32>
    %cst_26 = arith.constant dense<0.000000e+00> : vector<8x64xf32>
    %25 = tpu.matmul %24, %15, %cst_26 {dimension_numbers = #tpu.dot_dimension_numbers<[1], [0], [0], [1], [0, 0, 1, 1], [], []>} : vector<8x64xf32>, vector<64x64xf32>, vector<8x64xf32> -> vector<8x64xf32>
    %26 = vector.broadcast %16 : vector<1x64xf32> to vector<8x64xf32>
    %27 = arith.addf %25, %26 : vector<8x64xf32>
    %cst_27 = arith.constant 0.000000e+00 : f32
    %28 = vector.broadcast %cst_27 : f32 to vector<8x64xf32>
    %29 = arith.maximumf %27, %28 : vector<8x64xf32>
    %cst_28 = arith.constant dense<0.000000e+00> : vector<8x64xf32>
    %30 = tpu.matmul %29, %17, %cst_28 {dimension_numbers = #tpu.dot_dimension_numbers<[1], [0], [0], [1], [0, 0, 1, 1], [], []>} : vector<8x64xf32>, vector<64x64xf32>, vector<8x64xf32> -> vector<8x64xf32>
    %31 = vector.broadcast %18 : vector<1x64xf32> to vector<8x64xf32>
    %32 = arith.addf %30, %31 : vector<8x64xf32>
    %cst_29 = arith.constant 0.000000e+00 : f32
    %33 = vector.broadcast %cst_29 : f32 to vector<8x64xf32>
    %34 = arith.maximumf %32, %33 : vector<8x64xf32>
    %cst_30 = arith.constant dense<0.000000e+00> : vector<8xf32>
    %35 = vector.multi_reduction <add>, %34, %cst_30 [1] : vector<8x64xf32> to vector<8xf32>
    %36 = vector.shape_cast %35 : vector<8xf32> to vector<8x1xf32>
    %cst_31 = arith.constant 6.400000e+01 : f32
    %37 = vector.broadcast %cst_31 : f32 to vector<8x1xf32>
    %38 = arith.divf %36, %37 : vector<8x1xf32>
    %39 = vector.broadcast %38 : vector<8x1xf32> to vector<8x64xf32>
    %40 = arith.subf %34, %39 : vector<8x64xf32>
    %41 = arith.mulf %40, %40 : vector<8x64xf32>
    %cst_32 = arith.constant dense<0.000000e+00> : vector<8xf32>
    %42 = vector.multi_reduction <add>, %41, %cst_32 [1] : vector<8x64xf32> to vector<8xf32>
    %43 = vector.shape_cast %42 : vector<8xf32> to vector<8x1xf32>
    %cst_33 = arith.constant 6.400000e+01 : f32
    %44 = vector.broadcast %cst_33 : f32 to vector<8x1xf32>
    %45 = arith.divf %43, %44 : vector<8x1xf32>
    %46 = vector.broadcast %38 : vector<8x1xf32> to vector<8x64xf32>
    %47 = arith.subf %34, %46 : vector<8x64xf32>
    %cst_34 = arith.constant 9.99999974E-6 : f32
    %48 = vector.broadcast %cst_34 : f32 to vector<8x1xf32>
    %49 = arith.addf %45, %48 : vector<8x1xf32>
    %50 = math.rsqrt %49 : vector<8x1xf32>
    %51 = vector.broadcast %50 : vector<8x1xf32> to vector<8x64xf32>
    %52 = arith.mulf %47, %51 : vector<8x64xf32>
    %53 = vector.broadcast %19 : vector<1x64xf32> to vector<8x64xf32>
    %54 = arith.mulf %52, %53 : vector<8x64xf32>
    %55 = vector.broadcast %20 : vector<1x64xf32> to vector<8x64xf32>
    %56 = arith.addf %54, %55 : vector<8x64xf32>
    %cst_35 = arith.constant dense<0.000000e+00> : vector<8x32xf32>
    %57 = tpu.matmul %56, %21, %cst_35 {dimension_numbers = #tpu.dot_dimension_numbers<[1], [0], [0], [1], [0, 0, 1, 1], [], []>} : vector<8x64xf32>, vector<64x32xf32>, vector<8x32xf32> -> vector<8x32xf32>
    %58 = vector.broadcast %22 : vector<1x32xf32> to vector<8x32xf32>
    %59 = arith.addf %57, %58 : vector<8x32xf32>
    %60 = arith.addf %2, %59 : vector<8x32xf32>
    %c0_36 = arith.constant 0 : index
    %c0_37 = arith.constant 0 : index
    %61 = vector.load %arg10[%c0_36, %c0_37] : memref<8x32xf32, #tpu.memory_space<vmem>>, vector<8x32xf32>
    tpu.vector_store %arg10[%c0_36, %c0_37], %60 {strides = array<i32>} : memref<8x32xf32, #tpu.memory_space<vmem>>, vector<8x32xf32>,
    %62 = vector.extract_strided_slice %4 {offsets = [0, 64], sizes = [8, 64], strides = [1, 1]} : vector<8x128xf32> to vector<8x64xf32>
    %c64_38 = arith.constant 64 : index
    %c0_39 = arith.constant 0 : index
    %63 = vector.load %arg5[%c64_38, %c0_39] : memref<96x64xf32, #tpu.memory_space<vmem>>, vector<32x64xf32>
    %cst_40 = arith.constant dense<0.000000e+00> : vector<8x64xf32>
    %64 = tpu.matmul %60, %63, %cst_40 {dimension_numbers = #tpu.dot_dimension_numbers<[1], [0], [0], [1], [0, 0, 1, 1], [], []>} : vector<8x32xf32>, vector<32x64xf32>, vector<8x64xf32> -> vector<8x64xf32>
    %65 = arith.addf %62, %64 : vector<8x64xf32>
    %c5 = arith.constant 5 : index
    %c0_41 = arith.constant 0 : index
    %66 = vector.load %arg8[%c5, %c0_41] : memref<10x64xf32, #tpu.memory_space<vmem>>, vector<1x64xf32>
    %67 = vector.broadcast %66 : vector<1x64xf32> to vector<8x64xf32>
    %68 = arith.addf %65, %67 : vector<8x64xf32>
    %c128 = arith.constant 128 : index
    %c0_42 = arith.constant 0 : index
    %69 = vector.load %arg6[%c128, %c0_42] : memref<256x64xf32, #tpu.memory_space<vmem>>, vector<64x64xf32>
    %c6 = arith.constant 6 : index
    %c0_43 = arith.constant 0 : index
    %70 = vector.load %arg8[%c6, %c0_43] : memref<10x64xf32, #tpu.memory_space<vmem>>, vector<1x64xf32>
    %c192 = arith.constant 192 : index
    %c0_44 = arith.constant 0 : index
    %71 = vector.load %arg6[%c192, %c0_44] : memref<256x64xf32, #tpu.memory_space<vmem>>, vector<64x64xf32>
    %c7 = arith.constant 7 : index
    %c0_45 = arith.constant 0 : index
    %72 = vector.load %arg8[%c7, %c0_45] : memref<10x64xf32, #tpu.memory_space<vmem>>, vector<1x64xf32>
    %c8 = arith.constant 8 : index
    %c0_46 = arith.constant 0 : index
    %73 = vector.load %arg8[%c8, %c0_46] : memref<10x64xf32, #tpu.memory_space<vmem>>, vector<1x64xf32>
    %c9 = arith.constant 9 : index
    %c0_47 = arith.constant 0 : index
    %74 = vector.load %arg8[%c9, %c0_47] : memref<10x64xf32, #tpu.memory_space<vmem>>, vector<1x64xf32>
    %c64_48 = arith.constant 64 : index
    %c0_49 = arith.constant 0 : index
    %75 = vector.load %arg7[%c64_48, %c0_49] : memref<128x32xf32, #tpu.memory_space<vmem>>, vector<64x32xf32>
    %c1_50 = arith.constant 1 : index
    %c0_51 = arith.constant 0 : index
    %76 = vector.load %arg9[%c1_50, %c0_51] : memref<2x32xf32, #tpu.memory_space<vmem>>, vector<1x32xf32>
    %cst_52 = arith.constant 0.000000e+00 : f32
    %77 = vector.broadcast %cst_52 : f32 to vector<8x64xf32>
    %78 = arith.maximumf %68, %77 : vector<8x64xf32>
    %cst_53 = arith.constant dense<0.000000e+00> : vector<8x64xf32>
    %79 = tpu.matmul %78, %69, %cst_53 {dimension_numbers = #tpu.dot_dimension_numbers<[1], [0], [0], [1], [0, 0, 1, 1], [], []>} : vector<8x64xf32>, vector<64x64xf32>, vector<8x64xf32> -> vector<8x64xf32>
    %80 = vector.broadcast %70 : vector<1x64xf32> to vector<8x64xf32>
    %81 = arith.addf %79, %80 : vector<8x64xf32>
    %cst_54 = arith.constant 0.000000e+00 : f32
    %82 = vector.broadcast %cst_54 : f32 to vector<8x64xf32>
    %83 = arith.maximumf %81, %82 : vector<8x64xf32>
    %cst_55 = arith.constant dense<0.000000e+00> : vector<8x64xf32>
    %84 = tpu.matmul %83, %71, %cst_55 {dimension_numbers = #tpu.dot_dimension_numbers<[1], [0], [0], [1], [0, 0, 1, 1], [], []>} : vector<8x64xf32>, vector<64x64xf32>, vector<8x64xf32> -> vector<8x64xf32>
    %85 = vector.broadcast %72 : vector<1x64xf32> to vector<8x64xf32>
    %86 = arith.addf %84, %85 : vector<8x64xf32>
    %cst_56 = arith.constant 0.000000e+00 : f32
    %87 = vector.broadcast %cst_56 : f32 to vector<8x64xf32>
    %88 = arith.maximumf %86, %87 : vector<8x64xf32>
    %cst_57 = arith.constant dense<0.000000e+00> : vector<8xf32>
    %89 = vector.multi_reduction <add>, %88, %cst_57 [1] : vector<8x64xf32> to vector<8xf32>
    %90 = vector.shape_cast %89 : vector<8xf32> to vector<8x1xf32>
    %cst_58 = arith.constant 6.400000e+01 : f32
    %91 = vector.broadcast %cst_58 : f32 to vector<8x1xf32>
    %92 = arith.divf %90, %91 : vector<8x1xf32>
    %93 = vector.broadcast %92 : vector<8x1xf32> to vector<8x64xf32>
    %94 = arith.subf %88, %93 : vector<8x64xf32>
    %95 = arith.mulf %94, %94 : vector<8x64xf32>
    %cst_59 = arith.constant dense<0.000000e+00> : vector<8xf32>
    %96 = vector.multi_reduction <add>, %95, %cst_59 [1] : vector<8x64xf32> to vector<8xf32>
    %97 = vector.shape_cast %96 : vector<8xf32> to vector<8x1xf32>
    %cst_60 = arith.constant 6.400000e+01 : f32
    %98 = vector.broadcast %cst_60 : f32 to vector<8x1xf32>
    %99 = arith.divf %97, %98 : vector<8x1xf32>
    %100 = vector.broadcast %92 : vector<8x1xf32> to vector<8x64xf32>
    %101 = arith.subf %88, %100 : vector<8x64xf32>
    %cst_61 = arith.constant 9.99999974E-6 : f32
    %102 = vector.broadcast %cst_61 : f32 to vector<8x1xf32>
    %103 = arith.addf %99, %102 : vector<8x1xf32>
    %104 = math.rsqrt %103 : vector<8x1xf32>
    %105 = vector.broadcast %104 : vector<8x1xf32> to vector<8x64xf32>
    %106 = arith.mulf %101, %105 : vector<8x64xf32>
    %107 = vector.broadcast %73 : vector<1x64xf32> to vector<8x64xf32>
    %108 = arith.mulf %106, %107 : vector<8x64xf32>
    %109 = vector.broadcast %74 : vector<1x64xf32> to vector<8x64xf32>
    %110 = arith.addf %108, %109 : vector<8x64xf32>
    %cst_62 = arith.constant dense<0.000000e+00> : vector<8x32xf32>
    %111 = tpu.matmul %110, %75, %cst_62 {dimension_numbers = #tpu.dot_dimension_numbers<[1], [0], [0], [1], [0, 0, 1, 1], [], []>} : vector<8x64xf32>, vector<64x32xf32>, vector<8x32xf32> -> vector<8x32xf32>
    %112 = vector.broadcast %76 : vector<1x32xf32> to vector<8x32xf32>
    %113 = arith.addf %111, %112 : vector<8x32xf32>
    %c0_63 = arith.constant 0 : index
    %c0_64 = arith.constant 0 : index
    %114 = vector.load %arg11[%c0_63, %c0_64] : memref<8x32xf32, #tpu.memory_space<vmem>>, vector<8x32xf32>
    tpu.vector_store %arg11[%c0_63, %c0_64], %113 {strides = array<i32>} : memref<8x32xf32, #tpu.memory_space<vmem>>, vector<8x32xf32>,
    return
  }
  func.func @transform_0(%arg0: i32) -> (i32, i32) {
    %c0_i32 = arith.constant 0 : i32
    %c0_i32_0 = arith.constant 0 : i32
    return %arg0, %c0_i32 : i32, i32
  }
  func.func @transform_1(%arg0: i32) -> (i32, i32) {
    %c0_i32 = arith.constant 0 : i32
    %c0_i32_0 = arith.constant 0 : i32
    return %arg0, %c0_i32 : i32, i32
  }
  func.func @transform_2(%arg0: i32) -> (i32, i32) {
    %c0_i32 = arith.constant 0 : i32
    %c0_i32_0 = arith.constant 0 : i32
    return %arg0, %c0_i32 : i32, i32
  }
  func.func @transform_3(%arg0: i32) -> (i32, i32) {
    %c0_i32 = arith.constant 0 : i32
    %c0_i32_0 = arith.constant 0 : i32
    %c0_i32_1 = arith.constant 0 : i32
    return %c0_i32, %c0_i32_0 : i32, i32
  }
  func.func @transform_4(%arg0: i32) -> (i32, i32) {
    %c0_i32 = arith.constant 0 : i32
    %c0_i32_0 = arith.constant 0 : i32
    %c0_i32_1 = arith.constant 0 : i32
    return %c0_i32, %c0_i32_0 : i32, i32
  }
  func.func @transform_5(%arg0: i32) -> (i32, i32) {
    %c0_i32 = arith.constant 0 : i32
    %c0_i32_0 = arith.constant 0 : i32
    %c0_i32_1 = arith.constant 0 : i32
    return %c0_i32, %c0_i32_0 : i32, i32
  }
  func.func @transform_6(%arg0: i32) -> (i32, i32) {
    %c0_i32 = arith.constant 0 : i32
    %c0_i32_0 = arith.constant 0 : i32
    %c0_i32_1 = arith.constant 0 : i32
    return %c0_i32, %c0_i32_0 : i32, i32
  }
  func.func @transform_7(%arg0: i32) -> (i32, i32) {
    %c0_i32 = arith.constant 0 : i32
    %c0_i32_0 = arith.constant 0 : i32
    %c0_i32_1 = arith.constant 0 : i32
    return %c0_i32, %c0_i32_0 : i32, i32
  }
  func.func @transform_8(%arg0: i32) -> (i32, i32) {
    %c0_i32 = arith.constant 0 : i32
    %c0_i32_0 = arith.constant 0 : i32
    %c0_i32_1 = arith.constant 0 : i32
    return %c0_i32, %c0_i32_0 : i32, i32
  }
  func.func @transform_9(%arg0: i32) -> (i32, i32) {
    %c0_i32 = arith.constant 0 : i32
    %c0_i32_0 = arith.constant 0 : i32
    return %arg0, %c0_i32 : i32, i32
  }
  func.func @transform_10(%arg0: i32) -> (i32, i32) {
    %c0_i32 = arith.constant 0 : i32
    %c0_i32_0 = arith.constant 0 : i32
    return %arg0, %c0_i32 : i32, i32
  }
}

module attributes {stable_mosaic.version = 11 : i64} {
  func.func @_scatter_node_kernel(%arg0: i32, %arg1: i32, %arg2: memref<1x24xi32, #tpu.memory_space<vmem>>, %arg3: memref<24x32xf32, #tpu.memory_space<vmem>>, %arg4: memref<8x32xf32, #tpu.memory_space<vmem>>, %arg5: memref<64x64xf32, #tpu.memory_space<vmem>>, %arg6: memref<128x64xf32, #tpu.memory_space<vmem>>, %arg7: memref<64x32xf32, #tpu.memory_space<vmem>>, %arg8: memref<5x64xf32, #tpu.memory_space<vmem>>, %arg9: memref<1x32xf32, #tpu.memory_space<vmem>>, %arg10: memref<8x32xf32, #tpu.memory_space<vmem>>, %arg11: memref<8x32xf32, #tpu.memory_space<vmem>>) attributes {dimension_semantics = [#tpu.dimension_semantics<parallel>, #tpu.dimension_semantics<arbitrary>], iteration_bounds = array<i64: 2, 1>, scalar_prefetch = 0 : i64, scratch_operands = 1 : i64, tpu.core_type = #tpu.core_type<tc>, window_params = [{transform_indices = @transform_0, window_bounds = array<i64: 1, 24>}, {transform_indices = @transform_1, window_bounds = array<i64: 24, 32>}, {transform_indices = @transform_2, window_bounds = array<i64: 8, 32>}, {pipeline_mode = #tpu.pipeline_mode<synchronous>, transform_indices = @transform_3, window_bounds = array<i64: 64, 64>}, {pipeline_mode = #tpu.pipeline_mode<synchronous>, transform_indices = @transform_4, window_bounds = array<i64: 128, 64>}, {pipeline_mode = #tpu.pipeline_mode<synchronous>, transform_indices = @transform_5, window_bounds = array<i64: 64, 32>}, {pipeline_mode = #tpu.pipeline_mode<synchronous>, transform_indices = @transform_6, window_bounds = array<i64: 5, 64>}, {pipeline_mode = #tpu.pipeline_mode<synchronous>, transform_indices = @transform_7, window_bounds = array<i64: 1, 32>}, {transform_indices = @transform_8, window_bounds = array<i64: 8, 32>}]} {
    %c0_i32 = arith.constant 0 : i32
    %0 = arith.cmpi eq, %arg1, %c0_i32 : i32
    %1 = arith.extui %0 : i1 to i32
    %c0_i32_0 = arith.constant 0 : i32
    %2 = arith.cmpi ne, %1, %c0_i32_0 : i32
    scf.if %2 {
      %cst_10 = arith.constant 0.000000e+00 : f32
      %20 = vector.broadcast %cst_10 : f32 to vector<8x32xf32>
      %c0_11 = arith.constant 0 : index
      %c0_12 = arith.constant 0 : index
      %21 = vector.load %arg11[%c0_11, %c0_12] : memref<8x32xf32, #tpu.memory_space<vmem>>, vector<8x32xf32>
      tpu.vector_store %arg11[%c0_11, %c0_12], %20 {strides = array<i32>} : memref<8x32xf32, #tpu.memory_space<vmem>>, vector<8x32xf32>,
    } else {
    }
    %c8_i32 = arith.constant 8 : i32
    %3 = arith.muli %arg0, %c8_i32 : i32
    %4 = tpu.iota {dimensions = array<i32: 0>} : vector<8x24xi32>
    %5 = vector.broadcast %3 : i32 to vector<8x24xi32>
    %6 = arith.addi %5, %4 : vector<8x24xi32>
    %c0 = arith.constant 0 : index
    %c0_1 = arith.constant 0 : index
    %7 = vector.load %arg2[%c0, %c0_1] : memref<1x24xi32, #tpu.memory_space<vmem>>, vector<1x24xi32>
    %8 = vector.broadcast %7 : vector<1x24xi32> to vector<8x24xi32>
    %9 = arith.cmpi eq, %6, %8 : vector<8x24xi32>
    %10 = arith.extui %9 : vector<8x24xi1> to vector<8x24xi32>
    %11 = arith.sitofp %10 : vector<8x24xi32> to vector<8x24xf32>
    %c0_2 = arith.constant 0 : index
    %c0_3 = arith.constant 0 : index
    %12 = vector.load %arg11[%c0_2, %c0_3] : memref<8x32xf32, #tpu.memory_space<vmem>>, vector<8x32xf32>
    %c0_4 = arith.constant 0 : index
    %c0_5 = arith.constant 0 : index
    %13 = vector.load %arg3[%c0_4, %c0_5] : memref<24x32xf32, #tpu.memory_space<vmem>>, vector<24x32xf32>
    %cst = arith.constant dense<0.000000e+00> : vector<8x32xf32>
    %14 = tpu.matmul %11, %13, %cst {dimension_numbers = #tpu.dot_dimension_numbers<[1], [0], [0], [1], [0, 0, 1, 1], [], []>} : vector<8x24xf32>, vector<24x32xf32>, vector<8x32xf32> -> vector<8x32xf32>
    %15 = arith.addf %12, %14 : vector<8x32xf32>
    %c0_6 = arith.constant 0 : index
    %c0_7 = arith.constant 0 : index
    %16 = vector.load %arg11[%c0_6, %c0_7] : memref<8x32xf32, #tpu.memory_space<vmem>>, vector<8x32xf32>
    tpu.vector_store %arg11[%c0_6, %c0_7], %15 {strides = array<i32>} : memref<8x32xf32, #tpu.memory_space<vmem>>, vector<8x32xf32>,
    %c0_i32_8 = arith.constant 0 : i32
    %17 = arith.cmpi eq, %arg1, %c0_i32_8 : i32
    %18 = arith.extui %17 : i1 to i32
    %c0_i32_9 = arith.constant 0 : i32
    %19 = arith.cmpi ne, %18, %c0_i32_9 : i32
    scf.if %19 {
      %c0_10 = arith.constant 0 : index
      %c0_11 = arith.constant 0 : index
      %20 = vector.load %arg4[%c0_10, %c0_11] : memref<8x32xf32, #tpu.memory_space<vmem>>, vector<8x32xf32>
      %c0_12 = arith.constant 0 : index
      %c0_13 = arith.constant 0 : index
      %21 = vector.load %arg5[%c0_12, %c0_13] : memref<64x64xf32, #tpu.memory_space<vmem>>, vector<32x64xf32>
      %cst_14 = arith.constant dense<0.000000e+00> : vector<8x64xf32>
      %22 = tpu.matmul %20, %21, %cst_14 {dimension_numbers = #tpu.dot_dimension_numbers<[1], [0], [0], [1], [0, 0, 1, 1], [], []>} : vector<8x32xf32>, vector<32x64xf32>, vector<8x64xf32> -> vector<8x64xf32>
      %c0_15 = arith.constant 0 : index
      %c0_16 = arith.constant 0 : index
      %23 = vector.load %arg11[%c0_15, %c0_16] : memref<8x32xf32, #tpu.memory_space<vmem>>, vector<8x32xf32>
      %c32 = arith.constant 32 : index
      %c0_17 = arith.constant 0 : index
      %24 = vector.load %arg5[%c32, %c0_17] : memref<64x64xf32, #tpu.memory_space<vmem>>, vector<32x64xf32>
      %cst_18 = arith.constant dense<0.000000e+00> : vector<8x64xf32>
      %25 = tpu.matmul %23, %24, %cst_18 {dimension_numbers = #tpu.dot_dimension_numbers<[1], [0], [0], [1], [0, 0, 1, 1], [], []>} : vector<8x32xf32>, vector<32x64xf32>, vector<8x64xf32> -> vector<8x64xf32>
      %26 = arith.addf %22, %25 : vector<8x64xf32>
      %c0_19 = arith.constant 0 : index
      %c0_20 = arith.constant 0 : index
      %27 = vector.load %arg8[%c0_19, %c0_20] : memref<5x64xf32, #tpu.memory_space<vmem>>, vector<1x64xf32>
      %28 = vector.broadcast %27 : vector<1x64xf32> to vector<8x64xf32>
      %29 = arith.addf %26, %28 : vector<8x64xf32>
      %c0_21 = arith.constant 0 : index
      %c0_22 = arith.constant 0 : index
      %30 = vector.load %arg6[%c0_21, %c0_22] : memref<128x64xf32, #tpu.memory_space<vmem>>, vector<64x64xf32>
      %c1 = arith.constant 1 : index
      %c0_23 = arith.constant 0 : index
      %31 = vector.load %arg8[%c1, %c0_23] : memref<5x64xf32, #tpu.memory_space<vmem>>, vector<1x64xf32>
      %c64 = arith.constant 64 : index
      %c0_24 = arith.constant 0 : index
      %32 = vector.load %arg6[%c64, %c0_24] : memref<128x64xf32, #tpu.memory_space<vmem>>, vector<64x64xf32>
      %c2 = arith.constant 2 : index
      %c0_25 = arith.constant 0 : index
      %33 = vector.load %arg8[%c2, %c0_25] : memref<5x64xf32, #tpu.memory_space<vmem>>, vector<1x64xf32>
      %c3 = arith.constant 3 : index
      %c0_26 = arith.constant 0 : index
      %34 = vector.load %arg8[%c3, %c0_26] : memref<5x64xf32, #tpu.memory_space<vmem>>, vector<1x64xf32>
      %c4 = arith.constant 4 : index
      %c0_27 = arith.constant 0 : index
      %35 = vector.load %arg8[%c4, %c0_27] : memref<5x64xf32, #tpu.memory_space<vmem>>, vector<1x64xf32>
      %c0_28 = arith.constant 0 : index
      %c0_29 = arith.constant 0 : index
      %36 = vector.load %arg7[%c0_28, %c0_29] : memref<64x32xf32, #tpu.memory_space<vmem>>, vector<64x32xf32>
      %c0_30 = arith.constant 0 : index
      %c0_31 = arith.constant 0 : index
      %37 = vector.load %arg9[%c0_30, %c0_31] : memref<1x32xf32, #tpu.memory_space<vmem>>, vector<1x32xf32>
      %cst_32 = arith.constant 0.000000e+00 : f32
      %38 = vector.broadcast %cst_32 : f32 to vector<8x64xf32>
      %39 = arith.maximumf %29, %38 : vector<8x64xf32>
      %cst_33 = arith.constant dense<0.000000e+00> : vector<8x64xf32>
      %40 = tpu.matmul %39, %30, %cst_33 {dimension_numbers = #tpu.dot_dimension_numbers<[1], [0], [0], [1], [0, 0, 1, 1], [], []>} : vector<8x64xf32>, vector<64x64xf32>, vector<8x64xf32> -> vector<8x64xf32>
      %41 = vector.broadcast %31 : vector<1x64xf32> to vector<8x64xf32>
      %42 = arith.addf %40, %41 : vector<8x64xf32>
      %cst_34 = arith.constant 0.000000e+00 : f32
      %43 = vector.broadcast %cst_34 : f32 to vector<8x64xf32>
      %44 = arith.maximumf %42, %43 : vector<8x64xf32>
      %cst_35 = arith.constant dense<0.000000e+00> : vector<8x64xf32>
      %45 = tpu.matmul %44, %32, %cst_35 {dimension_numbers = #tpu.dot_dimension_numbers<[1], [0], [0], [1], [0, 0, 1, 1], [], []>} : vector<8x64xf32>, vector<64x64xf32>, vector<8x64xf32> -> vector<8x64xf32>
      %46 = vector.broadcast %33 : vector<1x64xf32> to vector<8x64xf32>
      %47 = arith.addf %45, %46 : vector<8x64xf32>
      %cst_36 = arith.constant 0.000000e+00 : f32
      %48 = vector.broadcast %cst_36 : f32 to vector<8x64xf32>
      %49 = arith.maximumf %47, %48 : vector<8x64xf32>
      %cst_37 = arith.constant dense<0.000000e+00> : vector<8xf32>
      %50 = vector.multi_reduction <add>, %49, %cst_37 [1] : vector<8x64xf32> to vector<8xf32>
      %51 = vector.shape_cast %50 : vector<8xf32> to vector<8x1xf32>
      %cst_38 = arith.constant 6.400000e+01 : f32
      %52 = vector.broadcast %cst_38 : f32 to vector<8x1xf32>
      %53 = arith.divf %51, %52 : vector<8x1xf32>
      %54 = vector.broadcast %53 : vector<8x1xf32> to vector<8x64xf32>
      %55 = arith.subf %49, %54 : vector<8x64xf32>
      %56 = arith.mulf %55, %55 : vector<8x64xf32>
      %cst_39 = arith.constant dense<0.000000e+00> : vector<8xf32>
      %57 = vector.multi_reduction <add>, %56, %cst_39 [1] : vector<8x64xf32> to vector<8xf32>
      %58 = vector.shape_cast %57 : vector<8xf32> to vector<8x1xf32>
      %cst_40 = arith.constant 6.400000e+01 : f32
      %59 = vector.broadcast %cst_40 : f32 to vector<8x1xf32>
      %60 = arith.divf %58, %59 : vector<8x1xf32>
      %61 = vector.broadcast %53 : vector<8x1xf32> to vector<8x64xf32>
      %62 = arith.subf %49, %61 : vector<8x64xf32>
      %cst_41 = arith.constant 9.99999974E-6 : f32
      %63 = vector.broadcast %cst_41 : f32 to vector<8x1xf32>
      %64 = arith.addf %60, %63 : vector<8x1xf32>
      %65 = math.rsqrt %64 : vector<8x1xf32>
      %66 = vector.broadcast %65 : vector<8x1xf32> to vector<8x64xf32>
      %67 = arith.mulf %62, %66 : vector<8x64xf32>
      %68 = vector.broadcast %34 : vector<1x64xf32> to vector<8x64xf32>
      %69 = arith.mulf %67, %68 : vector<8x64xf32>
      %70 = vector.broadcast %35 : vector<1x64xf32> to vector<8x64xf32>
      %71 = arith.addf %69, %70 : vector<8x64xf32>
      %cst_42 = arith.constant dense<0.000000e+00> : vector<8x32xf32>
      %72 = tpu.matmul %71, %36, %cst_42 {dimension_numbers = #tpu.dot_dimension_numbers<[1], [0], [0], [1], [0, 0, 1, 1], [], []>} : vector<8x64xf32>, vector<64x32xf32>, vector<8x32xf32> -> vector<8x32xf32>
      %73 = vector.broadcast %37 : vector<1x32xf32> to vector<8x32xf32>
      %74 = arith.addf %72, %73 : vector<8x32xf32>
      %75 = arith.addf %20, %74 : vector<8x32xf32>
      %c0_43 = arith.constant 0 : index
      %c0_44 = arith.constant 0 : index
      %76 = vector.load %arg10[%c0_43, %c0_44] : memref<8x32xf32, #tpu.memory_space<vmem>>, vector<8x32xf32>
      tpu.vector_store %arg10[%c0_43, %c0_44], %75 {strides = array<i32>} : memref<8x32xf32, #tpu.memory_space<vmem>>, vector<8x32xf32>,
    } else {
    }
    return
  }
  func.func @transform_0(%arg0: i32, %arg1: i32) -> (i32, i32) {
    %c0_i32 = arith.constant 0 : i32
    %c0_i32_0 = arith.constant 0 : i32
    return %c0_i32, %arg1 : i32, i32
  }
  func.func @transform_1(%arg0: i32, %arg1: i32) -> (i32, i32) {
    %c0_i32 = arith.constant 0 : i32
    %c0_i32_0 = arith.constant 0 : i32
    return %arg1, %c0_i32 : i32, i32
  }
  func.func @transform_2(%arg0: i32, %arg1: i32) -> (i32, i32) {
    %c0_i32 = arith.constant 0 : i32
    %c0_i32_0 = arith.constant 0 : i32
    return %arg0, %c0_i32 : i32, i32
  }
  func.func @transform_3(%arg0: i32, %arg1: i32) -> (i32, i32) {
    %c0_i32 = arith.constant 0 : i32
    %c0_i32_0 = arith.constant 0 : i32
    %c0_i32_1 = arith.constant 0 : i32
    return %c0_i32, %c0_i32_0 : i32, i32
  }
  func.func @transform_4(%arg0: i32, %arg1: i32) -> (i32, i32) {
    %c0_i32 = arith.constant 0 : i32
    %c0_i32_0 = arith.constant 0 : i32
    %c0_i32_1 = arith.constant 0 : i32
    return %c0_i32, %c0_i32_0 : i32, i32
  }
  func.func @transform_5(%arg0: i32, %arg1: i32) -> (i32, i32) {
    %c0_i32 = arith.constant 0 : i32
    %c0_i32_0 = arith.constant 0 : i32
    %c0_i32_1 = arith.constant 0 : i32
    return %c0_i32, %c0_i32_0 : i32, i32
  }
  func.func @transform_6(%arg0: i32, %arg1: i32) -> (i32, i32) {
    %c0_i32 = arith.constant 0 : i32
    %c0_i32_0 = arith.constant 0 : i32
    %c0_i32_1 = arith.constant 0 : i32
    return %c0_i32, %c0_i32_0 : i32, i32
  }
  func.func @transform_7(%arg0: i32, %arg1: i32) -> (i32, i32) {
    %c0_i32 = arith.constant 0 : i32
    %c0_i32_0 = arith.constant 0 : i32
    %c0_i32_1 = arith.constant 0 : i32
    return %c0_i32, %c0_i32_0 : i32, i32
  }
  func.func @transform_8(%arg0: i32, %arg1: i32) -> (i32, i32) {
    %c0_i32 = arith.constant 0 : i32
    %c0_i32_0 = arith.constant 0 : i32
    return %arg0, %c0_i32 : i32, i32
  }
}

module attributes {stable_mosaic.version = 11 : i64} {
  func.func @_edge_msg_kernel(%arg0: i32, %arg1: memref<8x32xf32, #tpu.memory_space<vmem>>, %arg2: memref<8x32xf32, #tpu.memory_space<vmem>>, %arg3: memref<8x32xf32, #tpu.memory_space<vmem>>, %arg4: memref<32x128xf32, #tpu.memory_space<vmem>>, %arg5: memref<96x64xf32, #tpu.memory_space<vmem>>, %arg6: memref<256x64xf32, #tpu.memory_space<vmem>>, %arg7: memref<128x32xf32, #tpu.memory_space<vmem>>, %arg8: memref<10x64xf32, #tpu.memory_space<vmem>>, %arg9: memref<2x32xf32, #tpu.memory_space<vmem>>, %arg10: memref<8x32xf32, #tpu.memory_space<vmem>>, %arg11: memref<8x32xf32, #tpu.memory_space<vmem>>) attributes {dimension_semantics = [#tpu.dimension_semantics<parallel>], iteration_bounds = array<i64: 3>, scalar_prefetch = 0 : i64, scratch_operands = 0 : i64, tpu.core_type = #tpu.core_type<tc>, window_params = [{transform_indices = @transform_0, window_bounds = array<i64: 8, 32>}, {transform_indices = @transform_1, window_bounds = array<i64: 8, 32>}, {transform_indices = @transform_2, window_bounds = array<i64: 8, 32>}, {pipeline_mode = #tpu.pipeline_mode<synchronous>, transform_indices = @transform_3, window_bounds = array<i64: 32, 128>}, {pipeline_mode = #tpu.pipeline_mode<synchronous>, transform_indices = @transform_4, window_bounds = array<i64: 96, 64>}, {pipeline_mode = #tpu.pipeline_mode<synchronous>, transform_indices = @transform_5, window_bounds = array<i64: 256, 64>}, {pipeline_mode = #tpu.pipeline_mode<synchronous>, transform_indices = @transform_6, window_bounds = array<i64: 128, 32>}, {pipeline_mode = #tpu.pipeline_mode<synchronous>, transform_indices = @transform_7, window_bounds = array<i64: 10, 64>}, {pipeline_mode = #tpu.pipeline_mode<synchronous>, transform_indices = @transform_8, window_bounds = array<i64: 2, 32>}, {transform_indices = @transform_9, window_bounds = array<i64: 8, 32>}, {transform_indices = @transform_10, window_bounds = array<i64: 8, 32>}]} {
    %c0 = arith.constant 0 : index
    %c0_0 = arith.constant 0 : index
    %0 = vector.load %arg1[%c0, %c0_0] : memref<8x32xf32, #tpu.memory_space<vmem>>, vector<8x32xf32>
    %c0_1 = arith.constant 0 : index
    %c0_2 = arith.constant 0 : index
    %1 = vector.load %arg2[%c0_1, %c0_2] : memref<8x32xf32, #tpu.memory_space<vmem>>, vector<8x32xf32>
    %c0_3 = arith.constant 0 : index
    %c0_4 = arith.constant 0 : index
    %2 = vector.load %arg3[%c0_3, %c0_4] : memref<8x32xf32, #tpu.memory_space<vmem>>, vector<8x32xf32>
    %c0_5 = arith.constant 0 : index
    %c0_6 = arith.constant 0 : index
    %3 = vector.load %arg4[%c0_5, %c0_6] : memref<32x128xf32, #tpu.memory_space<vmem>>, vector<32x128xf32>
    %cst = arith.constant dense<0.000000e+00> : vector<8x128xf32>
    %4 = tpu.matmul %0, %3, %cst {dimension_numbers = #tpu.dot_dimension_numbers<[1], [0], [0], [1], [0, 0, 1, 1], [], []>} : vector<8x32xf32>, vector<32x128xf32>, vector<8x128xf32> -> vector<8x128xf32>
    %5 = vector.extract_strided_slice %4 {offsets = [0, 0], sizes = [8, 64], strides = [1, 1]} : vector<8x128xf32> to vector<8x64xf32>
    %c0_7 = arith.constant 0 : index
    %c0_8 = arith.constant 0 : index
    %6 = vector.load %arg5[%c0_7, %c0_8] : memref<96x64xf32, #tpu.memory_space<vmem>>, vector<32x64xf32>
    %cst_9 = arith.constant dense<0.000000e+00> : vector<8x64xf32>
    %7 = tpu.matmul %1, %6, %cst_9 {dimension_numbers = #tpu.dot_dimension_numbers<[1], [0], [0], [1], [0, 0, 1, 1], [], []>} : vector<8x32xf32>, vector<32x64xf32>, vector<8x64xf32> -> vector<8x64xf32>
    %8 = arith.addf %5, %7 : vector<8x64xf32>
    %c32 = arith.constant 32 : index
    %c0_10 = arith.constant 0 : index
    %9 = vector.load %arg5[%c32, %c0_10] : memref<96x64xf32, #tpu.memory_space<vmem>>, vector<32x64xf32>
    %cst_11 = arith.constant dense<0.000000e+00> : vector<8x64xf32>
    %10 = tpu.matmul %2, %9, %cst_11 {dimension_numbers = #tpu.dot_dimension_numbers<[1], [0], [0], [1], [0, 0, 1, 1], [], []>} : vector<8x32xf32>, vector<32x64xf32>, vector<8x64xf32> -> vector<8x64xf32>
    %11 = arith.addf %8, %10 : vector<8x64xf32>
    %c0_12 = arith.constant 0 : index
    %c0_13 = arith.constant 0 : index
    %12 = vector.load %arg8[%c0_12, %c0_13] : memref<10x64xf32, #tpu.memory_space<vmem>>, vector<1x64xf32>
    %13 = vector.broadcast %12 : vector<1x64xf32> to vector<8x64xf32>
    %14 = arith.addf %11, %13 : vector<8x64xf32>
    %c0_14 = arith.constant 0 : index
    %c0_15 = arith.constant 0 : index
    %15 = vector.load %arg6[%c0_14, %c0_15] : memref<256x64xf32, #tpu.memory_space<vmem>>, vector<64x64xf32>
    %c1 = arith.constant 1 : index
    %c0_16 = arith.constant 0 : index
    %16 = vector.load %arg8[%c1, %c0_16] : memref<10x64xf32, #tpu.memory_space<vmem>>, vector<1x64xf32>
    %c64 = arith.constant 64 : index
    %c0_17 = arith.constant 0 : index
    %17 = vector.load %arg6[%c64, %c0_17] : memref<256x64xf32, #tpu.memory_space<vmem>>, vector<64x64xf32>
    %c2 = arith.constant 2 : index
    %c0_18 = arith.constant 0 : index
    %18 = vector.load %arg8[%c2, %c0_18] : memref<10x64xf32, #tpu.memory_space<vmem>>, vector<1x64xf32>
    %c3 = arith.constant 3 : index
    %c0_19 = arith.constant 0 : index
    %19 = vector.load %arg8[%c3, %c0_19] : memref<10x64xf32, #tpu.memory_space<vmem>>, vector<1x64xf32>
    %c4 = arith.constant 4 : index
    %c0_20 = arith.constant 0 : index
    %20 = vector.load %arg8[%c4, %c0_20] : memref<10x64xf32, #tpu.memory_space<vmem>>, vector<1x64xf32>
    %c0_21 = arith.constant 0 : index
    %c0_22 = arith.constant 0 : index
    %21 = vector.load %arg7[%c0_21, %c0_22] : memref<128x32xf32, #tpu.memory_space<vmem>>, vector<64x32xf32>
    %c0_23 = arith.constant 0 : index
    %c0_24 = arith.constant 0 : index
    %22 = vector.load %arg9[%c0_23, %c0_24] : memref<2x32xf32, #tpu.memory_space<vmem>>, vector<1x32xf32>
    %cst_25 = arith.constant 0.000000e+00 : f32
    %23 = vector.broadcast %cst_25 : f32 to vector<8x64xf32>
    %24 = arith.maximumf %14, %23 : vector<8x64xf32>
    %cst_26 = arith.constant dense<0.000000e+00> : vector<8x64xf32>
    %25 = tpu.matmul %24, %15, %cst_26 {dimension_numbers = #tpu.dot_dimension_numbers<[1], [0], [0], [1], [0, 0, 1, 1], [], []>} : vector<8x64xf32>, vector<64x64xf32>, vector<8x64xf32> -> vector<8x64xf32>
    %26 = vector.broadcast %16 : vector<1x64xf32> to vector<8x64xf32>
    %27 = arith.addf %25, %26 : vector<8x64xf32>
    %cst_27 = arith.constant 0.000000e+00 : f32
    %28 = vector.broadcast %cst_27 : f32 to vector<8x64xf32>
    %29 = arith.maximumf %27, %28 : vector<8x64xf32>
    %cst_28 = arith.constant dense<0.000000e+00> : vector<8x64xf32>
    %30 = tpu.matmul %29, %17, %cst_28 {dimension_numbers = #tpu.dot_dimension_numbers<[1], [0], [0], [1], [0, 0, 1, 1], [], []>} : vector<8x64xf32>, vector<64x64xf32>, vector<8x64xf32> -> vector<8x64xf32>
    %31 = vector.broadcast %18 : vector<1x64xf32> to vector<8x64xf32>
    %32 = arith.addf %30, %31 : vector<8x64xf32>
    %cst_29 = arith.constant 0.000000e+00 : f32
    %33 = vector.broadcast %cst_29 : f32 to vector<8x64xf32>
    %34 = arith.maximumf %32, %33 : vector<8x64xf32>
    %cst_30 = arith.constant dense<0.000000e+00> : vector<8xf32>
    %35 = vector.multi_reduction <add>, %34, %cst_30 [1] : vector<8x64xf32> to vector<8xf32>
    %36 = vector.shape_cast %35 : vector<8xf32> to vector<8x1xf32>
    %cst_31 = arith.constant 6.400000e+01 : f32
    %37 = vector.broadcast %cst_31 : f32 to vector<8x1xf32>
    %38 = arith.divf %36, %37 : vector<8x1xf32>
    %39 = vector.broadcast %38 : vector<8x1xf32> to vector<8x64xf32>
    %40 = arith.subf %34, %39 : vector<8x64xf32>
    %41 = arith.mulf %40, %40 : vector<8x64xf32>
    %cst_32 = arith.constant dense<0.000000e+00> : vector<8xf32>
    %42 = vector.multi_reduction <add>, %41, %cst_32 [1] : vector<8x64xf32> to vector<8xf32>
    %43 = vector.shape_cast %42 : vector<8xf32> to vector<8x1xf32>
    %cst_33 = arith.constant 6.400000e+01 : f32
    %44 = vector.broadcast %cst_33 : f32 to vector<8x1xf32>
    %45 = arith.divf %43, %44 : vector<8x1xf32>
    %46 = vector.broadcast %38 : vector<8x1xf32> to vector<8x64xf32>
    %47 = arith.subf %34, %46 : vector<8x64xf32>
    %cst_34 = arith.constant 9.99999974E-6 : f32
    %48 = vector.broadcast %cst_34 : f32 to vector<8x1xf32>
    %49 = arith.addf %45, %48 : vector<8x1xf32>
    %50 = math.rsqrt %49 : vector<8x1xf32>
    %51 = vector.broadcast %50 : vector<8x1xf32> to vector<8x64xf32>
    %52 = arith.mulf %47, %51 : vector<8x64xf32>
    %53 = vector.broadcast %19 : vector<1x64xf32> to vector<8x64xf32>
    %54 = arith.mulf %52, %53 : vector<8x64xf32>
    %55 = vector.broadcast %20 : vector<1x64xf32> to vector<8x64xf32>
    %56 = arith.addf %54, %55 : vector<8x64xf32>
    %cst_35 = arith.constant dense<0.000000e+00> : vector<8x32xf32>
    %57 = tpu.matmul %56, %21, %cst_35 {dimension_numbers = #tpu.dot_dimension_numbers<[1], [0], [0], [1], [0, 0, 1, 1], [], []>} : vector<8x64xf32>, vector<64x32xf32>, vector<8x32xf32> -> vector<8x32xf32>
    %58 = vector.broadcast %22 : vector<1x32xf32> to vector<8x32xf32>
    %59 = arith.addf %57, %58 : vector<8x32xf32>
    %60 = arith.addf %2, %59 : vector<8x32xf32>
    %c0_36 = arith.constant 0 : index
    %c0_37 = arith.constant 0 : index
    %61 = vector.load %arg10[%c0_36, %c0_37] : memref<8x32xf32, #tpu.memory_space<vmem>>, vector<8x32xf32>
    tpu.vector_store %arg10[%c0_36, %c0_37], %60 {strides = array<i32>} : memref<8x32xf32, #tpu.memory_space<vmem>>, vector<8x32xf32>,
    %62 = vector.extract_strided_slice %4 {offsets = [0, 64], sizes = [8, 64], strides = [1, 1]} : vector<8x128xf32> to vector<8x64xf32>
    %c64_38 = arith.constant 64 : index
    %c0_39 = arith.constant 0 : index
    %63 = vector.load %arg5[%c64_38, %c0_39] : memref<96x64xf32, #tpu.memory_space<vmem>>, vector<32x64xf32>
    %cst_40 = arith.constant dense<0.000000e+00> : vector<8x64xf32>
    %64 = tpu.matmul %60, %63, %cst_40 {dimension_numbers = #tpu.dot_dimension_numbers<[1], [0], [0], [1], [0, 0, 1, 1], [], []>} : vector<8x32xf32>, vector<32x64xf32>, vector<8x64xf32> -> vector<8x64xf32>
    %65 = arith.addf %62, %64 : vector<8x64xf32>
    %c5 = arith.constant 5 : index
    %c0_41 = arith.constant 0 : index
    %66 = vector.load %arg8[%c5, %c0_41] : memref<10x64xf32, #tpu.memory_space<vmem>>, vector<1x64xf32>
    %67 = vector.broadcast %66 : vector<1x64xf32> to vector<8x64xf32>
    %68 = arith.addf %65, %67 : vector<8x64xf32>
    %c128 = arith.constant 128 : index
    %c0_42 = arith.constant 0 : index
    %69 = vector.load %arg6[%c128, %c0_42] : memref<256x64xf32, #tpu.memory_space<vmem>>, vector<64x64xf32>
    %c6 = arith.constant 6 : index
    %c0_43 = arith.constant 0 : index
    %70 = vector.load %arg8[%c6, %c0_43] : memref<10x64xf32, #tpu.memory_space<vmem>>, vector<1x64xf32>
    %c192 = arith.constant 192 : index
    %c0_44 = arith.constant 0 : index
    %71 = vector.load %arg6[%c192, %c0_44] : memref<256x64xf32, #tpu.memory_space<vmem>>, vector<64x64xf32>
    %c7 = arith.constant 7 : index
    %c0_45 = arith.constant 0 : index
    %72 = vector.load %arg8[%c7, %c0_45] : memref<10x64xf32, #tpu.memory_space<vmem>>, vector<1x64xf32>
    %c8 = arith.constant 8 : index
    %c0_46 = arith.constant 0 : index
    %73 = vector.load %arg8[%c8, %c0_46] : memref<10x64xf32, #tpu.memory_space<vmem>>, vector<1x64xf32>
    %c9 = arith.constant 9 : index
    %c0_47 = arith.constant 0 : index
    %74 = vector.load %arg8[%c9, %c0_47] : memref<10x64xf32, #tpu.memory_space<vmem>>, vector<1x64xf32>
    %c64_48 = arith.constant 64 : index
    %c0_49 = arith.constant 0 : index
    %75 = vector.load %arg7[%c64_48, %c0_49] : memref<128x32xf32, #tpu.memory_space<vmem>>, vector<64x32xf32>
    %c1_50 = arith.constant 1 : index
    %c0_51 = arith.constant 0 : index
    %76 = vector.load %arg9[%c1_50, %c0_51] : memref<2x32xf32, #tpu.memory_space<vmem>>, vector<1x32xf32>
    %cst_52 = arith.constant 0.000000e+00 : f32
    %77 = vector.broadcast %cst_52 : f32 to vector<8x64xf32>
    %78 = arith.maximumf %68, %77 : vector<8x64xf32>
    %cst_53 = arith.constant dense<0.000000e+00> : vector<8x64xf32>
    %79 = tpu.matmul %78, %69, %cst_53 {dimension_numbers = #tpu.dot_dimension_numbers<[1], [0], [0], [1], [0, 0, 1, 1], [], []>} : vector<8x64xf32>, vector<64x64xf32>, vector<8x64xf32> -> vector<8x64xf32>
    %80 = vector.broadcast %70 : vector<1x64xf32> to vector<8x64xf32>
    %81 = arith.addf %79, %80 : vector<8x64xf32>
    %cst_54 = arith.constant 0.000000e+00 : f32
    %82 = vector.broadcast %cst_54 : f32 to vector<8x64xf32>
    %83 = arith.maximumf %81, %82 : vector<8x64xf32>
    %cst_55 = arith.constant dense<0.000000e+00> : vector<8x64xf32>
    %84 = tpu.matmul %83, %71, %cst_55 {dimension_numbers = #tpu.dot_dimension_numbers<[1], [0], [0], [1], [0, 0, 1, 1], [], []>} : vector<8x64xf32>, vector<64x64xf32>, vector<8x64xf32> -> vector<8x64xf32>
    %85 = vector.broadcast %72 : vector<1x64xf32> to vector<8x64xf32>
    %86 = arith.addf %84, %85 : vector<8x64xf32>
    %cst_56 = arith.constant 0.000000e+00 : f32
    %87 = vector.broadcast %cst_56 : f32 to vector<8x64xf32>
    %88 = arith.maximumf %86, %87 : vector<8x64xf32>
    %cst_57 = arith.constant dense<0.000000e+00> : vector<8xf32>
    %89 = vector.multi_reduction <add>, %88, %cst_57 [1] : vector<8x64xf32> to vector<8xf32>
    %90 = vector.shape_cast %89 : vector<8xf32> to vector<8x1xf32>
    %cst_58 = arith.constant 6.400000e+01 : f32
    %91 = vector.broadcast %cst_58 : f32 to vector<8x1xf32>
    %92 = arith.divf %90, %91 : vector<8x1xf32>
    %93 = vector.broadcast %92 : vector<8x1xf32> to vector<8x64xf32>
    %94 = arith.subf %88, %93 : vector<8x64xf32>
    %95 = arith.mulf %94, %94 : vector<8x64xf32>
    %cst_59 = arith.constant dense<0.000000e+00> : vector<8xf32>
    %96 = vector.multi_reduction <add>, %95, %cst_59 [1] : vector<8x64xf32> to vector<8xf32>
    %97 = vector.shape_cast %96 : vector<8xf32> to vector<8x1xf32>
    %cst_60 = arith.constant 6.400000e+01 : f32
    %98 = vector.broadcast %cst_60 : f32 to vector<8x1xf32>
    %99 = arith.divf %97, %98 : vector<8x1xf32>
    %100 = vector.broadcast %92 : vector<8x1xf32> to vector<8x64xf32>
    %101 = arith.subf %88, %100 : vector<8x64xf32>
    %cst_61 = arith.constant 9.99999974E-6 : f32
    %102 = vector.broadcast %cst_61 : f32 to vector<8x1xf32>
    %103 = arith.addf %99, %102 : vector<8x1xf32>
    %104 = math.rsqrt %103 : vector<8x1xf32>
    %105 = vector.broadcast %104 : vector<8x1xf32> to vector<8x64xf32>
    %106 = arith.mulf %101, %105 : vector<8x64xf32>
    %107 = vector.broadcast %73 : vector<1x64xf32> to vector<8x64xf32>
    %108 = arith.mulf %106, %107 : vector<8x64xf32>
    %109 = vector.broadcast %74 : vector<1x64xf32> to vector<8x64xf32>
    %110 = arith.addf %108, %109 : vector<8x64xf32>
    %cst_62 = arith.constant dense<0.000000e+00> : vector<8x32xf32>
    %111 = tpu.matmul %110, %75, %cst_62 {dimension_numbers = #tpu.dot_dimension_numbers<[1], [0], [0], [1], [0, 0, 1, 1], [], []>} : vector<8x64xf32>, vector<64x32xf32>, vector<8x32xf32> -> vector<8x32xf32>
    %112 = vector.broadcast %76 : vector<1x32xf32> to vector<8x32xf32>
    %113 = arith.addf %111, %112 : vector<8x32xf32>
    %c0_63 = arith.constant 0 : index
    %c0_64 = arith.constant 0 : index
    %114 = vector.load %arg11[%c0_63, %c0_64] : memref<8x32xf32, #tpu.memory_space<vmem>>, vector<8x32xf32>
    tpu.vector_store %arg11[%c0_63, %c0_64], %113 {strides = array<i32>} : memref<8x32xf32, #tpu.memory_space<vmem>>, vector<8x32xf32>,
    return
  }
  func.func @transform_0(%arg0: i32) -> (i32, i32) {
    %c0_i32 = arith.constant 0 : i32
    %c0_i32_0 = arith.constant 0 : i32
    return %arg0, %c0_i32 : i32, i32
  }
  func.func @transform_1(%arg0: i32) -> (i32, i32) {
    %c0_i32 = arith.constant 0 : i32
    %c0_i32_0 = arith.constant 0 : i32
    return %arg0, %c0_i32 : i32, i32
  }
  func.func @transform_2(%arg0: i32) -> (i32, i32) {
    %c0_i32 = arith.constant 0 : i32
    %c0_i32_0 = arith.constant 0 : i32
    return %arg0, %c0_i32 : i32, i32
  }
  func.func @transform_3(%arg0: i32) -> (i32, i32) {
    %c0_i32 = arith.constant 0 : i32
    %c0_i32_0 = arith.constant 0 : i32
    %c0_i32_1 = arith.constant 0 : i32
    return %c0_i32, %c0_i32_0 : i32, i32
  }
  func.func @transform_4(%arg0: i32) -> (i32, i32) {
    %c0_i32 = arith.constant 0 : i32
    %c0_i32_0 = arith.constant 0 : i32
    %c0_i32_1 = arith.constant 0 : i32
    return %c0_i32, %c0_i32_0 : i32, i32
  }
  func.func @transform_5(%arg0: i32) -> (i32, i32) {
    %c0_i32 = arith.constant 0 : i32
    %c0_i32_0 = arith.constant 0 : i32
    %c0_i32_1 = arith.constant 0 : i32
    return %c0_i32, %c0_i32_0 : i32, i32
  }
  func.func @transform_6(%arg0: i32) -> (i32, i32) {
    %c0_i32 = arith.constant 0 : i32
    %c0_i32_0 = arith.constant 0 : i32
    %c0_i32_1 = arith.constant 0 : i32
    return %c0_i32, %c0_i32_0 : i32, i32
  }
  func.func @transform_7(%arg0: i32) -> (i32, i32) {
    %c0_i32 = arith.constant 0 : i32
    %c0_i32_0 = arith.constant 0 : i32
    %c0_i32_1 = arith.constant 0 : i32
    return %c0_i32, %c0_i32_0 : i32, i32
  }
  func.func @transform_8(%arg0: i32) -> (i32, i32) {
    %c0_i32 = arith.constant 0 : i32
    %c0_i32_0 = arith.constant 0 : i32
    %c0_i32_1 = arith.constant 0 : i32
    return %c0_i32, %c0_i32_0 : i32, i32
  }
  func.func @transform_9(%arg0: i32) -> (i32, i32) {
    %c0_i32 = arith.constant 0 : i32
    %c0_i32_0 = arith.constant 0 : i32
    return %arg0, %c0_i32 : i32, i32
  }
  func.func @transform_10(%arg0: i32) -> (i32, i32) {
    %c0_i32 = arith.constant 0 : i32
    %c0_i32_0 = arith.constant 0 : i32
    return %arg0, %c0_i32 : i32, i32
  }
}

module attributes {stable_mosaic.version = 11 : i64} {
  func.func @_pool_decode_kernel(%arg0: i32, %arg1: memref<1x16xi32, #tpu.memory_space<vmem>>, %arg2: memref<16x32xf32, #tpu.memory_space<vmem>>, %arg3: memref<32x64xf32, #tpu.memory_space<vmem>>, %arg4: memref<1x64xf32, #tpu.memory_space<vmem>>, %arg5: memref<4x32xf32, #tpu.memory_space<vmem>>, %arg6: memref<2x32xf32, #tpu.memory_space<vmem>>, %arg7: memref<1x2xf32, #tpu.memory_space<vmem>>, %arg8: memref<2x2xf32, #tpu.memory_space<vmem>>, %arg9: memref<8x32xf32, #tpu.memory_space<vmem>>) attributes {dimension_semantics = [#tpu.dimension_semantics<arbitrary>], iteration_bounds = array<i64: 1>, scalar_prefetch = 0 : i64, scratch_operands = 1 : i64, tpu.core_type = #tpu.core_type<tc>, window_params = [{transform_indices = @transform_0, window_bounds = array<i64: 1, 16>}, {transform_indices = @transform_1, window_bounds = array<i64: 16, 32>}, {pipeline_mode = #tpu.pipeline_mode<synchronous>, transform_indices = @transform_2, window_bounds = array<i64: 32, 64>}, {pipeline_mode = #tpu.pipeline_mode<synchronous>, transform_indices = @transform_3, window_bounds = array<i64: 1, 64>}, {pipeline_mode = #tpu.pipeline_mode<synchronous>, transform_indices = @transform_4, window_bounds = array<i64: 4, 32>}, {pipeline_mode = #tpu.pipeline_mode<synchronous>, transform_indices = @transform_5, window_bounds = array<i64: 2, 32>}, {pipeline_mode = #tpu.pipeline_mode<synchronous>, transform_indices = @transform_6, window_bounds = array<i64: 1, 2>}, {pipeline_mode = #tpu.pipeline_mode<synchronous>, transform_indices = @transform_7, window_bounds = array<i64: 2, 2>}]} {
    %c0_i32 = arith.constant 0 : i32
    %0 = arith.cmpi eq, %arg0, %c0_i32 : i32
    %1 = arith.extui %0 : i1 to i32
    %c0_i32_0 = arith.constant 0 : i32
    %2 = arith.cmpi ne, %1, %c0_i32_0 : i32
    scf.if %2 {
      %cst_10 = arith.constant 0.000000e+00 : f32
      %17 = vector.broadcast %cst_10 : f32 to vector<8x32xf32>
      %c0_11 = arith.constant 0 : index
      %c0_12 = arith.constant 0 : index
      %18 = vector.load %arg9[%c0_11, %c0_12] : memref<8x32xf32, #tpu.memory_space<vmem>>, vector<8x32xf32>
      tpu.vector_store %arg9[%c0_11, %c0_12], %17 {strides = array<i32>} : memref<8x32xf32, #tpu.memory_space<vmem>>, vector<8x32xf32>,
    } else {
    }
    %3 = tpu.iota {dimensions = array<i32: 0>} : vector<8x16xi32>
    %c0 = arith.constant 0 : index
    %c0_1 = arith.constant 0 : index
    %4 = vector.load %arg1[%c0, %c0_1] : memref<1x16xi32, #tpu.memory_space<vmem>>, vector<1x16xi32>
    %5 = vector.broadcast %4 : vector<1x16xi32> to vector<8x16xi32>
    %6 = arith.cmpi eq, %3, %5 : vector<8x16xi32>
    %7 = arith.extui %6 : vector<8x16xi1> to vector<8x16xi32>
    %8 = arith.sitofp %7 : vector<8x16xi32> to vector<8x16xf32>
    %c0_2 = arith.constant 0 : index
    %c0_3 = arith.constant 0 : index
    %9 = vector.load %arg9[%c0_2, %c0_3] : memref<8x32xf32, #tpu.memory_space<vmem>>, vector<8x32xf32>
    %c0_4 = arith.constant 0 : index
    %c0_5 = arith.constant 0 : index
    %10 = vector.load %arg2[%c0_4, %c0_5] : memref<16x32xf32, #tpu.memory_space<vmem>>, vector<16x32xf32>
    %cst = arith.constant dense<0.000000e+00> : vector<8x32xf32>
    %11 = tpu.matmul %8, %10, %cst {dimension_numbers = #tpu.dot_dimension_numbers<[1], [0], [0], [1], [0, 0, 1, 1], [], []>} : vector<8x16xf32>, vector<16x32xf32>, vector<8x32xf32> -> vector<8x32xf32>
    %12 = arith.addf %9, %11 : vector<8x32xf32>
    %c0_6 = arith.constant 0 : index
    %c0_7 = arith.constant 0 : index
    %13 = vector.load %arg9[%c0_6, %c0_7] : memref<8x32xf32, #tpu.memory_space<vmem>>, vector<8x32xf32>
    tpu.vector_store %arg9[%c0_6, %c0_7], %12 {strides = array<i32>} : memref<8x32xf32, #tpu.memory_space<vmem>>, vector<8x32xf32>,
    %c0_i32_8 = arith.constant 0 : i32
    %14 = arith.cmpi eq, %arg0, %c0_i32_8 : i32
    %15 = arith.extui %14 : i1 to i32
    %c0_i32_9 = arith.constant 0 : i32
    %16 = arith.cmpi ne, %15, %c0_i32_9 : i32
    scf.if %16 {
      %c0_10 = arith.constant 0 : index
      %c0_11 = arith.constant 0 : index
      %17 = vector.load %arg9[%c0_10, %c0_11] : memref<8x32xf32, #tpu.memory_space<vmem>>, vector<8x32xf32>
      %cst_12 = arith.constant dense<0.000000e+00> : vector<8xf32>
      %18 = vector.multi_reduction <add>, %17, %cst_12 [1] : vector<8x32xf32> to vector<8xf32>
      %19 = vector.shape_cast %18 : vector<8xf32> to vector<8x1xf32>
      %cst_13 = arith.constant 3.200000e+01 : f32
      %20 = vector.broadcast %cst_13 : f32 to vector<8x1xf32>
      %21 = arith.divf %19, %20 : vector<8x1xf32>
      %22 = vector.broadcast %21 : vector<8x1xf32> to vector<8x32xf32>
      %23 = arith.subf %17, %22 : vector<8x32xf32>
      %24 = arith.mulf %23, %23 : vector<8x32xf32>
      %cst_14 = arith.constant dense<0.000000e+00> : vector<8xf32>
      %25 = vector.multi_reduction <add>, %24, %cst_14 [1] : vector<8x32xf32> to vector<8xf32>
      %26 = vector.shape_cast %25 : vector<8xf32> to vector<8x1xf32>
      %cst_15 = arith.constant 3.200000e+01 : f32
      %27 = vector.broadcast %cst_15 : f32 to vector<8x1xf32>
      %28 = arith.divf %26, %27 : vector<8x1xf32>
      %29 = vector.broadcast %21 : vector<8x1xf32> to vector<8x32xf32>
      %30 = arith.subf %17, %29 : vector<8x32xf32>
      %cst_16 = arith.constant 9.99999974E-6 : f32
      %31 = vector.broadcast %cst_16 : f32 to vector<8x1xf32>
      %32 = arith.addf %28, %31 : vector<8x1xf32>
      %33 = math.rsqrt %32 : vector<8x1xf32>
      %34 = vector.broadcast %33 : vector<8x1xf32> to vector<8x32xf32>
      %35 = arith.mulf %30, %34 : vector<8x32xf32>
      %c0_17 = arith.constant 0 : index
      %c0_18 = arith.constant 0 : index
      %36 = vector.load %arg3[%c0_17, %c0_18] : memref<32x64xf32, #tpu.memory_space<vmem>>, vector<32x64xf32>
      %cst_19 = arith.constant dense<0.000000e+00> : vector<8x64xf32>
      %37 = tpu.matmul %35, %36, %cst_19 {dimension_numbers = #tpu.dot_dimension_numbers<[1], [0], [0], [1], [0, 0, 1, 1], [], []>} : vector<8x32xf32>, vector<32x64xf32>, vector<8x64xf32> -> vector<8x64xf32>
      %c0_20 = arith.constant 0 : index
      %c0_21 = arith.constant 0 : index
      %38 = vector.load %arg4[%c0_20, %c0_21] : memref<1x64xf32, #tpu.memory_space<vmem>>, vector<1x64xf32>
      %39 = vector.broadcast %38 : vector<1x64xf32> to vector<8x64xf32>
      %40 = arith.addf %37, %39 : vector<8x64xf32>
      %41 = vector.extract_strided_slice %40 {offsets = [0, 0], sizes = [8, 32], strides = [1, 1]} : vector<8x64xf32> to vector<8x32xf32>
      %c0_22 = arith.constant 0 : index
      %c0_23 = arith.constant 0 : index
      %42 = vector.load %arg5[%c0_22, %c0_23] : memref<4x32xf32, #tpu.memory_space<vmem>>, vector<1x32xf32>
      %c2 = arith.constant 2 : index
      %c0_24 = arith.constant 0 : index
      %43 = vector.load %arg5[%c2, %c0_24] : memref<4x32xf32, #tpu.memory_space<vmem>>, vector<1x32xf32>
      %cst_25 = arith.constant dense<0.000000e+00> : vector<8xf32>
      %44 = vector.multi_reduction <add>, %41, %cst_25 [1] : vector<8x32xf32> to vector<8xf32>
      %45 = vector.shape_cast %44 : vector<8xf32> to vector<8x1xf32>
      %cst_26 = arith.constant 3.200000e+01 : f32
      %46 = vector.broadcast %cst_26 : f32 to vector<8x1xf32>
      %47 = arith.divf %45, %46 : vector<8x1xf32>
      %48 = vector.broadcast %47 : vector<8x1xf32> to vector<8x32xf32>
      %49 = arith.subf %41, %48 : vector<8x32xf32>
      %50 = arith.mulf %49, %49 : vector<8x32xf32>
      %cst_27 = arith.constant dense<0.000000e+00> : vector<8xf32>
      %51 = vector.multi_reduction <add>, %50, %cst_27 [1] : vector<8x32xf32> to vector<8xf32>
      %52 = vector.shape_cast %51 : vector<8xf32> to vector<8x1xf32>
      %cst_28 = arith.constant 3.200000e+01 : f32
      %53 = vector.broadcast %cst_28 : f32 to vector<8x1xf32>
      %54 = arith.divf %52, %53 : vector<8x1xf32>
      %55 = vector.broadcast %47 : vector<8x1xf32> to vector<8x32xf32>
      %56 = arith.subf %41, %55 : vector<8x32xf32>
      %cst_29 = arith.constant 9.99999974E-6 : f32
      %57 = vector.broadcast %cst_29 : f32 to vector<8x1xf32>
      %58 = arith.addf %54, %57 : vector<8x1xf32>
      %59 = math.rsqrt %58 : vector<8x1xf32>
      %60 = vector.broadcast %59 : vector<8x1xf32> to vector<8x32xf32>
      %61 = arith.mulf %56, %60 : vector<8x32xf32>
      %62 = vector.broadcast %42 : vector<1x32xf32> to vector<8x32xf32>
      %63 = arith.mulf %61, %62 : vector<8x32xf32>
      %64 = vector.broadcast %43 : vector<1x32xf32> to vector<8x32xf32>
      %65 = arith.addf %63, %64 : vector<8x32xf32>
      %c0_30 = arith.constant 0 : index
      %c0_31 = arith.constant 0 : index
      %66 = vector.load %arg6[%c0_30, %c0_31] : memref<2x32xf32, #tpu.memory_space<vmem>>, vector<1x32xf32>
      %67 = vector.broadcast %66 : vector<1x32xf32> to vector<8x32xf32>
      %68 = arith.mulf %65, %67 : vector<8x32xf32>
      %cst_32 = arith.constant dense<0.000000e+00> : vector<8xf32>
      %69 = vector.multi_reduction <add>, %68, %cst_32 [1] : vector<8x32xf32> to vector<8xf32>
      %70 = vector.shape_cast %69 : vector<8xf32> to vector<8x1xf32>
      %c0_33 = arith.constant 0 : index
      %c0_34 = arith.constant 0 : index
      %71 = vector.load %arg7[%c0_33, %c0_34] : memref<1x2xf32, #tpu.memory_space<vmem>>, vector<1x1xf32>
      %72 = vector.broadcast %71 : vector<1x1xf32> to vector<8x1xf32>
      %73 = arith.addf %70, %72 : vector<8x1xf32>
      %74 = vector.extract_strided_slice %40 {offsets = [0, 32], sizes = [8, 32], strides = [1, 1]} : vector<8x64xf32> to vector<8x32xf32>
      %c1 = arith.constant 1 : index
      %c0_35 = arith.constant 0 : index
      %75 = vector.load %arg5[%c1, %c0_35] : memref<4x32xf32, #tpu.memory_space<vmem>>, vector<1x32xf32>
      %c3 = arith.constant 3 : index
      %c0_36 = arith.constant 0 : index
      %76 = vector.load %arg5[%c3, %c0_36] : memref<4x32xf32, #tpu.memory_space<vmem>>, vector<1x32xf32>
      %cst_37 = arith.constant dense<0.000000e+00> : vector<8xf32>
      %77 = vector.multi_reduction <add>, %74, %cst_37 [1] : vector<8x32xf32> to vector<8xf32>
      %78 = vector.shape_cast %77 : vector<8xf32> to vector<8x1xf32>
      %cst_38 = arith.constant 3.200000e+01 : f32
      %79 = vector.broadcast %cst_38 : f32 to vector<8x1xf32>
      %80 = arith.divf %78, %79 : vector<8x1xf32>
      %81 = vector.broadcast %80 : vector<8x1xf32> to vector<8x32xf32>
      %82 = arith.subf %74, %81 : vector<8x32xf32>
      %83 = arith.mulf %82, %82 : vector<8x32xf32>
      %cst_39 = arith.constant dense<0.000000e+00> : vector<8xf32>
      %84 = vector.multi_reduction <add>, %83, %cst_39 [1] : vector<8x32xf32> to vector<8xf32>
      %85 = vector.shape_cast %84 : vector<8xf32> to vector<8x1xf32>
      %cst_40 = arith.constant 3.200000e+01 : f32
      %86 = vector.broadcast %cst_40 : f32 to vector<8x1xf32>
      %87 = arith.divf %85, %86 : vector<8x1xf32>
      %88 = vector.broadcast %80 : vector<8x1xf32> to vector<8x32xf32>
      %89 = arith.subf %74, %88 : vector<8x32xf32>
      %cst_41 = arith.constant 9.99999974E-6 : f32
      %90 = vector.broadcast %cst_41 : f32 to vector<8x1xf32>
      %91 = arith.addf %87, %90 : vector<8x1xf32>
      %92 = math.rsqrt %91 : vector<8x1xf32>
      %93 = vector.broadcast %92 : vector<8x1xf32> to vector<8x32xf32>
      %94 = arith.mulf %89, %93 : vector<8x32xf32>
      %95 = vector.broadcast %75 : vector<1x32xf32> to vector<8x32xf32>
      %96 = arith.mulf %94, %95 : vector<8x32xf32>
      %97 = vector.broadcast %76 : vector<1x32xf32> to vector<8x32xf32>
      %98 = arith.addf %96, %97 : vector<8x32xf32>
      %c1_42 = arith.constant 1 : index
      %c0_43 = arith.constant 0 : index
      %99 = vector.load %arg6[%c1_42, %c0_43] : memref<2x32xf32, #tpu.memory_space<vmem>>, vector<1x32xf32>
      %100 = vector.broadcast %99 : vector<1x32xf32> to vector<8x32xf32>
      %101 = arith.mulf %98, %100 : vector<8x32xf32>
      %cst_44 = arith.constant dense<0.000000e+00> : vector<8xf32>
      %102 = vector.multi_reduction <add>, %101, %cst_44 [1] : vector<8x32xf32> to vector<8xf32>
      %103 = vector.shape_cast %102 : vector<8xf32> to vector<8x1xf32>
      %c0_45 = arith.constant 0 : index
      %c1_46 = arith.constant 1 : index
      %104 = vector.load %arg7[%c0_45, %c1_46] : memref<1x2xf32, #tpu.memory_space<vmem>>, vector<1x1xf32>
      %105 = vector.broadcast %104 : vector<1x1xf32> to vector<8x1xf32>
      %106 = arith.addf %103, %105 : vector<8x1xf32>
      %107 = tpu.concatenate %73, %106 in 1 : vector<8x1xf32>, vector<8x1xf32> -> vector<8x2xf32>
      %108 = vector.extract_strided_slice %107 {offsets = [0, 0], sizes = [2, 2], strides = [1, 1]} : vector<8x2xf32> to vector<2x2xf32>
      %c0_47 = arith.constant 0 : index
      %c0_48 = arith.constant 0 : index
      %109 = vector.load %arg8[%c0_47, %c0_48] : memref<2x2xf32, #tpu.memory_space<vmem>>, vector<2x2xf32>
      tpu.vector_store %arg8[%c0_47, %c0_48], %108 {strides = array<i32>} : memref<2x2xf32, #tpu.memory_space<vmem>>, vector<2x2xf32>,
    } else {
    }
    return
  }
  func.func @transform_0(%arg0: i32) -> (i32, i32) {
    %c0_i32 = arith.constant 0 : i32
    %c0_i32_0 = arith.constant 0 : i32
    return %c0_i32, %arg0 : i32, i32
  }
  func.func @transform_1(%arg0: i32) -> (i32, i32) {
    %c0_i32 = arith.constant 0 : i32
    %c0_i32_0 = arith.constant 0 : i32
    return %arg0, %c0_i32 : i32, i32
  }
  func.func @transform_2(%arg0: i32) -> (i32, i32) {
    %c0_i32 = arith.constant 0 : i32
    %c0_i32_0 = arith.constant 0 : i32
    %c0_i32_1 = arith.constant 0 : i32
    return %c0_i32, %c0_i32_0 : i32, i32
  }
  func.func @transform_3(%arg0: i32) -> (i32, i32) {
    %c0_i32 = arith.constant 0 : i32
    %c0_i32_0 = arith.constant 0 : i32
    %c0_i32_1 = arith.constant 0 : i32
    return %c0_i32, %c0_i32_0 : i32, i32
  }
  func.func @transform_4(%arg0: i32) -> (i32, i32) {
    %c0_i32 = arith.constant 0 : i32
    %c0_i32_0 = arith.constant 0 : i32
    %c0_i32_1 = arith.constant 0 : i32
    return %c0_i32, %c0_i32_0 : i32, i32
  }
  func.func @transform_5(%arg0: i32) -> (i32, i32) {
    %c0_i32 = arith.constant 0 : i32
    %c0_i32_0 = arith.constant 0 : i32
    %c0_i32_1 = arith.constant 0 : i32
    return %c0_i32, %c0_i32_0 : i32, i32
  }
  func.func @transform_6(%arg0: i32) -> (i32, i32) {
    %c0_i32 = arith.constant 0 : i32
    %c0_i32_0 = arith.constant 0 : i32
    %c0_i32_1 = arith.constant 0 : i32
    return %c0_i32, %c0_i32_0 : i32, i32
  }
  func.func @transform_7(%arg0: i32) -> (i32, i32) {
    %c0_i32 = arith.constant 0 : i32
    %c0_i32_0 = arith.constant 0 : i32
    %c0_i32_1 = arith.constant 0 : i32
    return %c0_i32, %c0_i32_0 : i32, i32
  }
}

</mosaic_0001>

<bundles_post_ra>
// kernel: meta_edge_forward.10
= control target key start
LH: loop header
LB: loop body
LE: loop exit
PB: predicated region body
PF: predicated region fallthrough
CT: control target
= control target key end

     0   :  { %s883_s21 = smov 0   ;;  %s1021_s0 = inlined_call_operand.vmem [shape: f32[24,3], index: 0, kind: input, shape index: {}]   ;;  %s1022_s1 = inlined_call_operand.vmem [shape: f32[3,64], index: 1, kind: input, shape index: {}]   ;;  %s1023_s2 = inlined_call_operand.vmem [shape: f32[128,64], index: 2, kind: input, shape index: {}]   ;;  %s1024_s3 = inlined_call_operand.vmem [shape: f32[64,32], index: 3, kind: input, shape index: {}]   ;;  %s1025_s4 = inlined_call_operand.vmem [shape: f32[5,64], index: 4, kind: input, shape index: {}]   ;;  %s1026_s5 = inlined_call_operand.vmem [shape: f32[1,32], index: 5, kind: input, shape index: {}]   ;;  %s1027_s6 = inlined_call_operand.vmem [shape: f32[24,32], index: 6, kind: output, shape index: {}]  }
   0x1 LB: > { %s677_s22 = sadd.s32 4294967295, %s843_s21   ;;  %p681_p0 = scmp.ge.s32.totalorder %s843_s21, 1  ;;  %s843_s21 = sphi %s883_s21, %s16_s21  }
   0x2   : > { %p211_p1 = scmp.lt.s32.totalorder %s843_s21, 4 }
   0x4   : > { %p212_p2 = pnand %p681_p0, %p211_p1 }
   0x5   : > { %v248_v0 = vld [vmem:[%s1022_s1] sm:$0x7] (!%p212_p2)  ;;  %vm258_vm0 = vcmask (!%p212_p2), 1042432   ;;  %p239_p3 = scmp.lt.s32.totalorder (!%p212_p2), %s677_s22, 2  ;;  %v845_v1 = vmov (!%p212_p2), 0.0   ;;  %vm846_vm1 = vmmov (!%p212_p2), 0  }
   0x6   : > { %215 = sbr.rel (%p212_p2) target bundleno = 1193 (0x4a9), region = 44  ;;  %726 = vmatprep.subr.mxu0 (!%p212_p2), %v845_v1  ;;  %728 = vmatprep.mubr.msk.f32.mxu0 (!%p212_p2), %vm846_vm1, %v845_v1  ;;  %v332_v2 = vld [vmem:[%s1023_s2] sm:$0xff] (!%p212_p2)  ;;  %v333_v3 = vld [vmem:[%s1023_s2 + $0x8] sm:$0xff] (!%p212_p2)  ;;  %v334_v4 = vld [vmem:[%s1023_s2 + $0x10] sm:$0xff] (!%p212_p2)  ;;  %v847_v5 = vmov (!%p212_p2), 0.0|0.0   ;;  %vm254_vm2 = vcmask (!%p212_p2), 23552  }
   0x7   : > { %727 = vmatpush3.msk.msra.mxu0 (!%p212_p2), %vm258_vm0, %v248_v0  ;;  %788 = vmatprep.subr.bf16.mxu1 (!%p212_p2), %v847_v5  ;;  %v789_v6 = vpack.c.bf16 (!%p212_p2), %v333_v3, %v332_v2  ;;  %v335_v7 = vld [vmem:[%s1023_s2 + $0x18] sm:$0xff] (!%p212_p2)  ;;  %v336_v9 = vld [vmem:[%s1023_s2 + $0x20] sm:$0xff] (!%p212_p2)  ;;  %v337_v10 = vld [vmem:[%s1023_s2 + $0x28] sm:$0xff] (!%p212_p2)  ;;  %vm366_vm3 = vcmask (!%p212_p2), 523264   ;;  %vm622_vm4 = vcmask (!%p212_p2), 261120  }
   0x8   : > { %747 = vmatprep.mubr.msk.f32.mxu1 (!%p212_p2), %vm846_vm1, %v845_v1  ;;  %800 = vmatprep.subr.bf16.mxu0 (!%p212_p2), %v847_v5  ;;  %v792_v8 = vpack.c.bf16 (!%p212_p2), %v335_v7, %v334_v4  ;;  %v795_v12 = vpack.c.bf16 (!%p212_p2), %v337_v10, %v336_v9  ;;  %v338_v13 = vld [vmem:[%s1023_s2 + $0x30] sm:$0xff] (!%p212_p2)  ;;  %v339_v14 = vld [vmem:[%s1023_s2 + $0x38] sm:$0xff] (!%p212_p2)  ;;  %v341_v16 = vld [vmem:[%s1023_s2 + $0x40] sm:$0xff] (!%p212_p2) }
   0x9   : > { %790 = vmatpush3.bf16.msra.mxu1 (!%p212_p2), %v789_v6  ;;  %v798_v15 = vpack.c.bf16 (!%p212_p2), %v339_v14, %v338_v13  ;;  %v342_v17 = vld [vmem:[%s1023_s2 + $0x48] sm:$0xff] (!%p212_p2)  ;;  %v343_v18 = vld [vmem:[%s1023_s2 + $0x50] sm:$0xff] (!%p212_p2)  ;;  %v344_v20 = vld [vmem:[%s1023_s2 + $0x58] sm:$0xff] (!%p212_p2) }
   0xa   : > { %791 = vmatprep.subr.bf16.mxu1 (!%p212_p2), %v847_v5  ;;  %v801_v19 = vpack.c.bf16 (!%p212_p2), %v342_v17, %v341_v16  ;;  %v804_v21 = vpack.c.bf16 (!%p212_p2), %v344_v20, %v343_v18  ;;  %v345_v22 = vld [vmem:[%s1023_s2 + $0x60] sm:$0xff] (!%p212_p2)  ;;  %v346_v23 = vld [vmem:[%s1023_s2 + $0x68] sm:$0xff] (!%p212_p2)  ;;  %v347_v30 = vld [vmem:[%s1023_s2 + $0x70] sm:$0xff] (!%p212_p2) }
   0xb   : > { %v807_v24 = vpack.c.bf16 (!%p212_p2), %v346_v23, %v345_v22  ;;  %v684_v25 = vld [vmem:[%s1025_s4] ss:$0 sm:$0xff] (!%p212_p2)  ;;  %v348_v31 = vld [vmem:[%s1023_s2 + $0x78] sm:$0xff] (!%p212_p2)  ;;  %v687_v33 = vld [vmem:[%s1025_s4 + $0x1] ss:$0 sm:$0xff] (!%p212_p2) }
   0xc   : > { %v810_v32 = vpack.c.bf16 (!%p212_p2), %v348_v31, %v347_v30  ;;  %v689_v38 = vld [vmem:[%s1025_s4 + $0x2] ss:$0 sm:$0xff] (!%p212_p2)  ;;  %v353_v50 = vld [vmem:[%s1024_s3 + $0x8] sm:$0xff] (!%p212_p2)  ;;  %v354_v52 = vld [vmem:[%s1024_s3 + $0x10] sm:$0xff] (!%p212_p2) }
   0xd   : > { %s1029_s22 = smov (!%p239_p3, %s677_s22), 2  ;;  %793 = vmatpush3.bf16.msra.mxu1 %v792_v8  ;;  %v352_v49 = vld [vmem:[%s1024_s3] sm:$0xff]  ;;  %v355_v53 = vld [vmem:[%s1024_s3 + $0x18] sm:$0xff]  ;;  %v357_v56 = vld [vmem:[%s1024_s3 + $0x28] sm:$0xff] }
   0xe   : > { %s682_s9 = sshll.u32 %s1029_s22, 3  ;;  %794 = vmatprep.subr.bf16.mxu1 %v847_v5  ;;  %v813_v51 = vpack.c.bf16 %v353_v50, %v352_v49  ;;  %v816_v54 = vpack.c.bf16 %v355_v53, %v354_v52  ;;  %v356_v55 = vld [vmem:[%s1024_s3 + $0x20] sm:$0xff]  ;;  %v358_v58 = vld [vmem:[%s1024_s3 + $0x30] sm:$0xff]  ;;  %v359_v59 = vld [vmem:[%s1024_s3 + $0x38] sm:$0xff] }
   0xf   : > { %s242_s12 = scalar_lea.vmem %s1021_s0, %s682_s9  ;;  %v819_v57 = vpack.c.bf16 %v357_v56, %v356_v55  ;;  %v822_v60 = vpack.c.bf16 %v359_v59, %v358_v58  ;;  %v692_v3 = vld [vmem:[%s1025_s4 + $0x4] ss:$0 sm:$0xff]  ;;  %v693_v6 = vld [vmem:[%s1026_s5] ss:$0 sm:$0xff]  ;;  %s246_s27 = scalar_lea.vmem %s1027_s6, %s682_s9 }
  0x10   : > { %v247_v11 = vld [vmem:[%s242_s12] sm:$0xff] }
  0x11   : > { %729 = vmatmul.mubr.msk.f32.vlgmr.msra.gmra.mrb[0].mxu0 %vm254_vm2, %v247_v11  ;;  %796 = vmatpush3.bf16.msra.mxu1 %v795_v12 }
  0x12   : > { %766 = vmatprep.mubr.msk.f32.mxu0 %vm846_vm1, %v845_v1  ;;  %797 = vmatprep.subr.bf16.mxu1 %v847_v5 }
  0x13   : > { %802 = vmatpush3.bf16.msra.mxu0 %v801_v19 }
  0x14   : > { %803 = vmatprep.subr.bf16.mxu0 %v847_v5 }
  0x15   : > { %799 = vmatpush3.bf16.msra.mxu1 %v798_v15 }
  0x16   : > { %812 = vmatprep.subr.bf16.mxu1 %v847_v5 }
  0x17   : > { %805 = vmatpush3.bf16.msra.mxu0 %v804_v21 }
  0x18   : > { %806 = vmatprep.subr.bf16.mxu0 %v847_v5 }
  0x1b   : > { %808 = vmatpush3.bf16.msra.mxu0 %v807_v24 }
  0x1c   : > { %809 = vmatprep.subr.bf16.mxu0 %v847_v5 }
  0x1f   : > { %811 = vmatpush3.bf16.msra.mxu0 %v810_v32 }
  0xe4   : > { %v328_v26 = vpop.f32.mrb[0].mxu0 }
  0xe5   : > { %v329_v27 = vadd.f32 %v684_v25, %v328_v26  ;;  %v730_v28 = vpop.f32.mrb[1].mxu0 }
  0xe7   : > { %v361_v29 = vmax.f32 %v329_v27, 0.0 }
  0xe9   : > { %748 = vmatmul.mubr.msk.f32.vlgmr.msra.gmra.mrb[0].mxu1 %vm366_vm3, %v361_v29 }
  0xea   : > { %785 = vmatprep.mubr.msk.f32.mxu1 %vm846_vm1, %v845_v1  ;;  %814 = vmatpush3.bf16.msra.mxu1 %v813_v51  ;;  %v691_v1 = vld [vmem:[%s1025_s4 + $0x3] ss:$0 sm:$0xff] }
  0xeb   : > { %815 = vmatprep.subr.bf16.mxu1 %v847_v5 }
  0xee   : > { %817 = vmatpush3.bf16.msra.mxu1 %v816_v54 }
  0xef   : > { %818 = vmatprep.subr.bf16.mxu1 %v847_v5 }
  0xf2   : > { %820 = vmatpush3.bf16.msra.mxu1 %v819_v57 }
  0xf3   : > { %821 = vmatprep.subr.bf16.mxu1 %v847_v5 }
  0xf6   : > { %823 = vmatpush3.bf16.msra.mxu1 %v822_v60 }
 0x1bc   : > { %v436_v34 = vpop.f32.mrb[0].mxu1 }
 0x1bd   : > { %v437_v35 = vadd.f32 %v687_v33, %v436_v34  ;;  %v749_v36 = vpop.f32.mrb[1].mxu1 }
 0x1bf   : > { %v440_v37 = vmax.f32 %v437_v35, 0.0 }
 0x1c1   : > { %767 = vmatmul.mubr.msk.f32.vlgmr.msra.gmra.mrb[2].mxu0 %vm366_vm3, %v440_v37 }
 0x294   : > { %v514_v39 = vpop.f32.mrb[2].mxu0 }
 0x295   : > { %v515_v40 = vadd.f32 %v689_v38, %v514_v39  ;;  %v768_v41 = vpop.f32.mrb[3].mxu0 }
 0x297   : > { %v518_v42 = vmax.f32 %v515_v40, 0.0 }
 0x299   : > { %v519_v43 = vsel %vm366_vm3, %v518_v42, 0.0 }
 0x29a   : > { %520 = vadd.xlane.f32.xlu0 %v519_v43 }
 0x327   : > { %v521_v44 = vpop.xlane.xlu0 %520 }
 0x328   : > { %v523_v45 = vmul.f32 0.015625, %v521_v44 }
 0x32a   : > { %v524_v46 = vsub.f32 %v518_v42, %v523_v45 }
 0x32c   : > { %v525_v47 = vmul.f32 %v524_v46, %v524_v46 }
 0x32e   : > { %v526_v48 = vsel %vm366_vm3, %v525_v47, 0.0 }
 0x32f   : > { %527 = vadd.xlane.f32.xlu0 %v526_v48 }
 0x3bc   : > { %v528_v61 = vpop.xlane.xlu0 %527 }
 0x3bd   : > { %v529_v62 = vmul.f32 0.015625, %v528_v61 }
 0x3bf   : > { %v530_v63 = vadd.f32 1e-05, %v529_v62 }
 0x3c1   : > { %835 = vrsqrt.f32 %v530_v63 }
 0x3cb   : > { %v836_v0 = vpop.eup %835 }
 0x3cc   : > { %v532_v2 = vmul.f32 %v836_v0, %v524_v46 }
 0x3ce   : > { %v537_v4 = vmul.f32 %v691_v1, %v532_v2 }
 0x3d0   : > { %v542_v5 = vadd.f32 %v692_v3, %v537_v4 }
 0x3d2   : > { %786 = vmatmul.mubr.msk.f32.vlgmr.msra.gmra.mrb[2].mxu1 %vm366_vm3, %v542_v5 }
 0x4a5   : > { %v618_v7 = vpop.f32.mrb[2].mxu1 }
 0x4a6   : > { %v619_v8 = vadd.f32 %v693_v6, %v618_v7  ;;  %v787_v9 = vpop.f32.mrb[3].mxu1 }
 0x4a8   : > { %623 = vst.msk [vmem:[%s246_s27] sm:$0xff] %vm622_vm4, %v619_v8 }
 0x4a9 PF: > { %s16_s21 = sadd.s32 1, %s843_s21  }
 0x4aa   : > { %p13_p4 = scmp.ge.s32.totalorder %s16_s21, 5  }
 0x4ac   :  { %15 = sbr.rel (!%p13_p4) target bundleno = 1 (0x1), region = 74 }

// kernel: meta_edge_forward.9
= control target key start
LH: loop header
LB: loop body
LE: loop exit
PB: predicated region body
PF: predicated region fallthrough
CT: control target
= control target key end

     0   :  { %s883_s21 = smov 0   ;;  %s1021_s0 = inlined_call_operand.vmem [shape: f32[16,4], index: 0, kind: input, shape index: {}]   ;;  %s1022_s1 = inlined_call_operand.vmem [shape: f32[4,64], index: 1, kind: input, shape index: {}]   ;;  %s1023_s2 = inlined_call_operand.vmem [shape: f32[128,64], index: 2, kind: input, shape index: {}]   ;;  %s1024_s3 = inlined_call_operand.vmem [shape: f32[64,32], index: 3, kind: input, shape index: {}]   ;;  %s1025_s4 = inlined_call_operand.vmem [shape: f32[5,64], index: 4, kind: input, shape index: {}]   ;;  %s1026_s5 = inlined_call_operand.vmem [shape: f32[1,32], index: 5, kind: input, shape index: {}]   ;;  %s1027_s6 = inlined_call_operand.vmem [shape: f32[16,32], index: 6, kind: output, shape index: {}]  }
   0x1 LB: > { %s677_s22 = sadd.s32 4294967295, %s843_s21   ;;  %p681_p0 = scmp.ge.s32.totalorder %s843_s21, 1  ;;  %s843_s21 = sphi %s883_s21, %s16_s21  }
   0x2   : > { %p211_p1 = scmp.lt.s32.totalorder %s843_s21, 3 }
   0x4   : > { %p212_p2 = pnand %p681_p0, %p211_p1 }
   0x5   : > { %v248_v0 = vld [vmem:[%s1022_s1] sm:$0xf] (!%p212_p2)  ;;  %vm258_vm0 = vcmask (!%p212_p2), 1043456   ;;  %p239_p3 = scmp.lt.s32.totalorder (!%p212_p2), %s677_s22, 1  ;;  %v845_v1 = vmov (!%p212_p2), 0.0   ;;  %vm846_vm1 = vmmov (!%p212_p2), 0  }
   0x6   : > { %215 = sbr.rel (%p212_p2) target bundleno = 1193 (0x4a9), region = 44  ;;  %726 = vmatprep.subr.mxu0 (!%p212_p2), %v845_v1  ;;  %728 = vmatprep.mubr.msk.f32.mxu0 (!%p212_p2), %vm846_vm1, %v845_v1  ;;  %v332_v2 = vld [vmem:[%s1023_s2] sm:$0xff] (!%p212_p2)  ;;  %v333_v3 = vld [vmem:[%s1023_s2 + $0x8] sm:$0xff] (!%p212_p2)  ;;  %v334_v4 = vld [vmem:[%s1023_s2 + $0x10] sm:$0xff] (!%p212_p2)  ;;  %v847_v5 = vmov (!%p212_p2), 0.0|0.0   ;;  %vm254_vm2 = vcmask (!%p212_p2), 31744  }
   0x7   : > { %727 = vmatpush3.msk.msra.mxu0 (!%p212_p2), %vm258_vm0, %v248_v0  ;;  %788 = vmatprep.subr.bf16.mxu1 (!%p212_p2), %v847_v5  ;;  %v789_v6 = vpack.c.bf16 (!%p212_p2), %v333_v3, %v332_v2  ;;  %v335_v7 = vld [vmem:[%s1023_s2 + $0x18] sm:$0xff] (!%p212_p2)  ;;  %v336_v9 = vld [vmem:[%s1023_s2 + $0x20] sm:$0xff] (!%p212_p2)  ;;  %v337_v10 = vld [vmem:[%s1023_s2 + $0x28] sm:$0xff] (!%p212_p2)  ;;  %vm366_vm3 = vcmask (!%p212_p2), 523264   ;;  %vm622_vm4 = vcmask (!%p212_p2), 261120  }
   0x8   : > { %747 = vmatprep.mubr.msk.f32.mxu1 (!%p212_p2), %vm846_vm1, %v845_v1  ;;  %800 = vmatprep.subr.bf16.mxu0 (!%p212_p2), %v847_v5  ;;  %v792_v8 = vpack.c.bf16 (!%p212_p2), %v335_v7, %v334_v4  ;;  %v795_v12 = vpack.c.bf16 (!%p212_p2), %v337_v10, %v336_v9  ;;  %v338_v13 = vld [vmem:[%s1023_s2 + $0x30] sm:$0xff] (!%p212_p2)  ;;  %v339_v14 = vld [vmem:[%s1023_s2 + $0x38] sm:$0xff] (!%p212_p2)  ;;  %v341_v16 = vld [vmem:[%s1023_s2 + $0x40] sm:$0xff] (!%p212_p2) }
   0x9   : > { %790 = vmatpush3.bf16.msra.mxu1 (!%p212_p2), %v789_v6  ;;  %v798_v15 = vpack.c.bf16 (!%p212_p2), %v339_v14, %v338_v13  ;;  %v342_v17 = vld [vmem:[%s1023_s2 + $0x48] sm:$0xff] (!%p212_p2)  ;;  %v343_v18 = vld [vmem:[%s1023_s2 + $0x50] sm:$0xff] (!%p212_p2)  ;;  %v344_v20 = vld [vmem:[%s1023_s2 + $0x58] sm:$0xff] (!%p212_p2) }
   0xa   : > { %791 = vmatprep.subr.bf16.mxu1 (!%p212_p2), %v847_v5  ;;  %v801_v19 = vpack.c.bf16 (!%p212_p2), %v342_v17, %v341_v16  ;;  %v804_v21 = vpack.c.bf16 (!%p212_p2), %v344_v20, %v343_v18  ;;  %v345_v22 = vld [vmem:[%s1023_s2 + $0x60] sm:$0xff] (!%p212_p2)  ;;  %v346_v23 = vld [vmem:[%s1023_s2 + $0x68] sm:$0xff] (!%p212_p2)  ;;  %v347_v30 = vld [vmem:[%s1023_s2 + $0x70] sm:$0xff] (!%p212_p2) }
   0xb   : > { %v807_v24 = vpack.c.bf16 (!%p212_p2), %v346_v23, %v345_v22  ;;  %v684_v25 = vld [vmem:[%s1025_s4] ss:$0 sm:$0xff] (!%p212_p2)  ;;  %v348_v31 = vld [vmem:[%s1023_s2 + $0x78] sm:$0xff] (!%p212_p2)  ;;  %v687_v33 = vld [vmem:[%s1025_s4 + $0x1] ss:$0 sm:$0xff] (!%p212_p2) }
   0xc   : > { %v810_v32 = vpack.c.bf16 (!%p212_p2), %v348_v31, %v347_v30  ;;  %v689_v38 = vld [vmem:[%s1025_s4 + $0x2] ss:$0 sm:$0xff] (!%p212_p2)  ;;  %v353_v50 = vld [vmem:[%s1024_s3 + $0x8] sm:$0xff] (!%p212_p2)  ;;  %v354_v52 = vld [vmem:[%s1024_s3 + $0x10] sm:$0xff] (!%p212_p2) }
   0xd   : > { %s1029_s22 = smov (!%p239_p3, %s677_s22), 1  ;;  %793 = vmatpush3.bf16.msra.mxu1 %v792_v8  ;;  %v352_v49 = vld [vmem:[%s1024_s3] sm:$0xff]  ;;  %v355_v53 = vld [vmem:[%s1024_s3 + $0x18] sm:$0xff]  ;;  %v357_v56 = vld [vmem:[%s1024_s3 + $0x28] sm:$0xff] }
   0xe   : > { %s682_s9 = sshll.u32 %s1029_s22, 3  ;;  %794 = vmatprep.subr.bf16.mxu1 %v847_v5  ;;  %v813_v51 = vpack.c.bf16 %v353_v50, %v352_v49  ;;  %v816_v54 = vpack.c.bf16 %v355_v53, %v354_v52  ;;  %v356_v55 = vld [vmem:[%s1024_s3 + $0x20] sm:$0xff]  ;;  %v358_v58 = vld [vmem:[%s1024_s3 + $0x30] sm:$0xff]  ;;  %v359_v59 = vld [vmem:[%s1024_s3 + $0x38] sm:$0xff] }
   0xf   : > { %s242_s12 = scalar_lea.vmem %s1021_s0, %s682_s9  ;;  %v819_v57 = vpack.c.bf16 %v357_v56, %v356_v55  ;;  %v822_v60 = vpack.c.bf16 %v359_v59, %v358_v58  ;;  %v692_v3 = vld [vmem:[%s1025_s4 + $0x4] ss:$0 sm:$0xff]  ;;  %v693_v6 = vld [vmem:[%s1026_s5] ss:$0 sm:$0xff]  ;;  %s246_s27 = scalar_lea.vmem %s1027_s6, %s682_s9 }
  0x10   : > { %v247_v11 = vld [vmem:[%s242_s12] sm:$0xff] }
  0x11   : > { %729 = vmatmul.mubr.msk.f32.vlgmr.msra.gmra.mrb[0].mxu0 %vm254_vm2, %v247_v11  ;;  %796 = vmatpush3.bf16.msra.mxu1 %v795_v12 }
  0x12   : > { %766 = vmatprep.mubr.msk.f32.mxu0 %vm846_vm1, %v845_v1  ;;  %797 = vmatprep.subr.bf16.mxu1 %v847_v5 }
  0x13   : > { %802 = vmatpush3.bf16.msra.mxu0 %v801_v19 }
  0x14   : > { %803 = vmatprep.subr.bf16.mxu0 %v847_v5 }
  0x15   : > { %799 = vmatpush3.bf16.msra.mxu1 %v798_v15 }
  0x16   : > { %812 = vmatprep.subr.bf16.mxu1 %v847_v5 }
  0x17   : > { %805 = vmatpush3.bf16.msra.mxu0 %v804_v21 }
  0x18   : > { %806 = vmatprep.subr.bf16.mxu0 %v847_v5 }
  0x1b   : > { %808 = vmatpush3.bf16.msra.mxu0 %v807_v24 }
  0x1c   : > { %809 = vmatprep.subr.bf16.mxu0 %v847_v5 }
  0x1f   : > { %811 = vmatpush3.bf16.msra.mxu0 %v810_v32 }
  0xe4   : > { %v328_v26 = vpop.f32.mrb[0].mxu0 }
  0xe5   : > { %v329_v27 = vadd.f32 %v684_v25, %v328_v26  ;;  %v730_v28 = vpop.f32.mrb[1].mxu0 }
  0xe7   : > { %v361_v29 = vmax.f32 %v329_v27, 0.0 }
  0xe9   : > { %748 = vmatmul.mubr.msk.f32.vlgmr.msra.gmra.mrb[0].mxu1 %vm366_vm3, %v361_v29 }
  0xea   : > { %785 = vmatprep.mubr.msk.f32.mxu1 %vm846_vm1, %v845_v1  ;;  %814 = vmatpush3.bf16.msra.mxu1 %v813_v51  ;;  %v691_v1 = vld [vmem:[%s1025_s4 + $0x3] ss:$0 sm:$0xff] }
  0xeb   : > { %815 = vmatprep.subr.bf16.mxu1 %v847_v5 }
  0xee   : > { %817 = vmatpush3.bf16.msra.mxu1 %v816_v54 }
  0xef   : > { %818 = vmatprep.subr.bf16.mxu1 %v847_v5 }
  0xf2   : > { %820 = vmatpush3.bf16.msra.mxu1 %v819_v57 }
  0xf3   : > { %821 = vmatprep.subr.bf16.mxu1 %v847_v5 }
  0xf6   : > { %823 = vmatpush3.bf16.msra.mxu1 %v822_v60 }
 0x1bc   : > { %v436_v34 = vpop.f32.mrb[0].mxu1 }
 0x1bd   : > { %v437_v35 = vadd.f32 %v687_v33, %v436_v34  ;;  %v749_v36 = vpop.f32.mrb[1].mxu1 }
 0x1bf   : > { %v440_v37 = vmax.f32 %v437_v35, 0.0 }
 0x1c1   : > { %767 = vmatmul.mubr.msk.f32.vlgmr.msra.gmra.mrb[2].mxu0 %vm366_vm3, %v440_v37 }
 0x294   : > { %v514_v39 = vpop.f32.mrb[2].mxu0 }
 0x295   : > { %v515_v40 = vadd.f32 %v689_v38, %v514_v39  ;;  %v768_v41 = vpop.f32.mrb[3].mxu0 }
 0x297   : > { %v518_v42 = vmax.f32 %v515_v40, 0.0 }
 0x299   : > { %v519_v43 = vsel %vm366_vm3, %v518_v42, 0.0 }
 0x29a   : > { %520 = vadd.xlane.f32.xlu0 %v519_v43 }
 0x327   : > { %v521_v44 = vpop.xlane.xlu0 %520 }
 0x328   : > { %v523_v45 = vmul.f32 0.015625, %v521_v44 }
 0x32a   : > { %v524_v46 = vsub.f32 %v518_v42, %v523_v45 }
 0x32c   : > { %v525_v47 = vmul.f32 %v524_v46, %v524_v46 }
 0x32e   : > { %v526_v48 = vsel %vm366_vm3, %v525_v47, 0.0 }
 0x32f   : > { %527 = vadd.xlane.f32.xlu0 %v526_v48 }
 0x3bc   : > { %v528_v61 = vpop.xlane.xlu0 %527 }
 0x3bd   : > { %v529_v62 = vmul.f32 0.015625, %v528_v61 }
 0x3bf   : > { %v530_v63 = vadd.f32 1e-05, %v529_v62 }
 0x3c1   : > { %835 = vrsqrt.f32 %v530_v63 }
 0x3cb   : > { %v836_v0 = vpop.eup %835 }
 0x3cc   : > { %v532_v2 = vmul.f32 %v836_v0, %v524_v46 }
 0x3ce   : > { %v537_v4 = vmul.f32 %v691_v1, %v532_v2 }
 0x3d0   : > { %v542_v5 = vadd.f32 %v692_v3, %v537_v4 }
 0x3d2   : > { %786 = vmatmul.mubr.msk.f32.vlgmr.msra.gmra.mrb[2].mxu1 %vm366_vm3, %v542_v5 }
 0x4a5   : > { %v618_v7 = vpop.f32.mrb[2].mxu1 }
 0x4a6   : > { %v619_v8 = vadd.f32 %v693_v6, %v618_v7  ;;  %v787_v9 = vpop.f32.mrb[3].mxu1 }
 0x4a8   : > { %623 = vst.msk [vmem:[%s246_s27] sm:$0xff] %vm622_vm4, %v619_v8 }
 0x4a9 PF: > { %s16_s21 = sadd.s32 1, %s843_s21  }
 0x4aa   : > { %p13_p4 = scmp.ge.s32.totalorder %s16_s21, 4  }
 0x4ac   :  { %15 = sbr.rel (!%p13_p4) target bundleno = 1 (0x1), region = 74 }

// kernel: meta_edge_forward.11
= control target key start
LH: loop header
LB: loop body
LE: loop exit
PB: predicated region body
PF: predicated region fallthrough
CT: control target
= control target key end

     0   :  { %s1867_s13 = smov 0   ;;  %s2207_s0 = inlined_call_operand.vmem [shape: f32[24,32], index: 0, kind: input, shape index: {}]   ;;  %s2208_s1 = inlined_call_operand.vmem [shape: f32[24,32], index: 1, kind: input, shape index: {}]   ;;  %s2209_s2 = inlined_call_operand.vmem [shape: f32[24,32], index: 2, kind: input, shape index: {}]   ;;  %s2210_s3 = inlined_call_operand.vmem [shape: f32[32,128], index: 3, kind: input, shape index: {}]   ;;  %s2211_s4 = inlined_call_operand.vmem [shape: f32[96,64], index: 4, kind: input, shape index: {}]   ;;  %s2212_s5 = inlined_call_operand.vmem [shape: f32[256,64], index: 5, kind: input, shape index: {}]   ;;  %s2213_s6 = inlined_call_operand.vmem [shape: f32[128,32], index: 6, kind: input, shape index: {}]   ;;  %s2214_s7 = inlined_call_operand.vmem [shape: f32[10,64], index: 7, kind: input, shape index: {}]   ;;  %s2215_s8 = inlined_call_operand.vmem [shape: f32[2,32], index: 8, kind: input, shape index: {}]   ;;  %s2216_s9 = inlined_call_operand.vmem [shape: f32[24,32], index: 9, kind: output, shape index: {0}]   ;;  %s2217_s10 = inlined_call_operand.vmem [shape: f32[24,32], index: 10, kind: output, shape index: {1}]  }
   0x1 LB: > { %s1422_s14 = sadd.s32 4294967295, %s1806_s13   ;;  %p1426_p0 = scmp.ge.s32.totalorder %s1806_s13, 1  ;;  %s1806_s13 = sphi %s1867_s13, %s21_s13  }
   0x2   : > { %p332_p1 = scmp.lt.s32.totalorder %s1806_s13, 4 }
   0x4   : > { %p333_p2 = pnand %p1426_p0, %p332_p1 }
   0x5   : > { %v403_v0 = vld [vmem:[%s2210_s3] sm:$0xff] (!%p333_p2)  ;;  %v404_v1 = vld [vmem:[%s2210_s3 + $0x8] sm:$0xff] (!%p333_p2)  ;;  %v405_v2 = vld [vmem:[%s2210_s3 + $0x10] sm:$0xff] (!%p333_p2)  ;;  %v1808_v3 = vmov (!%p333_p2), 0.0|0.0   ;;  %vm1809_vm0 = vmmov (!%p333_p2), 0   ;;  %v1810_v6 = vmov (!%p333_p2), 0.0  }
   0x6   : > { %336 = sbr.rel (%p333_p2) target bundleno = 2616 (0xa38), region = 56  ;;  %1688 = vmatprep.subr.bf16.mxu1 (!%p333_p2), %v1808_v3  ;;  %v1689_v4 = vpack.c.bf16 (!%p333_p2), %v404_v1, %v403_v0  ;;  %v406_v5 = vld [vmem:[%s2210_s3 + $0x18] sm:$0xff] (!%p333_p2)  ;;  %1538 = vmatprep.mubr.msk.f32.mxu1 (!%p333_p2), %vm1809_vm0, %v1810_v6  ;;  %p380_p3 = scmp.lt.s32.totalorder (!%p333_p2), %s1422_s14, 2  ;;  %v559_v7 = vld [vmem:[%s2211_s4 + $0x20] sm:$0xff] (!%p333_p2)  ;;  %v560_v8 = vld [vmem:[%s2211_s4 + $0x28] sm:$0xff] (!%p333_p2)  ;;  %vm407_vm1 = vcmask (!%p333_p2), 261120  }
   0x7   : > { %1700 = vmatprep.subr.bf16.mxu0 (!%p333_p2), %v1808_v3  ;;  %1560 = vmatprep.mubr.msk.f32.mxu0 (!%p333_p2), %vm1809_vm0, %v1810_v6  ;;  %v1692_v9 = vpack.c.bf16 (!%p333_p2), %v406_v5, %v405_v2  ;;  %v1701_v10 = vpack.c.bf16 (!%p333_p2), %v560_v8, %v559_v7  ;;  %v561_v11 = vld [vmem:[%s2211_s4 + $0x30] sm:$0xff] (!%p333_p2)  ;;  %v562_v12 = vld [vmem:[%s2211_s4 + $0x38] sm:$0xff] (!%p333_p2)  ;;  %v481_v13 = vld [vmem:[%s2211_s4] sm:$0xff] (!%p333_p2)  ;;  %vm677_vm2 = vcmask (!%p333_p2), 523264   ;;  %s1811_s23 = smov (!%p333_p2), 64  }
   0x8   : > { %1690 = vmatpush3.bf16.msra.mxu1 (!%p333_p2), %v1689_v4  ;;  %v482_v14 = vld [vmem:[%s2211_s4 + $0x8] sm:$0xff] (!%p333_p2)  ;;  %v1704_v15 = vpack.c.bf16 (!%p333_p2), %v562_v12, %v561_v11  ;;  %v483_v18 = vld [vmem:[%s2211_s4 + $0x10] sm:$0xff] (!%p333_p2)  ;;  %v484_v19 = vld [vmem:[%s2211_s4 + $0x18] sm:$0xff] (!%p333_p2) }
   0x9   : > { %1691 = vmatprep.subr.bf16.mxu1 (!%p333_p2), %v1808_v3  ;;  %1702 = vmatpush3.bf16.msra.mxu0 (!%p333_p2), %v1701_v10  ;;  %v1695_v17 = vpack.c.bf16 (!%p333_p2), %v482_v14, %v481_v13  ;;  %v1698_v21 = vpack.c.bf16 (!%p333_p2), %v484_v19, %v483_v18  ;;  %v643_v23 = vld [vmem:[%s2212_s5] sm:$0xff] (!%p333_p2)  ;;  %v644_v24 = vld [vmem:[%s2212_s5 + $0x8] sm:$0xff] (!%p333_p2)  ;;  %v645_v26 = vld [vmem:[%s2212_s5 + $0x10] sm:$0xff] (!%p333_p2) }
   0xa   : > { %1703 = vmatprep.subr.bf16.mxu0 (!%p333_p2), %v1808_v3  ;;  %v1707_v25 = vpack.c.bf16 (!%p333_p2), %v644_v24, %v643_v23  ;;  %v646_v27 = vld [vmem:[%s2212_s5 + $0x18] sm:$0xff] (!%p333_p2)  ;;  %v647_v29 = vld [vmem:[%s2212_s5 + $0x20] sm:$0xff] (!%p333_p2)  ;;  %v648_v30 = vld [vmem:[%s2212_s5 + $0x28] sm:$0xff] (!%p333_p2) }
   0xb   : > { %v1710_v28 = vpack.c.bf16 (!%p333_p2), %v646_v27, %v645_v26  ;;  %v1713_v31 = vpack.c.bf16 (!%p333_p2), %v648_v30, %v647_v29  ;;  %v649_v32 = vld [vmem:[%s2212_s5 + $0x30] sm:$0xff] (!%p333_p2)  ;;  %v650_v33 = vld [vmem:[%s2212_s5 + $0x38] sm:$0xff] (!%p333_p2)  ;;  %v652_v35 = vld [vmem:[%s2212_s5 + $0x40] sm:$0xff] (!%p333_p2) }
   0xc   : > { %1693 = vmatpush3.bf16.msra.mxu1 (!%p333_p2), %v1692_v9  ;;  %v1716_v34 = vpack.c.bf16 (!%p333_p2), %v650_v33, %v649_v32  ;;  %v653_v36 = vld [vmem:[%s2212_s5 + $0x48] sm:$0xff] (!%p333_p2)  ;;  %v654_v37 = vld [vmem:[%s2212_s5 + $0x50] sm:$0xff] (!%p333_p2)  ;;  %v655_v39 = vld [vmem:[%s2212_s5 + $0x58] sm:$0xff] (!%p333_p2) }
   0xd   : > { %s2219_s14 = smov (!%p380_p3, %s1422_s14), 2  ;;  %1694 = vmatprep.subr.bf16.mxu1 %v1808_v3  ;;  %1705 = vmatpush3.bf16.msra.mxu0 %v1704_v15  ;;  %v1719_v38 = vpack.c.bf16 %v653_v36, %v652_v35  ;;  %v1722_v40 = vpack.c.bf16 %v655_v39, %v654_v37  ;;  %v656_v41 = vld [vmem:[%s2212_s5 + $0x60] sm:$0xff]  ;;  %v657_v42 = vld [vmem:[%s2212_s5 + $0x68] sm:$0xff]  ;;  %v658_v55 = vld [vmem:[%s2212_s5 + $0x70] sm:$0xff] }
   0xe   : > { %s1912_s17 = sshll.u32 %s2219_s14, 3  ;;  %1718 = vmatprep.subr.bf16.mxu0 %v1808_v3  ;;  %v1725_v43 = vpack.c.bf16 %v657_v42, %v656_v41  ;;  %v1435_v51 = vld [vmem:[%s2214_s7] ss:$0 sm:$0xff]  ;;  %v659_v56 = vld [vmem:[%s2212_s5 + $0x78] sm:$0xff]  ;;  %v1436_v58 = vld [vmem:[%s2214_s7 + $0x1] ss:$0 sm:$0xff] }
   0xf   : > { %s383_s20 = scalar_lea.vmem %s2207_s0, %s1912_s17  ;;  %s391_s14 = scalar_lea.vmem %s2209_s2, %s1912_s17  ;;  %v1728_v57 = vpack.c.bf16 %v659_v56, %v658_v55  ;;  %v1438_v63 = vld [vmem:[%s2214_s7 + $0x2] ss:$0 sm:$0xff]  ;;  %v664_v13 = vld [vmem:[%s2213_s6 + $0x8] sm:$0xff]  ;;  %v665_v15 = vld [vmem:[%s2213_s6 + $0x10] sm:$0xff] }
  0x10   : > { %v400_v16 = vld [vmem:[%s383_s20] sm:$0xff]  ;;  %s387_s29 = scalar_lea.vmem %s2208_s1, %s1912_s17  ;;  %v668_v19 = vld [vmem:[%s2213_s6 + $0x28] sm:$0xff]  ;;  %v670_v23 = vld [vmem:[%s2213_s6 + $0x38] sm:$0xff]  ;;  %s395_s28 = scalar_lea.vmem %s2216_s9, %s1912_s17 }
  0x11   : > { %v1930_v20 = vld [vmem:[%s391_s14] sm:$0xff]  ;;  %1539 = vmatmul.mubr.msk.f32.vlgmr.msra.gmra.mrb[0].mxu1 %vm407_vm1, %v400_v16  ;;  %v666_v16 = vld [vmem:[%s2213_s6 + $0x18] sm:$0xff]  ;;  %v934_v26 = vld [vmem:[%s2211_s4 + $0x48] sm:$0xff]  ;;  %s399_s21 = scalar_lea.vmem %s2217_s10, %s1912_s17 }
  0x12   : > { %1696 = vmatpush3.bf16.msra.mxu1 %v1695_v17  ;;  %1549 = vmatprep.mubr.msk.f32.mxu1 %vm1809_vm0, %v1810_v6  ;;  %v401_v22 = vld [vmem:[%s387_s29] sm:$0xff]  ;;  %v1734_v17 = vpack.c.bf16 %v666_v16, %v665_v15  ;;  %v935_v37 = vld [vmem:[%s2211_s4 + $0x50] sm:$0xff] }
  0x13   : > { %1697 = vmatprep.subr.bf16.mxu1 %v1808_v3  ;;  %1561 = vmatmul.mubr.msk.f32.vlgmr.msra.gmra.mrb[0].mxu0 %vm407_vm1, %v1930_v20  ;;  %v663_v12 = vld [vmem:[%s2213_s6] sm:$0xff] }
  0x14   : > { %1598 = vmatprep.mubr.msk.f32.mxu0 %vm1809_vm0, %v1810_v6  ;;  %1720 = vmatpush3.bf16.msra.mxu0 %v1719_v38  ;;  %v1731_v14 = vpack.c.bf16 %v664_v13, %v663_v12  ;;  %v667_v18 = vld [vmem:[%s2213_s6 + $0x20] sm:$0xff]  ;;  %v936_v38 = vld [vmem:[%s2211_s4 + $0x58] sm:$0xff] }
  0x15   : > { %1721 = vmatprep.subr.bf16.mxu0 %v1808_v3  ;;  %v1440_v32 = vld [vmem:[%s2214_s7 + $0x3] ss:$0 sm:$0xff]  ;;  %v1746_v39 = vpack.c.bf16 %v936_v38, %v935_v37  ;;  %v1445_v55 = vld [vmem:[%s2214_s7 + $0x5] ss:$0 sm:$0xff]  ;;  %v1041_v13 = vld [vmem:[%s2212_s5 + $0xf8] sm:$0xff] }
  0x16   : > { %1699 = vmatpush3.bf16.msra.mxu1 %v1698_v21  ;;  %v1737_v21 = vpack.c.bf16 %v668_v19, %v667_v18  ;;  %v1446_v15 = vld [vmem:[%s2214_s7 + $0x6] ss:$0 sm:$0xff]  ;;  %v1050_v38 = vld [vmem:[%s2213_s6 + $0x68] sm:$0xff] }
  0x17   : > { %1706 = vmatprep.subr.bf16.mxu1 %v1808_v3  ;;  %v1049_v37 = vld [vmem:[%s2213_s6 + $0x60] sm:$0xff] }
  0x18   : > { %1723 = vmatpush3.bf16.msra.mxu0 %v1722_v40  ;;  %v1442_v40 = vld [vmem:[%s2215_s8] ss:$0 sm:$0xff] }
  0x19   : > { %1550 = vmatmul.mubr.msk.f32.vlgmr.msra.gmra.mrb[2].mxu1 %vm407_vm1, %v401_v22  ;;  %1724 = vmatprep.subr.bf16.mxu0 %v1808_v3  ;;  %v669_v22 = vld [vmem:[%s2213_s6 + $0x30] sm:$0xff] }
  0x1a   : > { %1579 = vmatprep.mubr.msk.f32.mxu1 %vm1809_vm0, %v1810_v6  ;;  %1708 = vmatpush3.bf16.msra.mxu1 %v1707_v25  ;;  %v1740_v24 = vpack.c.bf16 %v670_v23, %v669_v22  ;;  %v933_v25 = vld [vmem:[%s2211_s4 + $0x40] sm:$0xff] }
  0x1b   : > { %1709 = vmatprep.subr.bf16.mxu1 %v1808_v3  ;;  %v1743_v27 = vpack.c.bf16 %v934_v26, %v933_v25 }
  0x1c   : > { %1726 = vmatpush3.bf16.msra.mxu0 %v1725_v43 }
  0x1d   : > { %1727 = vmatprep.subr.bf16.mxu0 %v1808_v3 }
  0x1e   : > { %1711 = vmatpush3.bf16.msra.mxu1 %v1710_v28 }
  0x1f   : > { %1712 = vmatprep.subr.bf16.mxu1 %v1808_v3 }
  0x20   : > { %1729 = vmatpush3.bf16.msra.mxu0 %v1728_v57  ;;  %v1031_v57 = vld [vmem:[%s2212_s5 + $0xb0] sm:$0xff] }
  0x21   : > { %1742 = vmatprep.subr.bf16.mxu0 %v1808_v3 }
  0x22   : > { %1714 = vmatpush3.bf16.msra.mxu1 %v1713_v31 }
  0x23   : > { %1715 = vmatprep.subr.bf16.mxu1 %v1808_v3 }
  0x26   : > { %1717 = vmatpush3.bf16.msra.mxu1 %v1716_v34  ;;  %v1441_v34 = vld [vmem:[%s2214_s7 + $0x4] ss:$0 sm:$0xff] }
  0x27   : > { %1730 = vmatprep.subr.bf16.mxu1 %v1808_v3 }
  0xe4   : > { %v1998_v44 = vpop.f32.mrb[0].mxu1 }
  0xe5   : > { %v1540_v45 = vpop.f32.mrb[1].mxu1 }
  0xe6   : > { %v632_v46 = vpop.f32.mrb[0].mxu0 }
  0xe7   : > { %v1562_v47 = vpop.f32.mrb[1].mxu0 }
  0xe8   : > { %v1026_v47 = vld [vmem:[%s2212_s5 + $0x88] sm:$0xff] }
  0xec   : > { %v554_v48 = vpop.f32.mrb[2].mxu1 }
  0xed   : > { %v558_v49 = vadd.f32 %v554_v48, %v1998_v44  ;;  %v1551_v50 = vpop.f32.mrb[3].mxu1  ;;  %v1027_v48 = vld [vmem:[%s2212_s5 + $0x90] sm:$0xff] }
  0xef   : > { %v636_v52 = vadd.f32 %v632_v46, %v558_v49  ;;  %v1025_v46 = vld [vmem:[%s2212_s5 + $0x80] sm:$0xff]  ;;  %v1028_v49 = vld [vmem:[%s2212_s5 + $0x98] sm:$0xff] }
  0xf0   : > { %v1752_v50 = vpack.c.bf16 %v1028_v49, %v1027_v48 }
  0xf1   : > { %v642_v53 = vadd.f32 %v1435_v51, %v636_v52  ;;  %v1029_v52 = vld [vmem:[%s2212_s5 + $0xa0] sm:$0xff] }
  0xf3   : > { %v672_v54 = vmax.f32 %v642_v53, 0.0  ;;  %v1030_v53 = vld [vmem:[%s2212_s5 + $0xa8] sm:$0xff] }
  0xf4   : > { %v1755_v56 = vpack.c.bf16 %v1030_v53, %v1029_v52 }
  0xf5   : > { %1580 = vmatmul.mubr.msk.f32.vlgmr.msra.gmra.mrb[4].mxu1 %vm677_vm2, %v672_v54 }
  0xf6   : > { %1617 = vmatprep.mubr.msk.f32.mxu1 %vm1809_vm0, %v1810_v6  ;;  %1732 = vmatpush3.bf16.msra.mxu1 %v1731_v14 }
  0xf7   : > { %1733 = vmatprep.subr.bf16.mxu1 %v1808_v3 }
  0xfa   : > { %1735 = vmatpush3.bf16.msra.mxu1 %v1734_v17 }
  0xfb   : > { %1736 = vmatprep.subr.bf16.mxu1 %v1808_v3 }
  0xfe   : > { %1738 = vmatpush3.bf16.msra.mxu1 %v1737_v21 }
  0xff   : > { %1739 = vmatprep.subr.bf16.mxu1 %v1808_v3 }
 0x102   : > { %1741 = vmatpush3.bf16.msra.mxu1 %v1740_v24 }
 0x103   : > { %1760 = vmatprep.subr.bf16.mxu1 %v1808_v3 }
 0x1c8   : > { %v747_v59 = vpop.f32.mrb[4].mxu1 }
 0x1c9   : > { %v748_v60 = vadd.f32 %v1436_v58, %v747_v59  ;;  %v1581_v61 = vpop.f32.mrb[5].mxu1  ;;  %v1032_v58 = vld [vmem:[%s2212_s5 + $0xb8] sm:$0xff] }
 0x1ca   : > { %v1758_v59 = vpack.c.bf16 %v1032_v58, %v1031_v57  ;;  %v1035_v61 = vld [vmem:[%s2212_s5 + $0xc8] sm:$0xff] }
 0x1cb   : > { %v751_v62 = vmax.f32 %v748_v60, 0.0  ;;  %v1034_v60 = vld [vmem:[%s2212_s5 + $0xc0] sm:$0xff] }
 0x1cd   : > { %1599 = vmatmul.mubr.msk.f32.vlgmr.msra.gmra.mrb[2].mxu0 %vm677_vm2, %v751_v62  ;;  %v1036_v62 = vld [vmem:[%s2212_s5 + $0xd0] sm:$0xff] }
 0x1ce   : > { %1628 = vmatprep.mubr.msk.f32.mxu0 %vm1809_vm0, %v1810_v6  ;;  %1744 = vmatpush3.bf16.msra.mxu0 %v1743_v27 }
 0x1cf   : > { %1745 = vmatprep.subr.bf16.mxu0 %v1808_v3 }
 0x1d2   : > { %1747 = vmatpush3.bf16.msra.mxu0 %v1746_v39  ;;  %v1779_v39 = vpack.c.bf16 %v1050_v38, %v1049_v37 }
 0x1d3   : > { %1748 = vmatprep.subr.bf16.mxu0 %v1808_v3 }
 0x2a0   : > { %v825_v0 = vpop.f32.mrb[2].mxu0 }
 0x2a1   : > { %v826_v1 = vadd.f32 %v1438_v63, %v825_v0  ;;  %v1600_v2 = vpop.f32.mrb[3].mxu0  ;;  %v1761_v63 = vpack.c.bf16 %v1035_v61, %v1034_v60  ;;  %v1037_v0 = vld [vmem:[%s2212_s5 + $0xd8] sm:$0xff] }
 0x2a3   : > { %v829_v4 = vmax.f32 %v826_v1, 0.0  ;;  %v1764_v1 = vpack.c.bf16 %v1037_v0, %v1036_v62 }
 0x2a5   : > { %v830_v5 = vsel %vm677_vm2, %v829_v4, 0.0 }
 0x2a6   : > { %831 = vadd.xlane.f32.xlu0 %v830_v5  ;;  %v1039_v5 = vld [vmem:[%s2212_s5 + $0xe8] sm:$0xff] }
 0x333   : > { %v832_v7 = vpop.xlane.xlu0 %831 }
 0x334   : > { %v834_v8 = vmul.f32 0.015625, %v832_v7 }
 0x336   : > { %v835_v9 = vsub.f32 %v829_v4, %v834_v8  ;;  %v1038_v4 = vld [vmem:[%s2212_s5 + $0xe0] sm:$0xff] }
 0x337   : > { %v1767_v8 = vpack.c.bf16 %v1039_v5, %v1038_v4 }
 0x338   : > { %v836_v10 = vmul.f32 %v835_v9, %v835_v9 }
 0x33a   : > { %v837_v11 = vsel %vm677_vm2, %v836_v10, 0.0 }
 0x33b   : > { %838 = vadd.xlane.f32.xlu0 %v837_v11 }
 0x3c8   : > { %v839_v28 = vpop.xlane.xlu0 %838 }
 0x3c9   : > { %v840_v29 = vmul.f32 0.015625, %v839_v28 }
 0x3cb   : > { %v841_v30 = vadd.f32 1e-05, %v840_v29 }
 0x3cd   : > { %1796 = vrsqrt.f32 %v841_v30 }
 0x3d7   : > { %v1797_v31 = vpop.eup %1796 }
 0x3d8   : > { %v843_v33 = vmul.f32 %v1797_v31, %v835_v9  ;;  %v1045_v31 = vld [vmem:[%s2213_s6 + $0x40] sm:$0xff] }
 0x3da   : > { %v848_v35 = vmul.f32 %v1440_v32, %v843_v33  ;;  %v1046_v32 = vld [vmem:[%s2213_s6 + $0x48] sm:$0xff] }
 0x3db   : > { %v1773_v33 = vpack.c.bf16 %v1046_v32, %v1045_v31 }
 0x3dc   : > { %v853_v36 = vadd.f32 %v1441_v34, %v848_v35  ;;  %v1047_v34 = vld [vmem:[%s2213_s6 + $0x50] sm:$0xff]  ;;  %v1048_v35 = vld [vmem:[%s2213_s6 + $0x58] sm:$0xff] }
 0x3de   : > { %1618 = vmatmul.mubr.msk.f32.vlgmr.msra.gmra.mrb[6].mxu1 %vm677_vm2, %v853_v36  ;;  %v1776_v36 = vpack.c.bf16 %v1048_v35, %v1047_v34 }
 0x3df   : > { %1666 = vmatprep.mubr.msk.f32.mxu1 %vm1809_vm0, %v1810_v6  ;;  %1762 = vmatpush3.bf16.msra.mxu1 %v1761_v63 }
 0x3e0   : > { %1763 = vmatprep.subr.bf16.mxu1 %v1808_v3 }
 0x3e3   : > { %1765 = vmatpush3.bf16.msra.mxu1 %v1764_v1 }
 0x3e4   : > { %1766 = vmatprep.subr.bf16.mxu1 %v1808_v3 }
 0x3e7   : > { %1768 = vmatpush3.bf16.msra.mxu1 %v1767_v8 }
 0x3e8   : > { %1769 = vmatprep.subr.bf16.mxu1 %v1808_v3 }
 0x4b1   : > { %v927_v41 = vpop.f32.mrb[6].mxu1 }
 0x4b2   : > { %v928_v42 = vadd.f32 %v1442_v40, %v927_v41  ;;  %v1619_v43 = vpop.f32.mrb[7].mxu1  ;;  %v1051_v40 = vld [vmem:[%s2213_s6 + $0x70] sm:$0xff]  ;;  %v1052_v41 = vld [vmem:[%s2213_s6 + $0x78] sm:$0xff] }
 0x4b4   : > { %v931_v45 = vadd.f32 %v928_v42, %v1930_v20  ;;  %v1749_v20 = vpack.c.bf16 %v1026_v47, %v1025_v46  ;;  %v1782_v42 = vpack.c.bf16 %v1052_v41, %v1051_v40 }
 0x4b6   : > { %932 = vst.msk [vmem:[%s395_s28] sm:$0xff] %vm407_vm1, %v931_v45  ;;  %1629 = vmatmul.mubr.msk.f32.vlgmr.msra.gmra.mrb[4].mxu0 %vm407_vm1, %v931_v45 }
 0x4b7   : > { %1647 = vmatprep.mubr.msk.f32.mxu0 %vm1809_vm0, %v1810_v6  ;;  %1750 = vmatpush3.bf16.msra.mxu0 %v1749_v20  ;;  %v1451_v20 = vld [vmem:[%s2214_s7 + $0x9] ss:$0 sm:$0xff] }
 0x4b8   : > { %1751 = vmatprep.subr.bf16.mxu0 %v1808_v3 }
 0x4bb   : > { %1753 = vmatpush3.bf16.msra.mxu0 %v1752_v50 }
 0x4bc   : > { %1754 = vmatprep.subr.bf16.mxu0 %v1808_v3 }
 0x4bf   : > { %1756 = vmatpush3.bf16.msra.mxu0 %v1755_v56 }
 0x4c0   : > { %1757 = vmatprep.subr.bf16.mxu0 %v1808_v3 }
 0x4c3   : > { %1759 = vmatpush3.bf16.msra.mxu0 %v1758_v59 }
 0x4c4   : > { %1772 = vmatprep.subr.bf16.mxu0 %v1808_v3 }
 0x589   : > { %v1006_v51 = vpop.f32.mrb[4].mxu0 }
 0x58a   : > { %1011 = vrot.lane.b32.xlu1 %v1006_v51, %s1811_s23  ;;  %v1630_v54 = vpop.f32.mrb[5].mxu0  ;;  %v1452_v51 = vld [vmem:[%s2215_s8 + $0x1] ss:$0 sm:$0xff] }
 0x58e   : > { %1021 = vrot.lane.b32.xlu1 %v1445_v55, %s1811_s23 }
 0x5fc   : > { %v1012_v2 = vpop.permute.xlu1 %1011 }
 0x5fd   : > { %v1014_v7 = vadd.f32 %v1012_v2, %v1998_v44  ;;  %v1040_v44 = vld [vmem:[%s2212_s5 + $0xf0] sm:$0xff] }
 0x5fe   : > { %v1770_v14 = vpack.c.bf16 %v1041_v13, %v1040_v44 }
 0x600   : > { %v1022_v9 = vpop.permute.xlu1 %1021  ;;  %1771 = vmatpush3.bf16.msra.mxu1 %v1770_v14 }
 0x601   : > { %v1024_v10 = vadd.f32 %v1022_v9, %v1014_v7 }
 0x603   : > { %v1054_v11 = vmax.f32 %v1024_v10, 0.0 }
 0x605   : > { %1060 = vrot.lane.b32.xlu0 %v1054_v11, %s1811_s23 }
 0x677   : > { %v1061_v12 = vpop.permute.xlu0 %1060 }
 0x678   : > { %1648 = vmatmul.mubr.msk.f32.vlgmr.msra.gmra.mrb[6].mxu0 %vm677_vm2, %v1061_v12 }
 0x679   : > { %1685 = vmatprep.mubr.msk.f32.mxu0 %vm1809_vm0, %v1810_v6  ;;  %v1448_v6 = vld [vmem:[%s2214_s7 + $0x7] ss:$0 sm:$0xff]  ;;  %1774 = vmatpush3.bf16.msra.mxu0 %v1773_v33 }
 0x67a   : > { %1775 = vmatprep.subr.bf16.mxu0 %v1808_v3 }
 0x67d   : > { %1777 = vmatpush3.bf16.msra.mxu0 %v1776_v36 }
 0x67e   : > { %1778 = vmatprep.subr.bf16.mxu0 %v1808_v3 }
 0x681   : > { %1780 = vmatpush3.bf16.msra.mxu0 %v1779_v39 }
 0x682   : > { %1781 = vmatprep.subr.bf16.mxu0 %v1808_v3  ;;  %v1450_v3 = vld [vmem:[%s2214_s7 + $0x8] ss:$0 sm:$0xff] }
 0x685   : > { %1783 = vmatpush3.bf16.msra.mxu0 %v1782_v42 }
 0x74b   : > { %v1130_v16 = vpop.f32.mrb[6].mxu0 }
 0x74c   : > { %v1131_v17 = vadd.f32 %v1446_v15, %v1130_v16  ;;  %v1649_v18 = vpop.f32.mrb[7].mxu0 }
 0x74e   : > { %v1134_v19 = vmax.f32 %v1131_v17, 0.0 }
 0x750   : > { %1667 = vmatmul.mubr.msk.f32.vlgmr.msra.gmra.mrb[8].mxu1 %vm677_vm2, %v1134_v19 }
 0x823   : > { %v1208_v21 = vpop.f32.mrb[8].mxu1 }
 0x824   : > { %v1209_v22 = vadd.f32 %v1448_v6, %v1208_v21  ;;  %v1668_v23 = vpop.f32.mrb[9].mxu1 }
 0x826   : > { %v1212_v24 = vmax.f32 %v1209_v22, 0.0 }
 0x828   : > { %v1213_v25 = vsel %vm677_vm2, %v1212_v24, 0.0 }
 0x829   : > { %1214 = vadd.xlane.f32.xlu1 %v1213_v25 }
 0x8b6   : > { %v1215_v26 = vpop.xlane.xlu1 %1214 }
 0x8b7   : > { %v1216_v27 = vmul.f32 0.015625, %v1215_v26 }
 0x8b9   : > { %v1217_v28 = vsub.f32 %v1212_v24, %v1216_v27 }
 0x8bb   : > { %v1218_v29 = vmul.f32 %v1217_v28, %v1217_v28 }
 0x8bd   : > { %v1219_v30 = vsel %vm677_vm2, %v1218_v29, 0.0 }
 0x8be   : > { %1220 = vadd.xlane.f32.xlu0 %v1219_v30 }
 0x94b   : > { %v1221_v43 = vpop.xlane.xlu0 %1220 }
 0x94c   : > { %v1222_v45 = vmul.f32 0.015625, %v1221_v43 }
 0x94e   : > { %v1223_v46 = vadd.f32 1e-05, %v1222_v45 }
 0x950   : > { %1798 = vrsqrt.f32 %v1223_v46 }
 0x95a   : > { %v1799_v47 = vpop.eup %1798 }
 0x95b   : > { %v1225_v48 = vmul.f32 %v1799_v47, %v1217_v28 }
 0x95d   : > { %v1230_v49 = vmul.f32 %v1450_v3, %v1225_v48 }
 0x95f   : > { %v1235_v50 = vadd.f32 %v1451_v20, %v1230_v49 }
 0x961   : > { %1686 = vmatmul.mubr.msk.f32.vlgmr.msra.gmra.mrb[8].mxu0 %vm677_vm2, %v1235_v50 }
 0xa34   : > { %v1309_v52 = vpop.f32.mrb[8].mxu0 }
 0xa35   : > { %v1310_v53 = vadd.f32 %v1452_v51, %v1309_v52  ;;  %v1687_v54 = vpop.f32.mrb[9].mxu0 }
 0xa37   : > { %1313 = vst.msk [vmem:[%s399_s21] sm:$0xff] %vm407_vm1, %v1310_v53 }
 0xa38 PF: > { %s21_s13 = sadd.s32 1, %s1806_s13  }
 0xa39   : > { %p18_p4 = scmp.ge.s32.totalorder %s21_s13, 5  }
 0xa3b   :  { %20 = sbr.rel (!%p18_p4) target bundleno = 1 (0x1), region = 104 }

// kernel: meta_edge_forward.12
= control target key start
LH: loop header
LB: loop body
LE: loop exit
PB: predicated region body
PF: predicated region fallthrough
CT: control target
= control target key end

     0   :  { %s1302_s27 = smov 0   ;;  %s1304_s28 = smov 0   ;;  %s1519_s0 = inlined_call_operand.vmem [shape: s32[1,24], index: 0, kind: input, shape index: {}]   ;;  %s1520_s1 = inlined_call_operand.vmem [shape: f32[24,32], index: 1, kind: input, shape index: {}]   ;;  %s1521_s2 = inlined_call_operand.vmem [shape: f32[16,32], index: 2, kind: input, shape index: {}]   ;;  %s1522_s3 = inlined_call_operand.vmem [shape: f32[64,64], index: 3, kind: input, shape index: {}]   ;;  %s1523_s4 = inlined_call_operand.vmem [shape: f32[128,64], index: 4, kind: input, shape index: {}]   ;;  %s1524_s5 = inlined_call_operand.vmem [shape: f32[64,32], index: 5, kind: input, shape index: {}]   ;;  %s1525_s6 = inlined_call_operand.vmem [shape: f32[5,64], index: 6, kind: input, shape index: {}]   ;;  %s1526_s7 = inlined_call_operand.vmem [shape: f32[1,32], index: 7, kind: input, shape index: {}]   ;;  %s1527_s8 = inlined_call_operand.vmem [shape: f32[16,32], index: 8, kind: output, shape index: {}]  }
   0x1   :  { %s1306_s29 = smov 0  }
   0x2 LB: > { %s30_s30 = sadd.s32 1, %s1248_s28  ;;  %p1001_p0 = scmp.ge.s32.totalorder %s1252_s29, 1  ;;  %s1252_s29 = sphi %s1306_s29, %s18_s29   ;;  %s1248_s28 = sphi %s1304_s28, %s1529_s28   ;;  %s1244_s27 = sphi %s1302_s27, %s1528_s27  }
   0x3   : > { %p32_p1 = scmp.ge.s32.totalorder %s30_s30, 2  ;;  %p292_p2 = scmp.lt.s32.totalorder %s1252_s29, 3 }
   0x5   : > { %s1531_s30 = smov (%p32_p1, %s30_s30), 0  ;;  %p293_p3 = pnand %p1001_p0, %p292_p2 }
   0x6   : > { %v369_v0 = vld [vmem:[%s1520_s1] sm:$0xff] (!%p293_p3)  ;;  %v370_v1 = vld [vmem:[%s1520_s1 + $0x8] sm:$0xff] (!%p293_p3)  ;;  %v356_v2 = vlaneseq (!%p293_p3)  ;;  %v1254_v3 = vmov (!%p293_p3), 0.0|0.0   ;;  %vm1255_vm0 = vmmov (!%p293_p3), 0   ;;  %v1256_v5 = vmov (!%p293_p3), 0.0   ;;  %s1004_s13 = sshll.u32 (!%p293_p3), %s1244_s27, 3 }
   0x7   : > { %296 = sbr.rel (%p293_p3) target bundleno = 1424 (0x590), region = 52  ;;  %1150 = vmatprep.subr.bf16.mxu0 (!%p293_p3), %v1254_v3  ;;  %v1151_v4 = vpack.c.bf16 (!%p293_p3), %v370_v1, %v369_v0  ;;  %1068 = vmatprep.mubr.msk.f32.mxu0 (!%p293_p3), %vm1255_vm0, %v1256_v5  ;;  %vm353_vm1 = vcmask (!%p293_p3), 261120   ;;  %v358_v7 = vstv (!%p293_p3), %s1004_s13  ;;  %v1005_v8 = vld [vmem:[%s1519_s0] ss:$0 sm:$0xff] (!%p293_p3)  ;;  %v371_v9 = vld [vmem:[%s1520_s1 + $0x10] sm:$0xff] (!%p293_p3)  ;;  %vm372_vm2 = vcmask (!%p293_p3), 195584  }
   0x8   : > { %v357_v6 = vshrl.u32 (!%p293_p3), %v356_v2, 7  ;;  %354 = vst.msk [vmem:[#allocation2] sm:$0xff] (!%p293_p3), %vm353_vm1, %v1256_v5  ;;  %1165 = vmatprep.subr.bf16.mxu1 (!%p293_p3), %v1254_v3  ;;  %1109 = vmatprep.mubr.msk.f32.mxu1 (!%p293_p3), %vm1255_vm0, %v1256_v5  ;;  %v458_v12 = vld [vmem:[%s1522_s3 + $0x20] sm:$0xff] (!%p293_p3)  ;;  %v459_v13 = vld [vmem:[%s1522_s3 + $0x28] sm:$0xff] (!%p293_p3)  ;;  %v460_v15 = vld [vmem:[%s1522_s3 + $0x30] sm:$0xff] (!%p293_p3)  ;;  %p341_p4 = scmp.lt.s32.totalorder (!%p293_p3), %s1244_s27, 1 }
   0x9   : > { %1152 = vmatpush3.bf16.msra.mxu0 (!%p293_p3), %v1151_v4  ;;  %v1154_v14 = vpack.c.bf16 (!%p293_p3), %v459_v13, %v458_v12  ;;  %v461_v16 = vld [vmem:[%s1522_s3 + $0x38] sm:$0xff] (!%p293_p3)  ;;  %v614_v18 = vld [vmem:[%s1523_s4] sm:$0xff] (!%p293_p3)  ;;  %v615_v19 = vld [vmem:[%s1523_s4 + $0x8] sm:$0xff] (!%p293_p3)  ;;  %vm648_vm4 = vcmask (!%p293_p3), 523264  }
   0xa   : > { %1066 = vmatprep.subr.mxu0 (!%p293_p3), %v1256_v5  ;;  %v359_v10 = vadd.s32 (!%p293_p3), %v358_v7, %v357_v6  ;;  %v1157_v17 = vpack.c.bf16 (!%p293_p3), %v461_v16, %v460_v15  ;;  %v1166_v20 = vpack.c.bf16 (!%p293_p3), %v615_v19, %v614_v18  ;;  %v453_v25 = vld [vmem:[%s1522_s3] sm:$0xff] (!%p293_p3)  ;;  %v454_v26 = vld [vmem:[%s1522_s3 + $0x8] sm:$0xff] (!%p293_p3)  ;;  %v455_v28 = vld [vmem:[%s1522_s3 + $0x10] sm:$0xff] (!%p293_p3) }
   0xb   : > { %v1160_v27 = vpack.c.bf16 (!%p293_p3), %v454_v26, %v453_v25  ;;  %v456_v29 = vld [vmem:[%s1522_s3 + $0x18] sm:$0xff] (!%p293_p3)  ;;  %v616_v33 = vld [vmem:[%s1523_s4 + $0x10] sm:$0xff] (!%p293_p3)  ;;  %v618_v36 = vld [vmem:[%s1523_s4 + $0x20] sm:$0xff] (!%p293_p3) }
   0xc   : > { %vm365_vm3 = vcmp.eq.s32.totalorder (!%p293_p3), %v359_v10, %v1005_v8  ;;  %1167 = vmatpush3.bf16.msra.mxu1 (!%p293_p3), %v1166_v20  ;;  %v1163_v31 = vpack.c.bf16 (!%p293_p3), %v456_v29, %v455_v28  ;;  %v617_v34 = vld [vmem:[%s1523_s4 + $0x18] sm:$0xff] (!%p293_p3)  ;;  %v619_v37 = vld [vmem:[%s1523_s4 + $0x28] sm:$0xff] (!%p293_p3)  ;;  %v620_v39 = vld [vmem:[%s1523_s4 + $0x30] sm:$0xff] (!%p293_p3) }
   0xd   : > { %1067 = vmatpush3.msra.mxu0 (!%p293_p3), %v371_v9  ;;  %v1006_v11 = vsel (!%p293_p3), %vm365_vm3, 1.0, %v1256_v5  ;;  %1168 = vmatprep.subr.bf16.mxu1 (!%p293_p3), %v1254_v3  ;;  %v1169_v35 = vpack.c.bf16 (!%p293_p3), %v617_v34, %v616_v33  ;;  %v1172_v38 = vpack.c.bf16 (!%p293_p3), %v619_v37, %v618_v36  ;;  %v621_v40 = vld [vmem:[%s1523_s4 + $0x38] sm:$0xff] (!%p293_p3)  ;;  %v623_v42 = vld [vmem:[%s1523_s4 + $0x40] sm:$0xff] (!%p293_p3)  ;;  %v624_v43 = vld [vmem:[%s1523_s4 + $0x48] sm:$0xff] (!%p293_p3) }
   0xe   : > { %1069 = vmatmul.mubr.msk.f32.vlgmr.msra.gmra.mrb[0].mxu0 %vm372_vm2, %v1006_v11  ;;  %1153 = vmatprep.subr.bf16.mxu0 %v1254_v3  ;;  %s1533_s27 = smov (!%p341_p4, %s1244_s27), 1  ;;  %v1175_v41 = vpack.c.bf16 %v621_v40, %v620_v39  ;;  %v625_v44 = vld [vmem:[%s1523_s4 + $0x50] sm:$0xff]  ;;  %v1178_v45 = vpack.c.bf16 %v624_v43, %v623_v42  ;;  %v626_v46 = vld [vmem:[%s1523_s4 + $0x58] sm:$0xff]  ;;  %v627_v48 = vld [vmem:[%s1523_s4 + $0x60] sm:$0xff] }
   0xf   : > { %1079 = vmatprep.mubr.msk.f32.mxu0 %vm1255_vm0, %v1256_v5  ;;  %1155 = vmatpush3.bf16.msra.mxu0 %v1154_v14  ;;  %v368_v21 = vld [vmem:[#allocation2] sm:$0xff]  ;;  %s1002_s20 = sshll.u32 %s1533_s27, 3  ;;  %v1181_v47 = vpack.c.bf16 %v626_v46, %v625_v44  ;;  %v628_v49 = vld [vmem:[%s1523_s4 + $0x68] sm:$0xff]  ;;  %v629_v59 = vld [vmem:[%s1523_s4 + $0x70] sm:$0xff] }
  0x10   : > { %1156 = vmatprep.subr.bf16.mxu0 %v1254_v3  ;;  %s344_s23 = scalar_lea.vmem %s1521_s2, %s1002_s20  ;;  %1170 = vmatpush3.bf16.msra.mxu1 %v1169_v35  ;;  %v1184_v50 = vpack.c.bf16 %v628_v49, %v627_v48  ;;  %v1010_v54 = vld [vmem:[%s1525_s6] ss:$0 sm:$0xff]  ;;  %v630_v60 = vld [vmem:[%s1523_s4 + $0x78] sm:$0xff]  ;;  %v1011_v62 = vld [vmem:[%s1525_s6 + $0x1] ss:$0 sm:$0xff]  ;;  %s348_s13 = scalar_lea.vmem %s1527_s8, %s1002_s20 }
  0x11   : > { %v1396_v32 = vld [vmem:[%s344_s23] sm:$0xff]  ;;  %1171 = vmatprep.subr.bf16.mxu1 %v1254_v3  ;;  %v1187_v61 = vpack.c.bf16 %v630_v60, %v629_v59  ;;  %v635_v16 = vld [vmem:[%s1524_s5 + $0x8] sm:$0xff]  ;;  %v636_v18 = vld [vmem:[%s1524_s5 + $0x10] sm:$0xff] }
  0x12   : > { %v1013_v4 = vld [vmem:[%s1525_s6 + $0x2] ss:$0 sm:$0xff]  ;;  %v637_v19 = vld [vmem:[%s1524_s5 + $0x18] sm:$0xff]  ;;  %v1016_v33 = vld [vmem:[%s1525_s6 + $0x4] ss:$0 sm:$0xff] }
  0x13   : > { %1158 = vmatpush3.bf16.msra.mxu0 %v1157_v17  ;;  %v634_v15 = vld [vmem:[%s1524_s5] sm:$0xff]  ;;  %v1193_v20 = vpack.c.bf16 %v637_v19, %v636_v18  ;;  %v641_v25 = vld [vmem:[%s1524_s5 + $0x38] sm:$0xff] }
  0x14   : > { %1159 = vmatprep.subr.bf16.mxu0 %v1254_v3  ;;  %1173 = vmatpush3.bf16.msra.mxu1 %v1172_v38  ;;  %v1190_v17 = vpack.c.bf16 %v635_v16, %v634_v15  ;;  %v1017_v36 = vld [vmem:[%s1526_s7] ss:$0 sm:$0xff] }
  0x15   : > { %1174 = vmatprep.subr.bf16.mxu1 %v1254_v3 }
  0x18   : > { %1176 = vmatpush3.bf16.msra.mxu1 %v1175_v41 }
  0x19   : > { %1189 = vmatprep.subr.bf16.mxu1 %v1254_v3 }
  0xe1   : > { %v442_v22 = vpop.f32.mrb[0].mxu0 }
  0xe2   : > { %v446_v23 = vadd.f32 %v442_v22, %v368_v21  ;;  %v1070_v24 = vpop.f32.mrb[1].mxu0  ;;  %v638_v21 = vld [vmem:[%s1524_s5 + $0x20] sm:$0xff]  ;;  %v639_v22 = vld [vmem:[%s1524_s5 + $0x28] sm:$0xff] }
  0xe3   : > { %v640_v24 = vld [vmem:[%s1524_s5 + $0x30] sm:$0xff] }
  0xe4   : > { %448 = vst.msk [vmem:[#allocation2] sm:$0xff] %vm353_vm1, %v446_v23  ;;  %v1196_v23 = vpack.c.bf16 %v639_v22, %v638_v21  ;;  %v1199_v26 = vpack.c.bf16 %v641_v25, %v640_v24 }
  0xeb   : > { %v457_v30 = vld [vmem:[#allocation2] sm:$0xff] }
  0xec   : > { %1080 = vmatmul.mubr.msk.f32.vlgmr.msra.gmra.mrb[2].mxu0 %vm353_vm1, %v457_v30 }
  0xed   : > { %1161 = vmatpush3.bf16.msra.mxu0 %v1160_v27  ;;  %1090 = vmatprep.mubr.msk.f32.mxu0 %vm1255_vm0, %v1256_v5 }
  0xee   : > { %1162 = vmatprep.subr.bf16.mxu0 %v1254_v3 }
  0xf1   : > { %1164 = vmatpush3.bf16.msra.mxu0 %v1163_v31 }
  0xf2   : > { %1177 = vmatprep.subr.bf16.mxu0 %v1254_v3 }
  0xf4   : > { %1091 = vmatmul.mubr.msk.f32.vlgmr.msra.gmra.mrb[4].mxu0 %vm353_vm1, %v1396_v32 }
  0xf5   : > { %1128 = vmatprep.mubr.msk.f32.mxu0 %vm1255_vm0, %v1256_v5  ;;  %1179 = vmatpush3.bf16.msra.mxu0 %v1178_v45 }
  0xf6   : > { %1180 = vmatprep.subr.bf16.mxu0 %v1254_v3 }
  0xf9   : > { %1182 = vmatpush3.bf16.msra.mxu0 %v1181_v47 }
  0xfa   : > { %1183 = vmatprep.subr.bf16.mxu0 %v1254_v3 }
  0xfd   : > { %1185 = vmatpush3.bf16.msra.mxu0 %v1184_v50 }
  0xfe   : > { %1186 = vmatprep.subr.bf16.mxu0 %v1254_v3 }
 0x101   : > { %1188 = vmatpush3.bf16.msra.mxu0 %v1187_v61 }
 0x1bf   : > { %v531_v51 = vpop.f32.mrb[2].mxu0 }
 0x1c0   : > { %v1081_v52 = vpop.f32.mrb[3].mxu0 }
 0x1c7   : > { %v604_v53 = vpop.f32.mrb[4].mxu0 }
 0x1c8   : > { %v605_v55 = vadd.f32 %v604_v53, %v531_v51  ;;  %v1092_v56 = vpop.f32.mrb[5].mxu0 }
 0x1ca   : > { %v613_v57 = vadd.f32 %v1010_v54, %v605_v55 }
 0x1cc   : > { %v643_v58 = vmax.f32 %v613_v57, 0.0 }
 0x1ce   : > { %1110 = vmatmul.mubr.msk.f32.vlgmr.msra.gmra.mrb[0].mxu1 %vm648_vm4, %v643_v58 }
 0x1cf   : > { %1147 = vmatprep.mubr.msk.f32.mxu1 %vm1255_vm0, %v1256_v5  ;;  %1191 = vmatpush3.bf16.msra.mxu1 %v1190_v17 }
 0x1d0   : > { %1192 = vmatprep.subr.bf16.mxu1 %v1254_v3 }
 0x1d3   : > { %1194 = vmatpush3.bf16.msra.mxu1 %v1193_v20 }
 0x1d4   : > { %1195 = vmatprep.subr.bf16.mxu1 %v1254_v3 }
 0x1d7   : > { %1197 = vmatpush3.bf16.msra.mxu1 %v1196_v23 }
 0x1d8   : > { %1198 = vmatprep.subr.bf16.mxu1 %v1254_v3  ;;  %v1015_v3 = vld [vmem:[%s1525_s6 + $0x3] ss:$0 sm:$0xff] }
 0x1db   : > { %1200 = vmatpush3.bf16.msra.mxu1 %v1199_v26 }
 0x2a1   : > { %v718_v63 = vpop.f32.mrb[0].mxu1 }
 0x2a2   : > { %v719_v0 = vadd.f32 %v1011_v62, %v718_v63  ;;  %v1111_v1 = vpop.f32.mrb[1].mxu1 }
 0x2a4   : > { %v722_v2 = vmax.f32 %v719_v0, 0.0 }
 0x2a6   : > { %1129 = vmatmul.mubr.msk.f32.vlgmr.msra.gmra.mrb[6].mxu0 %vm648_vm4, %v722_v2 }
 0x379   : > { %v796_v5 = vpop.f32.mrb[6].mxu0 }
 0x37a   : > { %v797_v6 = vadd.f32 %v1013_v4, %v796_v5  ;;  %v1130_v7 = vpop.f32.mrb[7].mxu0 }
 0x37c   : > { %v800_v8 = vmax.f32 %v797_v6, 0.0 }
 0x37e   : > { %v801_v9 = vsel %vm648_vm4, %v800_v8, 0.0 }
 0x37f   : > { %802 = vadd.xlane.f32.xlu0 %v801_v9 }
 0x40c   : > { %v803_v10 = vpop.xlane.xlu0 %802 }
 0x40d   : > { %v805_v11 = vmul.f32 0.015625, %v803_v10 }
 0x40f   : > { %v806_v12 = vsub.f32 %v800_v8, %v805_v11 }
 0x411   : > { %v807_v13 = vmul.f32 %v806_v12, %v806_v12 }
 0x413   : > { %v808_v14 = vsel %vm648_vm4, %v807_v13, 0.0 }
 0x414   : > { %809 = vadd.xlane.f32.xlu0 %v808_v14 }
 0x4a1   : > { %v810_v27 = vpop.xlane.xlu0 %809 }
 0x4a2   : > { %v811_v28 = vmul.f32 0.015625, %v810_v27 }
 0x4a4   : > { %v812_v29 = vadd.f32 1e-05, %v811_v28 }
 0x4a6   : > { %1228 = vrsqrt.f32 %v812_v29 }
 0x4b0   : > { %v1229_v30 = vpop.eup %1228 }
 0x4b1   : > { %v814_v31 = vmul.f32 %v1229_v30, %v806_v12 }
 0x4b3   : > { %v819_v34 = vmul.f32 %v1015_v3, %v814_v31 }
 0x4b5   : > { %v824_v35 = vadd.f32 %v1016_v33, %v819_v34 }
 0x4b7   : > { %1148 = vmatmul.mubr.msk.f32.vlgmr.msra.gmra.mrb[2].mxu1 %vm648_vm4, %v824_v35 }
 0x58a   : > { %v900_v37 = vpop.f32.mrb[2].mxu1 }
 0x58b   : > { %v901_v38 = vadd.f32 %v1017_v36, %v900_v37  ;;  %v1149_v39 = vpop.f32.mrb[3].mxu1 }
 0x58d   : > { %v904_v40 = vadd.f32 %v901_v38, %v1396_v32 }
 0x58f   : > { %905 = vst.msk [vmem:[%s348_s13] sm:$0xff] %vm353_vm1, %v904_v40 }
 0x590 PF: > { %s18_s29 = sadd.s32 1, %s1252_s29   ;;  %s1528_s27 = smov %s1248_s28 }
 0x591   : > { %p15_p5 = scmp.ge.s32.totalorder %s18_s29, 4   ;;  %s1529_s28 = smov %s1531_s30 }
 0x593   :  { %17 = sbr.rel (!%p15_p5) target bundleno = 2 (0x2), region = 96 }

// kernel: meta_edge_forward.15
= control target key start
LH: loop header
LB: loop body
LE: loop exit
PB: predicated region body
PF: predicated region fallthrough
CT: control target
= control target key end

     0   :  { %s2403_s0 = inlined_call_operand.vmem [shape: f32[24,32], index: 0, kind: input, shape index: {}]   ;;  %s2404_s1 = inlined_call_operand.vmem [shape: f32[24,32], index: 1, kind: input, shape index: {}]   ;;  %s2405_s2 = inlined_call_operand.vmem [shape: f32[24,32], index: 2, kind: input, shape index: {}]   ;;  %s2406_s3 = inlined_call_operand.vmem [shape: f32[32,128], index: 3, kind: input, shape index: {}]   ;;  %s2407_s4 = inlined_call_operand.vmem [shape: f32[96,64], index: 4, kind: input, shape index: {}]   ;;  %s2408_s5 = inlined_call_operand.vmem [shape: f32[256,64], index: 5, kind: input, shape index: {}]   ;;  %s2409_s6 = inlined_call_operand.vmem [shape: f32[128,32], index: 6, kind: input, shape index: {}]   ;;  %s2410_s7 = inlined_call_operand.vmem [shape: f32[10,64], index: 7, kind: input, shape index: {}]   ;;  %s2411_s8 = inlined_call_operand.vmem [shape: f32[2,32], index: 8, kind: input, shape index: {}]   ;;  %s2412_s9 = inlined_call_operand.hbm [shape: f32[24,32], index: 9, kind: output, shape index: {0}]   ;;  %s2413_s10 = inlined_call_operand.vmem [shape: f32[24,32], index: 10, kind: output, shape index: {1}]  }
   0x1   :  { %2416 = sst [smem:[#allocation5_spill]] %s2403_s0 }
   0x2   :  { %2417 = sst [smem:[#allocation6_spill]] %s2404_s1 }
   0x3   :  { %2418 = sst [smem:[#allocation7_spill]] %s2405_s2 }
   0x4   :  { %16 = vsyncpa [#allocation3], 0 }
   0x5   :  { %18 = vsyncpa [#allocation3 + $0x1], 0  ;;  %s1976_s13 = smov 0   ;;  %s1978_s14 = smov 0  }
   0x6   :  { %s1980_s15 = smov 0   ;;  %s1982_s16 = smov 0  }
   0x7 LB: > { %s1997_s17 = sadd.s32 4294967295, %s1914_s16   ;;  %s1442_s18 = sadd.s32 4294967294, %s1914_s16   ;;  %s1914_s16 = sphi %s1982_s16, %s2429_s16   ;;  %s1910_s15 = sphi %s1980_s15, %s2428_s15   ;;  %s1906_s14 = sphi %s1978_s14, %s2427_s14   ;;  %s1902_s13 = sphi %s1976_s13, %s2426_s13  }
   0x8   : > { %s2001_s19 = sadd.s32 1, %s1914_s16   ;;  %s235_s20 = sadd.s32 1, %s1910_s15 }
   0x9   : > { %s232_s21 = ssub.s32 %s1914_s16, %s2001_s19  ;;  %p245_p0 = scmp.ne.s32.totalorder %s1910_s15, %s1906_s14 }
   0xa   : > { %p233_p1 = scmp.eq.s32.totalorder %s232_s21, 0  ;;  %p246_p2 = scmp.eq.s32.totalorder %s1997_s17, 2 }
   0xb   : > { %p251_p3 = scmp.ne.s32.totalorder %s1906_s14, %s1902_s13  ;;  %p252_p4 = scmp.eq.s32.totalorder %s1442_s18, 2 }
   0xc   : > { %s2012_s22 = scalar_select %p233_p1, %s1910_s15, %s235_s20  }
   0xd   : > { %p2014_p5 = por %p246_p2, %p245_p0  ;;  %p2018_p6 = por %p252_p4, %p251_p3 }
   0xe   : > { %p1445_p7 = scmp.ge.s32.totalorder %s1914_s16, 1  ;;  %p335_p8 = scmp.lt.s32.totalorder %s1914_s16, 4 }
  0x10   : > { %p336_p9 = pnand %p1445_p7, %p335_p8 }
  0x11   : > { %v403_v0 = vld [vmem:[%s2406_s3] sm:$0xff] (!%p336_p9)  ;;  %v404_v1 = vld [vmem:[%s2406_s3 + $0x8] sm:$0xff] (!%p336_p9)  ;;  %v405_v2 = vld [vmem:[%s2406_s3 + $0x10] sm:$0xff] (!%p336_p9)  ;;  %v1916_v3 = vmov (!%p336_p9), 0.0|0.0   ;;  %vm1917_vm0 = vmmov (!%p336_p9), 0   ;;  %v1918_v6 = vmov (!%p336_p9), 0.0  }
  0x12   : > { %339 = sbr.rel (%p336_p9) target bundleno = 2629 (0xa45), region = 56  ;;  %1709 = vmatprep.subr.bf16.mxu1 (!%p336_p9), %v1916_v3  ;;  %v1710_v4 = vpack.c.bf16 (!%p336_p9), %v404_v1, %v403_v0  ;;  %v406_v5 = vld [vmem:[%s2406_s3 + $0x18] sm:$0xff] (!%p336_p9)  ;;  %1559 = vmatprep.mubr.msk.f32.mxu1 (!%p336_p9), %vm1917_vm0, %v1918_v6  ;;  %p384_p10 = scmp.lt.s32.totalorder (!%p336_p9), %s1997_s17, 2  ;;  %v559_v7 = vld [vmem:[%s2407_s4 + $0x20] sm:$0xff] (!%p336_p9)  ;;  %v560_v8 = vld [vmem:[%s2407_s4 + $0x28] sm:$0xff] (!%p336_p9)  ;;  %vm407_vm1 = vcmask (!%p336_p9), 261120  }
  0x13   : > { %1721 = vmatprep.subr.bf16.mxu0 (!%p336_p9), %v1916_v3  ;;  %1581 = vmatprep.mubr.msk.f32.mxu0 (!%p336_p9), %vm1917_vm0, %v1918_v6  ;;  %v1713_v9 = vpack.c.bf16 (!%p336_p9), %v406_v5, %v405_v2  ;;  %v1722_v10 = vpack.c.bf16 (!%p336_p9), %v560_v8, %v559_v7  ;;  %v561_v11 = vld [vmem:[%s2407_s4 + $0x30] sm:$0xff] (!%p336_p9)  ;;  %v562_v12 = vld [vmem:[%s2407_s4 + $0x38] sm:$0xff] (!%p336_p9)  ;;  %v481_v13 = vld [vmem:[%s2407_s4] sm:$0xff] (!%p336_p9)  ;;  %s2421_s0 = sld [smem:[#allocation5_spill]] (!%p336_p9)  ;;  %s2422_s2 = sld [smem:[#allocation7_spill]] (!%p336_p9)  ;;  %vm677_vm2 = vcmask (!%p336_p9), 523264  }
  0x14   : > { %1711 = vmatpush3.bf16.msra.mxu1 (!%p336_p9), %v1710_v4  ;;  %v482_v14 = vld [vmem:[%s2407_s4 + $0x8] sm:$0xff] (!%p336_p9)  ;;  %v1725_v15 = vpack.c.bf16 (!%p336_p9), %v562_v12, %v561_v11  ;;  %v483_v18 = vld [vmem:[%s2407_s4 + $0x10] sm:$0xff] (!%p336_p9)  ;;  %v484_v19 = vld [vmem:[%s2407_s4 + $0x18] sm:$0xff] (!%p336_p9)  ;;  %s2423_s1 = sld [smem:[#allocation6_spill]] (!%p336_p9)  ;;  %s2414_s20 = sand.u32 (!%p336_p9), 1, %s1906_s14  }
  0x15   : > { %1712 = vmatprep.subr.bf16.mxu1 (!%p336_p9), %v1916_v3  ;;  %1723 = vmatpush3.bf16.msra.mxu0 (!%p336_p9), %v1722_v10  ;;  %v1716_v17 = vpack.c.bf16 (!%p336_p9), %v482_v14, %v481_v13  ;;  %v1719_v21 = vpack.c.bf16 (!%p336_p9), %v484_v19, %v483_v18  ;;  %v643_v23 = vld [vmem:[%s2408_s5] sm:$0xff] (!%p336_p9)  ;;  %v644_v24 = vld [vmem:[%s2408_s5 + $0x8] sm:$0xff] (!%p336_p9)  ;;  %v645_v26 = vld [vmem:[%s2408_s5 + $0x10] sm:$0xff] (!%p336_p9)  ;;  %s1919_s18 = smov (!%p336_p9), 64   ;;  %s1474_s27 = sshll.u32 (!%p336_p9), %s1997_s17, 7 }
  0x16   : > { %1724 = vmatprep.subr.bf16.mxu0 (!%p336_p9), %v1916_v3  ;;  %v1728_v25 = vpack.c.bf16 (!%p336_p9), %v644_v24, %v643_v23  ;;  %v646_v27 = vld [vmem:[%s2408_s5 + $0x18] sm:$0xff] (!%p336_p9)  ;;  %v647_v29 = vld [vmem:[%s2408_s5 + $0x20] sm:$0xff] (!%p336_p9)  ;;  %v648_v30 = vld [vmem:[%s2408_s5 + $0x28] sm:$0xff] (!%p336_p9) }
  0x17   : > { %v1731_v28 = vpack.c.bf16 (!%p336_p9), %v646_v27, %v645_v26  ;;  %v1734_v31 = vpack.c.bf16 (!%p336_p9), %v648_v30, %v647_v29  ;;  %v649_v32 = vld [vmem:[%s2408_s5 + $0x30] sm:$0xff] (!%p336_p9)  ;;  %v650_v33 = vld [vmem:[%s2408_s5 + $0x38] sm:$0xff] (!%p336_p9)  ;;  %v652_v35 = vld [vmem:[%s2408_s5 + $0x40] sm:$0xff] (!%p336_p9) }
  0x18   : > { %1714 = vmatpush3.bf16.msra.mxu1 (!%p336_p9), %v1713_v9  ;;  %v1737_v34 = vpack.c.bf16 (!%p336_p9), %v650_v33, %v649_v32  ;;  %v653_v36 = vld [vmem:[%s2408_s5 + $0x48] sm:$0xff] (!%p336_p9)  ;;  %v654_v37 = vld [vmem:[%s2408_s5 + $0x50] sm:$0xff] (!%p336_p9)  ;;  %v655_v39 = vld [vmem:[%s2408_s5 + $0x58] sm:$0xff] (!%p336_p9) }
  0x19   : > { %s385_s26 = scalar_select %p384_p10, %s1997_s17, 2  ;;  %1715 = vmatprep.subr.bf16.mxu1 %v1916_v3  ;;  %1726 = vmatpush3.bf16.msra.mxu0 %v1725_v15  ;;  %v1740_v38 = vpack.c.bf16 %v653_v36, %v652_v35  ;;  %v1743_v40 = vpack.c.bf16 %v655_v39, %v654_v37  ;;  %v656_v41 = vld [vmem:[%s2408_s5 + $0x60] sm:$0xff]  ;;  %v657_v42 = vld [vmem:[%s2408_s5 + $0x68] sm:$0xff]  ;;  %v658_v55 = vld [vmem:[%s2408_s5 + $0x70] sm:$0xff] }
  0x1a   : > { %1739 = vmatprep.subr.bf16.mxu0 %v1916_v3  ;;  %v1746_v43 = vpack.c.bf16 %v657_v42, %v656_v41  ;;  %v1454_v51 = vld [vmem:[%s2410_s7] ss:$0 sm:$0xff]  ;;  %v659_v56 = vld [vmem:[%s2408_s5 + $0x78] sm:$0xff]  ;;  %v1455_v58 = vld [vmem:[%s2410_s7 + $0x1] ss:$0 sm:$0xff] }
  0x1b   : > { %s2063_s21 = sshll.u32 %s385_s26, 3  ;;  %v1749_v57 = vpack.c.bf16 %v659_v56, %v658_v55  ;;  %v1457_v63 = vld [vmem:[%s2410_s7 + $0x2] ss:$0 sm:$0xff]  ;;  %v664_v13 = vld [vmem:[%s2409_s6 + $0x8] sm:$0xff]  ;;  %v665_v15 = vld [vmem:[%s2409_s6 + $0x10] sm:$0xff] }
  0x1c   : > { %s387_s28 = scalar_lea.vmem %s2421_s0, %s2063_s21  ;;  %s395_s26 = scalar_lea.vmem %s2422_s2, %s2063_s21  ;;  %v663_v12 = vld [vmem:[%s2409_s6] sm:$0xff]  ;;  %v668_v19 = vld [vmem:[%s2409_s6 + $0x28] sm:$0xff]  ;;  %v670_v23 = vld [vmem:[%s2409_s6 + $0x38] sm:$0xff] }
  0x1d   : > { %v400_v16 = vld [vmem:[%s387_s28] sm:$0xff]  ;;  %s391_s28 = scalar_lea.vmem %s2423_s1, %s2063_s21  ;;  %v1752_v14 = vpack.c.bf16 %v664_v13, %v663_v12  ;;  %v934_v26 = vld [vmem:[%s2407_s4 + $0x48] sm:$0xff]  ;;  %v935_v37 = vld [vmem:[%s2407_s4 + $0x50] sm:$0xff]  ;;  %s2357_s0 = scalar_lea.hbm %s2412_s9, %s1474_s27 }
  0x1e   : > { %v2081_v20 = vld [vmem:[%s395_s26] sm:$0xff]  ;;  %1560 = vmatmul.mubr.msk.f32.vlgmr.msra.gmra.mrb[0].mxu1 %vm407_vm1, %v400_v16  ;;  %v666_v16 = vld [vmem:[%s2409_s6 + $0x18] sm:$0xff] }
  0x1f   : > { %1717 = vmatpush3.bf16.msra.mxu1 %v1716_v17  ;;  %1570 = vmatprep.mubr.msk.f32.mxu1 %vm1917_vm0, %v1918_v6  ;;  %v401_v22 = vld [vmem:[%s391_s28] sm:$0xff]  ;;  %v1755_v17 = vpack.c.bf16 %v666_v16, %v665_v15  ;;  %s2233_s28 = sshll.u32 %s2414_s20, 3  ;;  %v1041_v13 = vld [vmem:[%s2408_s5 + $0xf8] sm:$0xff] }
  0x20   : > { %1718 = vmatprep.subr.bf16.mxu1 %v1916_v3  ;;  %1582 = vmatmul.mubr.msk.f32.vlgmr.msra.gmra.mrb[0].mxu0 %vm407_vm1, %v2081_v20  ;;  %v667_v18 = vld [vmem:[%s2409_s6 + $0x20] sm:$0xff]  ;;  %s2415_s29 = scalar_lea.vmem [#allocation2], %s2233_s28  ;;  %s2424_s30 = scalar_lea.vmem [#allocation2], %s2233_s28 }
  0x21   : > { %1619 = vmatprep.mubr.msk.f32.mxu0 %vm1917_vm0, %v1918_v6  ;;  %1741 = vmatpush3.bf16.msra.mxu0 %v1740_v38  ;;  %v1459_v32 = vld [vmem:[%s2410_s7 + $0x3] ss:$0 sm:$0xff]  ;;  %v936_v38 = vld [vmem:[%s2407_s4 + $0x58] sm:$0xff]  ;;  %v1464_v55 = vld [vmem:[%s2410_s7 + $0x5] ss:$0 sm:$0xff]  ;;  %s1332_s26 = sshll.u32 %s2424_s30, 4  ;;  %s1333_s26 = int_to_ptr.vmem [resolvable:$true] %s1332_s26 }
  0x22   : > { %1742 = vmatprep.subr.bf16.mxu0 %v1916_v3  ;;  %v1767_v39 = vpack.c.bf16 %v936_v38, %v935_v37  ;;  %v1465_v15 = vld [vmem:[%s2410_s7 + $0x6] ss:$0 sm:$0xff]  ;;  %v1050_v38 = vld [vmem:[%s2409_s6 + $0x68] sm:$0xff]  ;;  %s1852_s1 = scalar_lea.vmem %s1333_s26, 128 }
  0x23   : > { %1720 = vmatpush3.bf16.msra.mxu1 %v1719_v21  ;;  %v1758_v21 = vpack.c.bf16 %v668_v19, %v667_v18  ;;  %v1049_v37 = vld [vmem:[%s2409_s6 + $0x60] sm:$0xff]  ;;  %p1853_p11 = scmp.ne.s32.totalorder %s1333_s26, %s1852_s1 }
  0x24   : > { %1727 = vmatprep.subr.bf16.mxu1 %v1916_v3 }
  0x25   : > { %1744 = vmatpush3.bf16.msra.mxu0 %v1743_v40  ;;  %v1461_v40 = vld [vmem:[%s2411_s8] ss:$0 sm:$0xff]  ;;  %p1854_p12 = pnand %p1853_p11, %p2014_p5 }
  0x26   : > { %1571 = vmatmul.mubr.msk.f32.vlgmr.msra.gmra.mrb[2].mxu1 %vm407_vm1, %v401_v22  ;;  %1745 = vmatprep.subr.bf16.mxu0 %v1916_v3  ;;  %v669_v22 = vld [vmem:[%s2409_s6 + $0x30] sm:$0xff] }
  0x27   : > { %1600 = vmatprep.mubr.msk.f32.mxu1 %vm1917_vm0, %v1918_v6  ;;  %1729 = vmatpush3.bf16.msra.mxu1 %v1728_v25  ;;  %v1761_v24 = vpack.c.bf16 %v670_v23, %v669_v22  ;;  %v933_v25 = vld [vmem:[%s2407_s4 + $0x40] sm:$0xff]  ;;  %p1855_p13 = pneg %p1854_p12 }
  0x28   : > { %1730 = vmatprep.subr.bf16.mxu1 %v1916_v3  ;;  %v1764_v27 = vpack.c.bf16 %v934_v26, %v933_v25 }
  0x29   : > { %1747 = vmatpush3.bf16.msra.mxu0 %v1746_v43 }
  0x2a   : > { %1748 = vmatprep.subr.bf16.mxu0 %v1916_v3 }
  0x2b   : > { %1732 = vmatpush3.bf16.msra.mxu1 %v1731_v28 }
  0x2c   : > { %1733 = vmatprep.subr.bf16.mxu1 %v1916_v3 }
  0x2d   : > { %1750 = vmatpush3.bf16.msra.mxu0 %v1749_v57  ;;  %v1031_v57 = vld [vmem:[%s2408_s5 + $0xb0] sm:$0xff] }
  0x2e   : > { %1763 = vmatprep.subr.bf16.mxu0 %v1916_v3 }
  0x2f   : > { %1735 = vmatpush3.bf16.msra.mxu1 %v1734_v31 }
  0x30   : > { %1736 = vmatprep.subr.bf16.mxu1 %v1916_v3 }
  0x33   : > { %1738 = vmatpush3.bf16.msra.mxu1 %v1737_v34  ;;  %v1460_v34 = vld [vmem:[%s2410_s7 + $0x4] ss:$0 sm:$0xff] }
  0x34   : > { %1751 = vmatprep.subr.bf16.mxu1 %v1916_v3 }
  0xf1   : > { %v2149_v44 = vpop.f32.mrb[0].mxu1 }
  0xf2   : > { %v1561_v45 = vpop.f32.mrb[1].mxu1 }
  0xf3   : > { %v632_v46 = vpop.f32.mrb[0].mxu0 }
  0xf4   : > { %v1583_v47 = vpop.f32.mrb[1].mxu0 }
  0xf5   : > { %v1026_v47 = vld [vmem:[%s2408_s5 + $0x88] sm:$0xff] }
  0xf9   : > { %v554_v48 = vpop.f32.mrb[2].mxu1 }
  0xfa   : > { %v558_v49 = vadd.f32 %v554_v48, %v2149_v44  ;;  %v1572_v50 = vpop.f32.mrb[3].mxu1 }
  0xfc   : > { %v636_v52 = vadd.f32 %v632_v46, %v558_v49  ;;  %v1025_v46 = vld [vmem:[%s2408_s5 + $0x80] sm:$0xff]  ;;  %v1028_v49 = vld [vmem:[%s2408_s5 + $0x98] sm:$0xff] }
  0xfd   : > { %v1770_v48 = vpack.c.bf16 %v1026_v47, %v1025_v46 }
  0xfe   : > { %v642_v53 = vadd.f32 %v1454_v51, %v636_v52  ;;  %v1029_v52 = vld [vmem:[%s2408_s5 + $0xa0] sm:$0xff] }
 0x100   : > { %v672_v54 = vmax.f32 %v642_v53, 0.0  ;;  %v1030_v53 = vld [vmem:[%s2408_s5 + $0xa8] sm:$0xff] }
 0x101   : > { %v1776_v56 = vpack.c.bf16 %v1030_v53, %v1029_v52 }
 0x102   : > { %1601 = vmatmul.mubr.msk.f32.vlgmr.msra.gmra.mrb[4].mxu1 %vm677_vm2, %v672_v54 }
 0x103   : > { %1638 = vmatprep.mubr.msk.f32.mxu1 %vm1917_vm0, %v1918_v6  ;;  %1753 = vmatpush3.bf16.msra.mxu1 %v1752_v14 }
 0x104   : > { %1754 = vmatprep.subr.bf16.mxu1 %v1916_v3 }
 0x107   : > { %1756 = vmatpush3.bf16.msra.mxu1 %v1755_v17 }
 0x108   : > { %1757 = vmatprep.subr.bf16.mxu1 %v1916_v3 }
 0x10b   : > { %1759 = vmatpush3.bf16.msra.mxu1 %v1758_v21 }
 0x10c   : > { %1760 = vmatprep.subr.bf16.mxu1 %v1916_v3 }
 0x10f   : > { %1762 = vmatpush3.bf16.msra.mxu1 %v1761_v24 }
 0x110   : > { %1781 = vmatprep.subr.bf16.mxu1 %v1916_v3 }
 0x1d5   : > { %v747_v59 = vpop.f32.mrb[4].mxu1 }
 0x1d6   : > { %v748_v60 = vadd.f32 %v1455_v58, %v747_v59  ;;  %v1602_v61 = vpop.f32.mrb[5].mxu1  ;;  %v1032_v58 = vld [vmem:[%s2408_s5 + $0xb8] sm:$0xff] }
 0x1d7   : > { %v1779_v59 = vpack.c.bf16 %v1032_v58, %v1031_v57  ;;  %v1035_v61 = vld [vmem:[%s2408_s5 + $0xc8] sm:$0xff] }
 0x1d8   : > { %v751_v62 = vmax.f32 %v748_v60, 0.0  ;;  %v1034_v60 = vld [vmem:[%s2408_s5 + $0xc0] sm:$0xff] }
 0x1da   : > { %1620 = vmatmul.mubr.msk.f32.vlgmr.msra.gmra.mrb[2].mxu0 %vm677_vm2, %v751_v62  ;;  %v1036_v62 = vld [vmem:[%s2408_s5 + $0xd0] sm:$0xff] }
 0x1db   : > { %1649 = vmatprep.mubr.msk.f32.mxu0 %vm1917_vm0, %v1918_v6  ;;  %1765 = vmatpush3.bf16.msra.mxu0 %v1764_v27 }
 0x1dc   : > { %1766 = vmatprep.subr.bf16.mxu0 %v1916_v3 }
 0x1df   : > { %1768 = vmatpush3.bf16.msra.mxu0 %v1767_v39  ;;  %v1800_v39 = vpack.c.bf16 %v1050_v38, %v1049_v37 }
 0x1e0   : > { %1769 = vmatprep.subr.bf16.mxu0 %v1916_v3 }
 0x2ad   : > { %v825_v0 = vpop.f32.mrb[2].mxu0 }
 0x2ae   : > { %v826_v1 = vadd.f32 %v1457_v63, %v825_v0  ;;  %v1621_v2 = vpop.f32.mrb[3].mxu0  ;;  %v1782_v63 = vpack.c.bf16 %v1035_v61, %v1034_v60  ;;  %v1037_v0 = vld [vmem:[%s2408_s5 + $0xd8] sm:$0xff] }
 0x2b0   : > { %v829_v4 = vmax.f32 %v826_v1, 0.0  ;;  %v1785_v1 = vpack.c.bf16 %v1037_v0, %v1036_v62 }
 0x2b2   : > { %v830_v5 = vsel %vm677_vm2, %v829_v4, 0.0 }
 0x2b3   : > { %831 = vadd.xlane.f32.xlu0 %v830_v5  ;;  %v1039_v5 = vld [vmem:[%s2408_s5 + $0xe8] sm:$0xff] }
 0x340   : > { %v832_v7 = vpop.xlane.xlu0 %831 }
 0x341   : > { %v834_v8 = vmul.f32 0.015625, %v832_v7 }
 0x343   : > { %v835_v9 = vsub.f32 %v829_v4, %v834_v8  ;;  %v1038_v4 = vld [vmem:[%s2408_s5 + $0xe0] sm:$0xff] }
 0x344   : > { %v1788_v8 = vpack.c.bf16 %v1039_v5, %v1038_v4 }
 0x345   : > { %v836_v10 = vmul.f32 %v835_v9, %v835_v9 }
 0x347   : > { %v837_v11 = vsel %vm677_vm2, %v836_v10, 0.0 }
 0x348   : > { %838 = vadd.xlane.f32.xlu0 %v837_v11 }
 0x3d5   : > { %v839_v28 = vpop.xlane.xlu0 %838 }
 0x3d6   : > { %v840_v29 = vmul.f32 0.015625, %v839_v28 }
 0x3d8   : > { %v841_v30 = vadd.f32 1e-05, %v840_v29 }
 0x3da   : > { %1848 = vrsqrt.f32 %v841_v30 }
 0x3e4   : > { %v1849_v31 = vpop.eup %1848 }
 0x3e5   : > { %v843_v33 = vmul.f32 %v1849_v31, %v835_v9  ;;  %v1045_v31 = vld [vmem:[%s2409_s6 + $0x40] sm:$0xff] }
 0x3e7   : > { %v848_v35 = vmul.f32 %v1459_v32, %v843_v33  ;;  %v1046_v32 = vld [vmem:[%s2409_s6 + $0x48] sm:$0xff] }
 0x3e8   : > { %v1794_v33 = vpack.c.bf16 %v1046_v32, %v1045_v31 }
 0x3e9   : > { %v853_v36 = vadd.f32 %v1460_v34, %v848_v35  ;;  %v1047_v34 = vld [vmem:[%s2409_s6 + $0x50] sm:$0xff]  ;;  %v1048_v35 = vld [vmem:[%s2409_s6 + $0x58] sm:$0xff] }
 0x3eb   : > { %1639 = vmatmul.mubr.msk.f32.vlgmr.msra.gmra.mrb[6].mxu1 %vm677_vm2, %v853_v36  ;;  %v1797_v36 = vpack.c.bf16 %v1048_v35, %v1047_v34 }
 0x3ec   : > { %1687 = vmatprep.mubr.msk.f32.mxu1 %vm1917_vm0, %v1918_v6  ;;  %1783 = vmatpush3.bf16.msra.mxu1 %v1782_v63 }
 0x3ed   : > { %1784 = vmatprep.subr.bf16.mxu1 %v1916_v3 }
 0x3f0   : > { %1786 = vmatpush3.bf16.msra.mxu1 %v1785_v1 }
 0x3f1   : > { %1787 = vmatprep.subr.bf16.mxu1 %v1916_v3 }
 0x3f4   : > { %1789 = vmatpush3.bf16.msra.mxu1 %v1788_v8 }
 0x3f5   : > { %1790 = vmatprep.subr.bf16.mxu1 %v1916_v3 }
 0x4be   : > { %v927_v41 = vpop.f32.mrb[6].mxu1 }
 0x4bf   : > { %v928_v42 = vadd.f32 %v1461_v40, %v927_v41  ;;  %v1640_v43 = vpop.f32.mrb[7].mxu1  ;;  %v1051_v40 = vld [vmem:[%s2409_s6 + $0x70] sm:$0xff]  ;;  %v1052_v41 = vld [vmem:[%s2409_s6 + $0x78] sm:$0xff] }
 0x4c1   : > { %v931_v45 = vadd.f32 %v928_v42, %v2081_v20  ;;  %v1027_v20 = vld [vmem:[%s2408_s5 + $0x90] sm:$0xff]  ;;  %v1803_v42 = vpack.c.bf16 %v1052_v41, %v1051_v40 }
 0x4c2   : > { %v1773_v50 = vpack.c.bf16 %v1028_v49, %v1027_v20 }
 0x4c3   : > { %1650 = vmatmul.mubr.msk.f32.vlgmr.msra.gmra.mrb[4].mxu0 %vm407_vm1, %v931_v45  ;;  %932 = vst.msk [vmem:[%s2415_s29] sm:$0xff] %vm407_vm1, %v931_v45  ;;  %s1920_s29 = smov [#allocation2]  }
 0x4c4   : > { %1668 = vmatprep.mubr.msk.f32.mxu0 %vm1917_vm0, %v1918_v6  ;;  %1771 = vmatpush3.bf16.msra.mxu0 %v1770_v48  ;;  %v1470_v48 = vld [vmem:[%s2410_s7 + $0x9] ss:$0 sm:$0xff]  ;;  %s1856_s20 = sshll.u32 %s1920_s29, 4  ;;  %s1857_s20 = int_to_ptr.vmem [resolvable:$false] %s1856_s20 }
 0x4c5   : > { %1772 = vmatprep.subr.bf16.mxu0 %v1916_v3  ;;  %s1858_s2 = scalar_lea.vmem %s1857_s20, 256  ;;  %p1859_p0 = scmp.lt.s32.totalorder %s1333_s26, %s1857_s20 }
 0x4c6   : > { %p1860_p1 = scmp.lt.s32.totalorder %s1858_s2, %s1852_s1 }
 0x4c8   : > { %1774 = vmatpush3.bf16.msra.mxu0 %v1773_v50  ;;  %p1861_p2 = por %p1860_p1, %p1859_p0 }
 0x4c9   : > { %1775 = vmatprep.subr.bf16.mxu0 %v1916_v3 }
 0x4ca   : > { %p1862_p3 = pnand %p1861_p2, %p1855_p13 }
 0x4cc   : > { %1777 = vmatpush3.bf16.msra.mxu0 %v1776_v56 }
 0x4cd   : > { %1778 = vmatprep.subr.bf16.mxu0 %v1916_v3 }
 0x4d0   : > { %1780 = vmatpush3.bf16.msra.mxu0 %v1779_v59 }
 0x4d1   : > { %1793 = vmatprep.subr.bf16.mxu0 %v1916_v3 }
 0x596   : > { %v1006_v51 = vpop.f32.mrb[4].mxu0 }
 0x597   : > { %1011 = vrot.lane.b32.xlu1 %v1006_v51, %s1919_s18  ;;  %v1651_v54 = vpop.f32.mrb[5].mxu0 }
 0x59b   : > { %1021 = vrot.lane.b32.xlu1 %v1464_v55, %s1919_s18 }
 0x609   : > { %v1012_v2 = vpop.permute.xlu1 %1011 }
 0x60a   : > { %v1014_v7 = vadd.f32 %v1012_v2, %v2149_v44  ;;  %v1040_v44 = vld [vmem:[%s2408_s5 + $0xf0] sm:$0xff] }
 0x60b   : > { %v1791_v14 = vpack.c.bf16 %v1041_v13, %v1040_v44 }
 0x60d   : > { %v1022_v9 = vpop.permute.xlu1 %1021  ;;  %1792 = vmatpush3.bf16.msra.mxu1 %v1791_v14 }
 0x60e   : > { %v1024_v10 = vadd.f32 %v1022_v9, %v1014_v7 }
 0x610   : > { %v1054_v11 = vmax.f32 %v1024_v10, 0.0 }
 0x612   : > { %1060 = vrot.lane.b32.xlu0 %v1054_v11, %s1919_s18  ;;  %s2425_s18 = sand.u32 1, %s1906_s14  }
 0x613   : > { %s1315_s25 = scalar_lea.sflag [#allocation3], %s2425_s18 }
 0x684   : > { %v1061_v12 = vpop.permute.xlu0 %1060 }
 0x685   : > { %1669 = vmatmul.mubr.msk.f32.vlgmr.msra.gmra.mrb[6].mxu0 %vm677_vm2, %v1061_v12 }
 0x686   : > { %1706 = vmatprep.mubr.msk.f32.mxu0 %vm1917_vm0, %v1918_v6  ;;  %v1467_v6 = vld [vmem:[%s2410_s7 + $0x7] ss:$0 sm:$0xff]  ;;  %1795 = vmatpush3.bf16.msra.mxu0 %v1794_v33 }
 0x687   : > { %1796 = vmatprep.subr.bf16.mxu0 %v1916_v3 }
 0x68a   : > { %1798 = vmatpush3.bf16.msra.mxu0 %v1797_v36 }
 0x68b   : > { %1799 = vmatprep.subr.bf16.mxu0 %v1916_v3 }
 0x68e   : > { %1801 = vmatpush3.bf16.msra.mxu0 %v1800_v39 }
 0x68f   : > { %1802 = vmatprep.subr.bf16.mxu0 %v1916_v3  ;;  %v1469_v3 = vld [vmem:[%s2410_s7 + $0x8] ss:$0 sm:$0xff] }
 0x692   : > { %1804 = vmatpush3.bf16.msra.mxu0 %v1803_v42 }
 0x758   : > { %v1130_v16 = vpop.f32.mrb[6].mxu0 }
 0x759   : > { %v1131_v17 = vadd.f32 %v1465_v15, %v1130_v16  ;;  %v1670_v18 = vpop.f32.mrb[7].mxu0 }
 0x75b   : > { %v1134_v19 = vmax.f32 %v1131_v17, 0.0 }
 0x75d   : > { %1688 = vmatmul.mubr.msk.f32.vlgmr.msra.gmra.mrb[8].mxu1 %vm677_vm2, %v1134_v19 }
 0x830   : > { %v1208_v21 = vpop.f32.mrb[8].mxu1 }
 0x831   : > { %v1209_v22 = vadd.f32 %v1467_v6, %v1208_v21  ;;  %v1689_v23 = vpop.f32.mrb[9].mxu1 }
 0x833   : > { %v1212_v24 = vmax.f32 %v1209_v22, 0.0 }
 0x835   : > { %v1213_v25 = vsel %vm677_vm2, %v1212_v24, 0.0 }
 0x836   : > { %1214 = vadd.xlane.f32.xlu1 %v1213_v25 }
 0x8c3   : > { %v1215_v26 = vpop.xlane.xlu1 %1214 }
 0x8c4   : > { %v1216_v27 = vmul.f32 0.015625, %v1215_v26 }
 0x8c6   : > { %v1217_v28 = vsub.f32 %v1212_v24, %v1216_v27 }
 0x8c8   : > { %v1218_v29 = vmul.f32 %v1217_v28, %v1217_v28 }
 0x8ca   : > { %v1219_v30 = vsel %vm677_vm2, %v1218_v29, 0.0 }
 0x8cb   : > { %1220 = vadd.xlane.f32.xlu0 %v1219_v30 }
 0x958   : > { %v1221_v43 = vpop.xlane.xlu0 %1220 }
 0x959   : > { %v1222_v45 = vmul.f32 0.015625, %v1221_v43 }
 0x95b   : > { %v1223_v46 = vadd.f32 1e-05, %v1222_v45 }
 0x95d   : > { %1850 = vrsqrt.f32 %v1223_v46 }
 0x967   : > { %v1851_v47 = vpop.eup %1850 }
 0x968   : > { %v1225_v20 = vmul.f32 %v1851_v47, %v1217_v28 }
 0x96a   : > { %v1230_v49 = vmul.f32 %v1469_v3, %v1225_v20 }
 0x96c   : > { %v1235_v50 = vadd.f32 %v1470_v48, %v1230_v49 }
 0x96e   : > { %1707 = vmatmul.mubr.msk.f32.vlgmr.msra.gmra.mrb[8].mxu0 %vm677_vm2, %v1235_v50 }
 0x96f   : > { %1865 = shalt.err (!%p1862_p3)
}
 0x970   : > { %s1866_s17 = scalar_lea.hbm %s2357_s0, 128  ;;  %s1870_s30 = scalar_lea.hbm %s2412_s9, 384 }
 0x971   : > { %p1867_p4 = scmp.ne.s32.totalorder %s2357_s0, %s1866_s17  ;;  %p1871_p9 = scmp.lt.u32.totalorder %s2357_s0, %s2412_s9 }
 0x972   : > { %p1872_p10 = scmp.lt.u32.totalorder %s1870_s30, %s1866_s17  ;;  %p1874_p12 = scmp.lt.u32.totalorder %s1866_s17, %s2357_s0 }
 0x973   : > { %p1868_p7 = pnand %p1867_p4, %p2014_p5 }
 0x974   : > { %p1873_p11 = por %p1872_p10, %p1871_p9 }
 0x975   : > { %p1869_p8 = pneg %p1868_p7 }
 0x976   : > { %p1875_p13 = por %p1874_p12, %p1873_p11 }
 0x978   : > { %p1876_p0 = pnand %p1875_p13, %p1869_p8 }
 0x97a   : > { %1879 = shalt.err (!%p1876_p0)
}
 0x97b   : > { %1805 = dma.vmem_to_hbm [thread:$0]  (%p2014_p5), %s1333_s26, 128, %s2357_s0, %s1315_s25   ;;  %v1471_v51 = vld [vmem:[%s2411_s8 + $0x1] ss:$0 sm:$0xff] }
 0x97c   : > { %s399_s20 = scalar_lea.vmem %s2413_s10, %s2063_s21 }
 0xa41   : > { %v1309_v52 = vpop.f32.mrb[8].mxu0 }
 0xa42   : > { %v1310_v53 = vadd.f32 %v1471_v51, %v1309_v52  ;;  %v1708_v54 = vpop.f32.mrb[9].mxu0 }
 0xa44   : > { %1313 = vst.msk [vmem:[%s399_s20] sm:$0xff] %vm407_vm1, %v1310_v53 }
 0xa45 PF: > { %p1811_p1 = scmp.ge.s32.totalorder %s1914_s16, 2  ;;  %s1347_s23 = sand.u32 1, %s1902_s13  }
 0xa46   : > { %s1348_s0 = scalar_lea.sflag [#allocation3], %s1347_s23 }
 0xa47   : > { %p1808_p5 = pnand %p1811_p1, %p2018_p6 }
 0xa49   : > { %1897 = dma.done.wait (!%p1808_p5), %s1348_s0, 128  }
 0xa4a   : > { %1899 = vsyncadd (!%p1808_p5), %s1348_s0, 4294967168  ;;  %p21_p2 = scmp.ge.s32.totalorder %s2001_s19, 5   ;;  %s2426_s13 = smov %s1906_s14 }
 0xa4b   : > { %s2427_s14 = smov %s1910_s15  ;;  %s2428_s15 = smov %s2012_s22 }
 0xa4c   : > { %s2429_s16 = smov %s2001_s19  ;;  %23 = sbr.rel (!%p21_p2) target bundleno = 7 (0x7), region = 109 }
 0xa53   :  { %1360 = vsyncpa [#allocation3], 1 }
 0xa54   :  { %1362 = vsyncpa [#allocation3 + $0x1], 1 }

// kernel: meta_edge_forward.17
= control target key start
LH: loop header
LB: loop body
LE: loop exit
PB: predicated region body
PF: predicated region fallthrough
CT: control target
= control target key end

     0   :  { %vm31_vm0 = vcmask 261120   ;;  %v427_v2 = vmov 0.0|0.0   ;;  %v428_v4 = vmov 0.0   ;;  %vm429_vm1 = vmmov 0   ;;  %s544_s0 = inlined_call_operand.vmem [shape: s32[1,16], index: 0, kind: input, shape index: {}]   ;;  %s545_s1 = inlined_call_operand.vmem [shape: f32[16,32], index: 1, kind: input, shape index: {}]   ;;  %s546_s2 = inlined_call_operand.vmem [shape: f32[32,64], index: 2, kind: input, shape index: {}]   ;;  %s547_s3 = inlined_call_operand.vmem [shape: f32[1,64], index: 3, kind: input, shape index: {}]   ;;  %s548_s4 = inlined_call_operand.vmem [shape: f32[4,32], index: 4, kind: input, shape index: {}]   ;;  %s549_s5 = inlined_call_operand.vmem [shape: f32[2,32], index: 5, kind: input, shape index: {}]   ;;  %s550_s6 = inlined_call_operand.vmem [shape: f32[1,2], index: 6, kind: input, shape index: {}]   ;;  %s551_s7 = inlined_call_operand.hbm [shape: f32[2,2], index: 7, kind: output, shape index: {}]  }
   0x1   :  { %v44_v0 = vld [vmem:[%s545_s1] sm:$0xff]  ;;  %v45_v1 = vld [vmem:[%s545_s1 + $0x8] sm:$0xff]  ;;  %382 = vmatprep.subr.bf16.mxu0 %v427_v2  ;;  %32 = vst.msk [vmem:[#allocation2] sm:$0xff] %vm31_vm0, %v428_v4  ;;  %368 = vmatprep.mubr.msk.f32.mxu0 %vm429_vm1, %v428_v4  ;;  %v33_v5 = vlaneseq }
   0x2   :  { %v383_v3 = vpack.c.bf16 %v45_v1, %v44_v0 }
   0x3   :  { %12 = vsyncpa [#allocation4], 0  ;;  %v344_v6 = vld [vmem:[%s544_s0] ss:$0 sm:$0xff]  ;;  %385 = vmatprep.subr.bf16.mxu1 %v427_v2  ;;  %379 = vmatprep.mubr.msk.f32.mxu1 %vm429_vm1, %v428_v4  ;;  %v34_v7 = vshrl.u32 %v33_v5, 7  ;;  %vm46_vm2 = vcmask 130048  }
   0x4   :  { %384 = vmatpush3.bf16.msra.mxu0 %v383_v3  ;;  %v141_v20 = vld [vmem:[%s546_s2] sm:$0xff]  ;;  %v142_v21 = vld [vmem:[%s546_s2 + $0x8] sm:$0xff]  ;;  %v143_v22 = vld [vmem:[%s546_s2 + $0x10] sm:$0xff]  ;;  %s431_s17 = smov 32   ;;  %vm326_vm4 = vcmask 7168   ;;  %vm328_vm5 = vcmask 9216  }
   0x5   :  { %vm40_vm3 = vcmp.eq.s32.totalorder %v34_v7, %v344_v6  ;;  %v386_v23 = vpack.c.bf16 %v142_v21, %v141_v20  ;;  %v144_v24 = vld [vmem:[%s546_s2 + $0x18] sm:$0xff]  ;;  %v347_v31 = vld [vmem:[%s547_s3] ss:$0 sm:$0xff]  ;;  %s430_s2 = smov 96   ;;  %v353_v37 = vld [vmem:[%s548_s4 + $0x1] ss:$0 sm:$0xff] }
   0x6   :  { %v345_v8 = vsel %vm40_vm3, 1.0, %v428_v4  ;;  %v389_v25 = vpack.c.bf16 %v144_v24, %v143_v22  ;;  %v354_v43 = vld [vmem:[%s548_s4 + $0x3] ss:$0 sm:$0xff]  ;;  %v355_v46 = vld [vmem:[%s549_s5 + $0x1] ss:$0 sm:$0xff] }
   0x7   :  { %369 = vmatmul.mubr.msk.f32.vlgmr.msra.gmra.mrb[0].mxu0 %vm46_vm2, %v345_v8  ;;  %387 = vmatpush3.bf16.msra.mxu1 %v386_v23  ;;  %v349_v3 = vld [vmem:[%s548_s4] ss:$0 sm:$0xff]  ;;  %v350_v5 = vld [vmem:[%s548_s4 + $0x2] ss:$0 sm:$0xff]  ;;  %s432_s4 = smov [#allocation3]  }
   0x8   :  { %v43_v9 = vld [vmem:[#allocation2] sm:$0xff]  ;;  %388 = vmatprep.subr.bf16.mxu1 %v427_v2  ;;  %s336_s29 = sshll.u32 %s432_s4, 4  ;;  %s337_s29 = int_to_ptr.vmem [resolvable:$true] %s336_s29 }
   0x9   :  { %v351_v7 = vld [vmem:[%s549_s5] ss:$0 sm:$0xff]  ;;  %s403_s5 = scalar_lea.vmem %s337_s29, 32  ;;  %p408_p1 = scmp.lt.s32.totalorder %s337_s29, %s337_s29 }
   0xa   :  { %p404_p0 = scmp.ne.s32.totalorder %s337_s29, %s403_s5  ;;  %p409_p2 = scmp.lt.s32.totalorder %s403_s5, %s403_s5 }
   0xb   :  { %390 = vmatpush3.bf16.msra.mxu1 %v389_v25 }
   0xc   :  { %p410_p3 = por %p409_p2, %p408_p1 }
   0xe   :  { %p411_p4 = pnand %p410_p3, %p404_p0 }
  0xda   :  { %v116_v10 = vpop.f32.mrb[0].mxu0 }
  0xdb   :  { %v120_v11 = vadd.f32 %v116_v10, %v43_v9  ;;  %v370_v12 = vpop.f32.mrb[1].mxu0 }
  0xdd   :  { %122 = vst.msk [vmem:[#allocation2] sm:$0xff] %vm31_vm0, %v120_v11 }
  0xe4   :  { %v126_v13 = vld [vmem:[#allocation2] sm:$0xff] }
  0xe5   :  { %v127_v14 = vsel %vm31_vm0, %v126_v13, 0.0 }
  0xe6   :  { %128 = vadd.xlane.f32.xlu0 %v127_v14 }
 0x173   :  { %v129_v15 = vpop.xlane.xlu0 %128 }
 0x174   :  { %v131_v16 = vmul.f32 0.03125, %v129_v15 }
 0x176   :  { %v132_v17 = vsub.f32 %v126_v13, %v131_v16  ;;  %v352_v13 = vld [vmem:[%s550_s6] ss:$0 sm:$0xff] }
 0x178   :  { %v133_v18 = vmul.f32 %v132_v17, %v132_v17 }
 0x17a   :  { %v134_v19 = vsel %vm31_vm0, %v133_v18, 0.0 }
 0x17b   :  { %135 = vadd.xlane.f32.xlu0 %v134_v19 }
 0x208   :  { %v136_v26 = vpop.xlane.xlu0 %135 }
 0x209   :  { %v137_v27 = vmul.f32 0.03125, %v136_v26 }
 0x20b   :  { %v138_v28 = vadd.f32 1e-05, %v137_v27 }
 0x20d   :  { %397 = vrsqrt.f32 %v138_v28 }
 0x217   :  { %v398_v29 = vpop.eup %397 }
 0x218   :  { %v140_v30 = vmul.f32 %v398_v29, %v132_v17 }
 0x21a   :  { %380 = vmatmul.mubr.msk.f32.vlgmr.msra.gmra.mrb[0].mxu1 %vm31_vm0, %v140_v30 }
 0x2ed   :  { %v221_v32 = vpop.f32.mrb[0].mxu1 }
 0x2ee   :  { %v222_v33 = vadd.f32 %v347_v31, %v221_v32  ;;  %v381_v34 = vpop.f32.mrb[1].mxu1 }
 0x2f0   :  { %270 = vrot.lane.b32.xlu1 %v222_v33, %s430_s2  ;;  %v227_v42 = vsel %vm31_vm0, %v222_v33, 0.0 }
 0x362   :  { %v271_v35 = vpop.permute.xlu1 %270 }
 0x363   :  { %v273_v36 = vsel %vm31_vm0, %v271_v35, 0.0 }
 0x364   :  { %274 = vadd.xlane.f32.xlu1 %v273_v36 }
 0x375   :  { %295 = vrot.lane.b32.xlu1 %v353_v37, %s431_s17 }
 0x3f1   :  { %v275_v38 = vpop.xlane.xlu1 %274 }
 0x3f2   :  { %v276_v39 = vmul.f32 0.03125, %v275_v38 }
 0x3f4   :  { %v277_v40 = vsub.f32 %v222_v33, %v276_v39 }
 0x3f5   :  { %v296_v52 = vpop.permute.xlu1 %295 }
 0x3f6   :  { %v278_v41 = vmul.f32 %v277_v40, %v277_v40 }
 0x3f8   :  { %280 = vrot.lane.b32.xlu0 %v278_v41, %s430_s2 }
 0x417   :  { %228 = vadd.xlane.f32.xlu0 %v227_v42 }
 0x42d   :  { %304 = vrot.lane.b32.xlu0 %v354_v43, %s431_s17 }
 0x46a   :  { %v281_v44 = vpop.permute.xlu0 %280 }
 0x46b   :  { %v283_v45 = vsel %vm31_vm0, %v281_v44, 0.0 }
 0x46c   :  { %284 = vadd.xlane.f32.xlu1 %v283_v45 }
 0x47d   :  { %314 = vrot.lane.b32.xlu1 %v355_v46, %s431_s17 }
 0x4a4   :  { %v229_v47 = vpop.xlane.xlu0 %228 }
 0x4a5   :  { %v230_v48 = vmul.f32 0.03125, %v229_v47 }
 0x4a7   :  { %v231_v49 = vsub.f32 %v222_v33, %v230_v48 }
 0x4a8   :  { %v305_v58 = vpop.permute.xlu0 %304 }
 0x4a9   :  { %v232_v50 = vmul.f32 %v231_v49, %v231_v49 }
 0x4ab   :  { %v233_v51 = vsel %vm31_vm0, %v232_v50, 0.0 }
 0x4ac   :  { %234 = vadd.xlane.f32.xlu1 %v233_v51 }
 0x4f9   :  { %v285_v53 = vpop.xlane.xlu1 %284 }
 0x4fa   :  { %v286_v54 = vmul.f32 0.03125, %v285_v53 }
 0x4fc   :  { %v287_v55 = vadd.f32 1e-05, %v286_v54 }
 0x4fd   :  { %v315_v60 = vpop.permute.xlu1 %314 }
 0x4fe   :  { %399 = vrsqrt.f32 %v287_v55 }
 0x508   :  { %v400_v56 = vpop.eup %399 }
 0x509   :  { %v289_v57 = vmul.f32 %v400_v56, %v277_v40 }
 0x50b   :  { %v298_v59 = vmul.f32 %v296_v52, %v289_v57 }
 0x50d   :  { %v307_v61 = vadd.f32 %v305_v58, %v298_v59 }
 0x50f   :  { %v317_v62 = vmul.f32 %v315_v60, %v307_v61 }
 0x511   :  { %319 = vrot.lane.b32.xlu0 %v317_v62, %s430_s2 }
 0x539   :  { %v235_v63 = vpop.xlane.xlu1 %234 }
 0x53a   :  { %v236_v0 = vmul.f32 0.03125, %v235_v63 }
 0x53c   :  { %v237_v1 = vadd.f32 1e-05, %v236_v0 }
 0x53e   :  { %401 = vrsqrt.f32 %v237_v1 }
 0x548   :  { %v402_v2 = vpop.eup %401 }
 0x549   :  { %v239_v4 = vmul.f32 %v402_v2, %v231_v49 }
 0x54b   :  { %v244_v6 = vmul.f32 %v349_v3, %v239_v4 }
 0x54d   :  { %v249_v8 = vadd.f32 %v350_v5, %v244_v6 }
 0x54f   :  { %v255_v9 = vmul.f32 %v351_v7, %v249_v8 }
 0x551   :  { %v256_v10 = vsel %vm31_vm0, %v255_v9, 0.0 }
 0x552   :  { %257 = vadd.xlane.f32.xlu0 %v256_v10 }
 0x583   :  { %v320_v11 = vpop.permute.xlu0 %319 }
 0x584   :  { %v322_v12 = vsel %vm31_vm0, %v320_v11, 0.0 }
 0x585   :  { %323 = vadd.xlane.f32.xlu1 %v322_v12 }
 0x5df   :  { %v258_v14 = vpop.xlane.xlu0 %257 }
 0x5e0   :  { %v266_v16 = vadd.f32 %v352_v13, %v258_v14 }
 0x612   :  { %v324_v15 = vpop.xlane.xlu1 %323 }
 0x613   :  { %v325_v17 = vadd.f32 %v352_v13, %v324_v15 }
 0x615   :  { %v327_v18 = vsel %vm326_vm4, %v266_v16, %v325_v17 }
 0x616   :  { %329 = vst.msk [vmem:[#allocation3] sm:$0x3] %vm328_vm5, %v327_v18 }
 0x617   :  { %414 = shalt.err (!%p411_p4)
}
 0x618   :  { %s415_s1 = scalar_lea.hbm %s551_s7, 32 }
 0x619   :  { %p416_p5 = scmp.ne.s32.totalorder %s551_s7, %s415_s1  ;;  %p419_p6 = scmp.lt.u32.totalorder %s415_s1, %s551_s7 }
 0x61b   :  { %p421_p7 = pnand %p419_p6, %p416_p5 }
 0x61d   :  { %424 = shalt.err (!%p421_p7)
}
 0x61e   :  { %339 = dma.vmem_to_hbm [thread:$0]  %s337_s29, 32, %s551_s7, [#allocation4]  }
 0x61f   :  { %425 = dma.done.wait [#allocation4], 32  }
 0x620   :  { %426 = vsyncadd [#allocation4], 4294967264 }
 0x621   :  { %343 = vsyncpa [#allocation4], 1 }

</bundles_post_ra>
